<compile_context>
chip_gen: v7x
topology: tpu7x:2x2x1
jax: 0.10.0
libtpu: 0.0.40
codegen_flags: <defaults>
</compile_context>

<pallas_src>
import functools
import math

import numpy as np
import jax
import jax.numpy as jnp
from jax import lax
from jax.experimental import pallas as pl
from jax.experimental.pallas import tpu as pltpu

# ---------------- synthetic config ----------------
INPUT_CH = 1
OUTPUT_CH = 4
CONV_LAYER = 3
NUM_PLANE = 3
NUM_QUAT = 3
NUM_HEADS = NUM_PLANE + NUM_QUAT
VOXEL = 8           # 8 -> 4 -> 2 -> 1
BATCH = 2
NEG_SLOPE = 0.2
NORM_EPS = 1e-12

CONV_DTYPE = jnp.bfloat16   # Toeplitz conv weights + conv matmul operand dtype
OUT_PAD = 128               # lane-dense output width (real outputs = 24 cols)


# ---------------- static layer geometry ----------------

def _layer_geometry():
    layers = []
    v, cin, cin_stride, cout = VOXEL, INPUT_CH, INPUT_CH, OUTPUT_CH
    for _ in range(CONV_LAYER):
        vh = v // 2
        # pad cout so each pool slab (vh^3 * cout_stride lanes) is 128-aligned
        req = 128 // math.gcd(vh ** 3, 128)
        cout_stride = ((cout + req - 1) // req) * req
        layers.append(dict(v=v, vh=vh, cin=cin, cin_stride=cin_stride,
                           cout=cout, cout_stride=cout_stride,
                           slab=vh ** 3 * cout_stride))
        v, cin, cin_stride, cout = vh, cout, cout_stride, cout * 2
    return layers


LAYERS = _layer_geometry()                       # [(8,1,4),(4,4,8),(2,8,16)] (+padding)
POOL_SLABS = tuple(l['slab'] for l in LAYERS)    # (256, 128, 128)  -- all %128 == 0
FEAT = LAYERS[-1]['cout']                        # 16  (true feature dim)
FEAT_STRIDE = LAYERS[-1]['cout_stride']          # 128 (lane-padded feature dim)


# ---------------- fused Pallas kernel ----------------

def _lrelu(x):
    return jnp.where(x > 0, x, NEG_SLOPE * x)


def prsnet_fused_kernel(*refs, pool_slabs):
    """Whole PRS-Net forward.

    refs layout (all VMEM, whole-array):
      x            [B_pad, V^3*Cin]                       (f32)
      (W_l, b_l)*3 W_l: [in_l, 8*slab_l] Toeplitz conv matrix (bf16); output
                   columns ordered (pool-corner(8), d', h', w', cout_pad) so
                   the 2x2x2 max-pool is a max over 8 contiguous, 128-aligned
                   lane slabs.  b_l: [1, slab_l] bias tiled over pooled voxels
                   (zeros in the channel padding lanes)  (f32).
      hW1,hb1,hW2,hb2,hW3,hb3   6 heads batched (W2/W3 block-diagonal); W3/b3
                   lane-padded to OUT_PAD columns (zeros)            (f32).
      nrm          [OUT_PAD, OUT_PAD] block matrix: (y*y) @ nrm = per-head sum
                   of squares of the components used by normalize(), broadcast
                   to the head's 4 columns (planes use 3 comps, quats 4).
      o_ref        [B_pad, OUT_PAD]  (6 heads x 4 in the first 24 lanes),
                   normalized; padded lanes are 0.
    """
    n_layers = len(pool_slabs)
    x_ref = refs[0]
    conv_refs = refs[1:1 + 2 * n_layers]
    hw1, hb1, hw2, hb2, hw3, hb3, nrm = refs[1 + 2 * n_layers:1 + 2 * n_layers + 7]
    o_ref = refs[1 + 2 * n_layers + 7]

    x = x_ref[...]
    for l in range(n_layers):
        w_ref, b_ref = conv_refs[2 * l], conv_refs[2 * l + 1]
        g = pool_slabs[l]
        # conv3d as one native-bf16 MXU matmul (Toeplitz-expanded weights),
        # f32 accumulation.
        y = jnp.dot(x.astype(CONV_DTYPE), w_ref[...],
                    preferred_element_type=jnp.float32)
        # 2x2x2 max-pool = max over 8 contiguous lane slabs (128-aligned)
        m = y[:, 0:g]
        for k in range(1, 8):
            m = jnp.maximum(m, y[:, k * g:(k + 1) * g])
        # bias after the pool (identical math, 8x fewer adds), then LeakyReLU
        x = _lrelu(m + b_ref[...])

    # batched MLP heads: Linear -> LReLU -> Linear -> LReLU -> Linear (f32)
    h = _lrelu(jnp.dot(x, hw1[...], preferred_element_type=jnp.float32) + hb1[...])
    h = _lrelu(jnp.dot(h, hw2[...], preferred_element_type=jnp.float32) + hb2[...])
    y = jnp.dot(h, hw3[...], preferred_element_type=jnp.float32) + hb3[...]
    # normalize(x, d) = x / ||x[:, :d]||  (d=3 planes, d=4 quats), via
    # sum-of-squares matmul + rsqrt (EUP slot, no divide).
    ss = jnp.dot(y * y, nrm[...], preferred_element_type=jnp.float32)
    # padded columns of y are exactly 0, so they stay 0 after scaling.
    o_ref[...] = y * lax.rsqrt(jnp.maximum(ss, NORM_EPS))


# ---------------- pallas_call wrapper ----------------

@jax.jit
def prsnet_forward(x_ncdhw, fused_ops):
    # x_ncdhw: [B, Cin, D, H, W] (PyTorch NCDHW layout)
    b = x_ncdhw.shape[0]
    b_pad = ((b + 7) // 8) * 8                       # sublane-dense batch
    x2d = jnp.transpose(x_ncdhw, (0, 2, 3, 4, 1)).reshape(b, -1)  # cols = (d,h,w,c)
    x2d = jnp.pad(x2d, ((0, b_pad - b), (0, 0)))
    out = pl.pallas_call(
        functools.partial(prsnet_fused_kernel, pool_slabs=POOL_SLABS),
        out_shape=jax.ShapeDtypeStruct((b_pad, OUT_PAD), jnp.float32),
        in_specs=[pl.BlockSpec(memory_space=pltpu.MemorySpace.VMEM)]
                 * (1 + len(fused_ops)),
        out_specs=pl.BlockSpec(memory_space=pltpu.MemorySpace.VMEM),
        compiler_params=pltpu.CompilerParams(vmem_limit_bytes=32 * 1024 * 1024),
    )(x2d, *fused_ops)
    out = out[:b, :4 * NUM_HEADS]
    planes = [out[:, 4 * i:4 * (i + 1)] for i in range(NUM_PLANE)]
    quats = [out[:, 4 * (NUM_PLANE + i):4 * (NUM_PLANE + i + 1)]
             for i in range(NUM_QUAT)]
    return planes, quats


# ---------------- host-side (one-time) weight preparation ----------------

def build_conv_pool_matrix(w, v, cin, cin_stride, cout, cout_stride):
    """w: [3,3,3,cin,cout].  Returns M [v^3*cin_stride, 8*(v//2)^3*cout_stride]
    such that for row-vectors x whose columns are ordered
    (d, h, w, ci) with stride cin_stride,  y = x @ M  has columns ordered
    (corner k=(ad,ah,aw), d', h', w', co) and
    y[:, col] = Conv3d(x, pad=1)[2d'+ad, 2h'+ah, 2w'+aw, co]  (no bias)."""
    w = np.asarray(w, np.float32)
    vh = v // 2
    m = np.zeros((v ** 3 * cin_stride, 8 * vh ** 3 * cout_stride), np.float32)
    qd, qh, qw = [a.ravel() for a in np.meshgrid(np.arange(vh), np.arange(vh),
                                                 np.arange(vh), indexing='ij')]
    pooled = (qd * vh + qh) * vh + qw
    ci = np.arange(cin)
    co = np.arange(cout)
    for ad in range(2):
        for ah in range(2):
            for aw in range(2):
                k = (ad * 2 + ah) * 2 + aw
                od, oh, ow = 2 * qd + ad, 2 * qh + ah, 2 * qw + aw
                for kd in range(3):
                    for kh in range(3):
                        for kw in range(3):
                            idd, ihh, iww = od + kd - 1, oh + kh - 1, ow + kw - 1
                            valid = ((idd >= 0) & (idd < v) & (ihh >= 0) & (ihh < v)
                                     & (iww >= 0) & (iww < v))
                            if not np.any(valid):
                                continue
                            in_base = ((idd[valid] * v + ihh[valid]) * v
                                       + iww[valid]) * cin_stride
                            out_base = (k * vh ** 3 + pooled[valid]) * cout_stride
                            rows = in_base[:, None, None] + ci[None, :, None]
                            cols = out_base[:, None, None] + co[None, None, :]
                            m[rows, cols] = w[kd, kh, kw]
    return m


def build_fused_heads(plane_heads, quat_heads):
    heads = list(plane_heads) + list(quat_heads)
    nh = len(heads)
    h1 = heads[0][0].shape[1]        # feat // 2
    h2 = heads[0][2].shape[1]        # feat // 4
    w1 = np.zeros((FEAT_STRIDE, nh * h1), np.float32)
    w2 = np.zeros((nh * h1, nh * h2), np.float32)
    w3 = np.zeros((nh * h2, OUT_PAD), np.float32)          # lane-padded output
    b1 = np.concatenate([np.asarray(h[1]) for h in heads], axis=1).astype(np.float32)
    b2 = np.concatenate([np.asarray(h[3]) for h in heads], axis=1).astype(np.float32)
    b3 = np.zeros((1, OUT_PAD), np.float32)
    b3[:, :nh * 4] = np.concatenate([np.asarray(h[5]) for h in heads], axis=1)
    for i, hd in enumerate(heads):
        w1[:FEAT, i * h1:(i + 1) * h1] = np.asarray(hd[0])
        w2[i * h1:(i + 1) * h1, i * h2:(i + 1) * h2] = np.asarray(hd[2])
        w3[i * h2:(i + 1) * h2, i * 4:(i + 1) * 4] = np.asarray(hd[4])
    # normalization helper: ss = (y*y) @ S  -> per-head sum of squares
    s = np.zeros((OUT_PAD, OUT_PAD), np.float32)
    for i in range(nh):
        nd = 3 if i < NUM_PLANE else 4      # planes normalize over 3, quats over 4
        s[i * 4:i * 4 + nd, i * 4:(i + 1) * 4] = 1.0
    return w1, b1, w2, b2, w3, b3, s


def prepare_fused_params(params):
    ops = []
    for geo, (w, b) in zip(LAYERS, params['conv']):
        big_w = build_conv_pool_matrix(w, geo['v'], geo['cin'], geo['cin_stride'],
                                       geo['cout'], geo['cout_stride'])
        bp = np.zeros(geo['cout_stride'], np.float32)
        bp[:geo['cout']] = np.asarray(b)
        bias = np.tile(bp, geo['vh'] ** 3).reshape(1, -1)
        # conv Toeplitz weights in bf16 (dominant HBM traffic), bias stays f32
        ops += [jnp.asarray(big_w, CONV_DTYPE), jnp.asarray(bias, jnp.float32)]
    ops += [jnp.asarray(a, jnp.float32)
            for a in build_fused_heads(params['plane'], params['quat'])]
    return tuple(ops)


# ---------------- pure-JAX reference (correctness check) ----------------

def prsnet_reference(x_ncdhw, params):
    x = jnp.transpose(x_ncdhw, (0, 2, 3, 4, 1))
    for (w, b) in params['conv']:
        x = lax.conv_general_dilated(
            x, w, window_strides=(1, 1, 1), padding=[(1, 1)] * 3,
            dimension_numbers=('NDHWC', 'DHWIO', 'NDHWC'),
            precision=lax.Precision.HIGHEST) + b
        x = lax.reduce_window(x, -jnp.inf, lax.max, (1, 2, 2, 2, 1),
                              (1, 2, 2, 2, 1), 'VALID')
        x = jnp.where(x > 0, x, NEG_SLOPE * x)
    feat = x.reshape(x.shape[0], -1)

    def head(hp, nd):
        w1, b1, w2, b2, w3, b3 = hp
        h = feat @ w1 + b1
        h = jnp.where(h > 0, h, NEG_SLOPE * h)
        h = h @ w2 + b2
        h = jnp.where(h > 0, h, NEG_SLOPE * h)
        y = h @ w3 + b3
        n = jnp.sqrt(jnp.sum(y[:, :nd] ** 2, axis=1, keepdims=True))
        return y / jnp.maximum(n, 1e-6)

    planes = [head(p, 3) for p in params['plane']]
    quats = [head(q, 4) for q in params['quat']]
    return planes, quats


# ---------------- deterministic parameter init ----------------

def make_head(key, feat, last_bias, zero_last_weight):
    k1, k2, k3, k4, k5 = jax.random.split(key, 5)
    h1, h2 = feat // 2, feat // 4
    w1 = jax.random.normal(k1, (feat, h1), jnp.float32) / np.sqrt(feat)
    b1 = jax.random.normal(k2, (1, h1), jnp.float32) * 0.01
    w2 = jax.random.normal(k3, (h1, h2), jnp.float32) / np.sqrt(h1)
    b2 = jax.random.normal(k4, (1, h2), jnp.float32) * 0.01
    if zero_last_weight:
        w3 = jnp.zeros((h2, 4), jnp.float32)   # last.weight.data = zeros (planes)
    else:
        w3 = jax.random.normal(k5, (h2, 4), jnp.float32) / np.sqrt(h2)
    b3 = jnp.asarray(last_bias, jnp.float32).reshape(1, 4)
    return (w1, b1, w2, b2, w3, b3)


def init_params(key):
    s = float(np.sin(np.pi / 2))
    bias_terms = {
        'plane1': [1.0, 0.0, 0.0, 0.0],
        'plane2': [0.0, 1.0, 0.0, 0.0],
        'plane3': [0.0, 0.0, 1.0, 0.0],
        'quat1': [0.0, 0.0, 0.0, s],
        'quat2': [0.0, 0.0, s, 0.0],
        'quat3': [0.0, s, 0.0, 0.0],
    }
    params = {'conv': [], 'plane': [], 'quat': []}
    in_ch, out_ch = INPUT_CH, OUTPUT_CH
    k = key
    for _ in range(CONV_LAYER):
        k, k1, k2 = jax.random.split(k, 3)
        fan_in = in_ch * 27
        w = jax.random.normal(k1, (3, 3, 3, in_ch, out_ch), jnp.float32) / np.sqrt(fan_in)
        b = jax.random.normal(k2, (out_ch,), jnp.float32) * 0.01
        params['conv'].append((w, b))
        in_ch = out_ch
        out_ch *= 2
    assert in_ch == FEAT
    for i in range(NUM_PLANE):
        k, kh = jax.random.split(k)
        params['plane'].append(
            make_head(kh, FEAT, bias_terms['plane' + str(i + 1)], zero_last_weight=True))
    for i in range(NUM_QUAT):
        k, kh = jax.random.split(k)
        params['quat'].append(
            make_head(kh, FEAT, bias_terms['quat' + str(i + 1)], zero_last_weight=False))
    return params


if __name__ == "__main__":
    key = jax.random.PRNGKey(0)
    kp, kx = jax.random.split(key)
    params = init_params(kp)
    fused_ops = prepare_fused_params(params)           # one-time host-side prep
    x = jax.random.normal(kx, (BATCH, INPUT_CH, VOXEL, VOXEL, VOXEL), jnp.float32)

    planes, quats = prsnet_forward(x, fused_ops)
    jax.block_until_ready(planes)
    jax.block_until_ready(quats)

    assert len(planes) == NUM_PLANE and len(quats) == NUM_QUAT
    assert all(p.shape == (BATCH, 4) for p in planes)
    assert all(q.shape == (BATCH, 4) for q in quats)

    # correctness vs. a pure-JAX f32 reference of the PyTorch forward pass
    # (conv path runs in bf16 on the MXU, hence the 5e-2 tolerance)
    ref_planes, ref_quats = jax.jit(prsnet_reference)(x, params)
    for got, want in zip(planes + quats, ref_planes + ref_quats):
        np.testing.assert_allclose(np.asarray(got), np.asarray(want),
                                   rtol=5e-2, atol=5e-2)

    # plane heads have zero last-layer weights -> output == normalized bias
    np.testing.assert_allclose(
        np.asarray(planes[0]),
        np.tile(np.array([1.0, 0.0, 0.0, 0.0], np.float32), (BATCH, 1)),
        atol=1e-5)

    print("KERNEL_OK")
</pallas_src>

<mosaic_0001>
module attributes {stable_mosaic.version = 11 : i64} {
  func.func @prsnet_fused_kernel(%arg0: memref<8x512xf32, #tpu.memory_space<vmem>>, %arg1: memref<512x2048xbf16, #tpu.memory_space<vmem>>, %arg2: memref<1x256xf32, #tpu.memory_space<vmem>>, %arg3: memref<256x1024xbf16, #tpu.memory_space<vmem>>, %arg4: memref<1x128xf32, #tpu.memory_space<vmem>>, %arg5: memref<128x1024xbf16, #tpu.memory_space<vmem>>, %arg6: memref<1x128xf32, #tpu.memory_space<vmem>>, %arg7: memref<128x48xf32, #tpu.memory_space<vmem>>, %arg8: memref<1x48xf32, #tpu.memory_space<vmem>>, %arg9: memref<48x24xf32, #tpu.memory_space<vmem>>, %arg10: memref<1x24xf32, #tpu.memory_space<vmem>>, %arg11: memref<24x128xf32, #tpu.memory_space<vmem>>, %arg12: memref<1x128xf32, #tpu.memory_space<vmem>>, %arg13: memref<128x128xf32, #tpu.memory_space<vmem>>, %arg14: memref<8x128xf32, #tpu.memory_space<vmem>>) attributes {dimension_semantics = [], scalar_prefetch = 0 : i64, scratch_operands = 0 : i64, tpu.core_type = #tpu.core_type<tc>} {
    %c0 = arith.constant 0 : index
    %c0_0 = arith.constant 0 : index
    %0 = vector.load %arg0[%c0, %c0_0] : memref<8x512xf32, #tpu.memory_space<vmem>>, vector<8x512xf32>
    %1 = arith.truncf %0 : vector<8x512xf32> to vector<8x512xbf16>
    %c0_1 = arith.constant 0 : index
    %c0_2 = arith.constant 0 : index
    %2 = vector.load %arg1[%c0_1, %c0_2] : memref<512x2048xbf16, #tpu.memory_space<vmem>>, vector<512x2048xbf16>
    %cst = arith.constant dense<0.000000e+00> : vector<8x2048xf32>
    %3 = tpu.matmul %1, %2, %cst {dimension_numbers = #tpu.dot_dimension_numbers<[1], [0], [0], [1], [0, 0, 1, 1], [], []>} : vector<8x512xbf16>, vector<512x2048xbf16>, vector<8x2048xf32> -> vector<8x2048xf32>
    %4 = vector.extract_strided_slice %3 {offsets = [0, 0], sizes = [8, 256], strides = [1, 1]} : vector<8x2048xf32> to vector<8x256xf32>
    %5 = vector.extract_strided_slice %3 {offsets = [0, 256], sizes = [8, 256], strides = [1, 1]} : vector<8x2048xf32> to vector<8x256xf32>
    %6 = arith.maximumf %4, %5 : vector<8x256xf32>
    %7 = vector.extract_strided_slice %3 {offsets = [0, 512], sizes = [8, 256], strides = [1, 1]} : vector<8x2048xf32> to vector<8x256xf32>
    %8 = arith.maximumf %6, %7 : vector<8x256xf32>
    %9 = vector.extract_strided_slice %3 {offsets = [0, 768], sizes = [8, 256], strides = [1, 1]} : vector<8x2048xf32> to vector<8x256xf32>
    %10 = arith.maximumf %8, %9 : vector<8x256xf32>
    %11 = vector.extract_strided_slice %3 {offsets = [0, 1024], sizes = [8, 256], strides = [1, 1]} : vector<8x2048xf32> to vector<8x256xf32>
    %12 = arith.maximumf %10, %11 : vector<8x256xf32>
    %13 = vector.extract_strided_slice %3 {offsets = [0, 1280], sizes = [8, 256], strides = [1, 1]} : vector<8x2048xf32> to vector<8x256xf32>
    %14 = arith.maximumf %12, %13 : vector<8x256xf32>
    %15 = vector.extract_strided_slice %3 {offsets = [0, 1536], sizes = [8, 256], strides = [1, 1]} : vector<8x2048xf32> to vector<8x256xf32>
    %16 = arith.maximumf %14, %15 : vector<8x256xf32>
    %17 = vector.extract_strided_slice %3 {offsets = [0, 1792], sizes = [8, 256], strides = [1, 1]} : vector<8x2048xf32> to vector<8x256xf32>
    %18 = arith.maximumf %16, %17 : vector<8x256xf32>
    %c0_3 = arith.constant 0 : index
    %c0_4 = arith.constant 0 : index
    %19 = vector.load %arg2[%c0_3, %c0_4] : memref<1x256xf32, #tpu.memory_space<vmem>>, vector<1x256xf32>
    %20 = vector.broadcast %19 : vector<1x256xf32> to vector<8x256xf32>
    %21 = arith.addf %18, %20 : vector<8x256xf32>
    %cst_5 = arith.constant 0.000000e+00 : f32
    %22 = vector.broadcast %cst_5 : f32 to vector<8x256xf32>
    %23 = arith.cmpf ogt, %21, %22 : vector<8x256xf32>
    %cst_6 = arith.constant 2.000000e-01 : f32
    %24 = vector.broadcast %cst_6 : f32 to vector<8x256xf32>
    %25 = arith.mulf %24, %21 : vector<8x256xf32>
    %26 = arith.select %23, %21, %25 : vector<8x256xi1>, vector<8x256xf32>
    %27 = arith.truncf %26 : vector<8x256xf32> to vector<8x256xbf16>
    %c0_7 = arith.constant 0 : index
    %c0_8 = arith.constant 0 : index
    %28 = vector.load %arg3[%c0_7, %c0_8] : memref<256x1024xbf16, #tpu.memory_space<vmem>>, vector<256x1024xbf16>
    %cst_9 = arith.constant dense<0.000000e+00> : vector<8x1024xf32>
    %29 = tpu.matmul %27, %28, %cst_9 {dimension_numbers = #tpu.dot_dimension_numbers<[1], [0], [0], [1], [0, 0, 1, 1], [], []>} : vector<8x256xbf16>, vector<256x1024xbf16>, vector<8x1024xf32> -> vector<8x1024xf32>
    %30 = vector.extract_strided_slice %29 {offsets = [0, 0], sizes = [8, 128], strides = [1, 1]} : vector<8x1024xf32> to vector<8x128xf32>
    %31 = vector.extract_strided_slice %29 {offsets = [0, 128], sizes = [8, 128], strides = [1, 1]} : vector<8x1024xf32> to vector<8x128xf32>
    %32 = arith.maximumf %30, %31 : vector<8x128xf32>
    %33 = vector.extract_strided_slice %29 {offsets = [0, 256], sizes = [8, 128], strides = [1, 1]} : vector<8x1024xf32> to vector<8x128xf32>
    %34 = arith.maximumf %32, %33 : vector<8x128xf32>
    %35 = vector.extract_strided_slice %29 {offsets = [0, 384], sizes = [8, 128], strides = [1, 1]} : vector<8x1024xf32> to vector<8x128xf32>
    %36 = arith.maximumf %34, %35 : vector<8x128xf32>
    %37 = vector.extract_strided_slice %29 {offsets = [0, 512], sizes = [8, 128], strides = [1, 1]} : vector<8x1024xf32> to vector<8x128xf32>
    %38 = arith.maximumf %36, %37 : vector<8x128xf32>
    %39 = vector.extract_strided_slice %29 {offsets = [0, 640], sizes = [8, 128], strides = [1, 1]} : vector<8x1024xf32> to vector<8x128xf32>
    %40 = arith.maximumf %38, %39 : vector<8x128xf32>
    %41 = vector.extract_strided_slice %29 {offsets = [0, 768], sizes = [8, 128], strides = [1, 1]} : vector<8x1024xf32> to vector<8x128xf32>
    %42 = arith.maximumf %40, %41 : vector<8x128xf32>
    %43 = vector.extract_strided_slice %29 {offsets = [0, 896], sizes = [8, 128], strides = [1, 1]} : vector<8x1024xf32> to vector<8x128xf32>
    %44 = arith.maximumf %42, %43 : vector<8x128xf32>
    %c0_10 = arith.constant 0 : index
    %c0_11 = arith.constant 0 : index
    %45 = vector.load %arg4[%c0_10, %c0_11] : memref<1x128xf32, #tpu.memory_space<vmem>>, vector<1x128xf32>
    %46 = vector.broadcast %45 : vector<1x128xf32> to vector<8x128xf32>
    %47 = arith.addf %44, %46 : vector<8x128xf32>
    %cst_12 = arith.constant 0.000000e+00 : f32
    %48 = vector.broadcast %cst_12 : f32 to vector<8x128xf32>
    %49 = arith.cmpf ogt, %47, %48 : vector<8x128xf32>
    %cst_13 = arith.constant 2.000000e-01 : f32
    %50 = vector.broadcast %cst_13 : f32 to vector<8x128xf32>
    %51 = arith.mulf %50, %47 : vector<8x128xf32>
    %52 = arith.select %49, %47, %51 : vector<8x128xi1>, vector<8x128xf32>
    %53 = arith.truncf %52 : vector<8x128xf32> to vector<8x128xbf16>
    %c0_14 = arith.constant 0 : index
    %c0_15 = arith.constant 0 : index
    %54 = vector.load %arg5[%c0_14, %c0_15] : memref<128x1024xbf16, #tpu.memory_space<vmem>>, vector<128x1024xbf16>
    %cst_16 = arith.constant dense<0.000000e+00> : vector<8x1024xf32>
    %55 = tpu.matmul %53, %54, %cst_16 {dimension_numbers = #tpu.dot_dimension_numbers<[1], [0], [0], [1], [0, 0, 1, 1], [], []>} : vector<8x128xbf16>, vector<128x1024xbf16>, vector<8x1024xf32> -> vector<8x1024xf32>
    %56 = vector.extract_strided_slice %55 {offsets = [0, 0], sizes = [8, 128], strides = [1, 1]} : vector<8x1024xf32> to vector<8x128xf32>
    %57 = vector.extract_strided_slice %55 {offsets = [0, 128], sizes = [8, 128], strides = [1, 1]} : vector<8x1024xf32> to vector<8x128xf32>
    %58 = arith.maximumf %56, %57 : vector<8x128xf32>
    %59 = vector.extract_strided_slice %55 {offsets = [0, 256], sizes = [8, 128], strides = [1, 1]} : vector<8x1024xf32> to vector<8x128xf32>
    %60 = arith.maximumf %58, %59 : vector<8x128xf32>
    %61 = vector.extract_strided_slice %55 {offsets = [0, 384], sizes = [8, 128], strides = [1, 1]} : vector<8x1024xf32> to vector<8x128xf32>
    %62 = arith.maximumf %60, %61 : vector<8x128xf32>
    %63 = vector.extract_strided_slice %55 {offsets = [0, 512], sizes = [8, 128], strides = [1, 1]} : vector<8x1024xf32> to vector<8x128xf32>
    %64 = arith.maximumf %62, %63 : vector<8x128xf32>
    %65 = vector.extract_strided_slice %55 {offsets = [0, 640], sizes = [8, 128], strides = [1, 1]} : vector<8x1024xf32> to vector<8x128xf32>
    %66 = arith.maximumf %64, %65 : vector<8x128xf32>
    %67 = vector.extract_strided_slice %55 {offsets = [0, 768], sizes = [8, 128], strides = [1, 1]} : vector<8x1024xf32> to vector<8x128xf32>
    %68 = arith.maximumf %66, %67 : vector<8x128xf32>
    %69 = vector.extract_strided_slice %55 {offsets = [0, 896], sizes = [8, 128], strides = [1, 1]} : vector<8x1024xf32> to vector<8x128xf32>
    %70 = arith.maximumf %68, %69 : vector<8x128xf32>
    %c0_17 = arith.constant 0 : index
    %c0_18 = arith.constant 0 : index
    %71 = vector.load %arg6[%c0_17, %c0_18] : memref<1x128xf32, #tpu.memory_space<vmem>>, vector<1x128xf32>
    %72 = vector.broadcast %71 : vector<1x128xf32> to vector<8x128xf32>
    %73 = arith.addf %70, %72 : vector<8x128xf32>
    %cst_19 = arith.constant 0.000000e+00 : f32
    %74 = vector.broadcast %cst_19 : f32 to vector<8x128xf32>
    %75 = arith.cmpf ogt, %73, %74 : vector<8x128xf32>
    %cst_20 = arith.constant 2.000000e-01 : f32
    %76 = vector.broadcast %cst_20 : f32 to vector<8x128xf32>
    %77 = arith.mulf %76, %73 : vector<8x128xf32>
    %78 = arith.select %75, %73, %77 : vector<8x128xi1>, vector<8x128xf32>
    %c0_21 = arith.constant 0 : index
    %c0_22 = arith.constant 0 : index
    %79 = vector.load %arg7[%c0_21, %c0_22] : memref<128x48xf32, #tpu.memory_space<vmem>>, vector<128x48xf32>
    %cst_23 = arith.constant dense<0.000000e+00> : vector<8x48xf32>
    %80 = tpu.matmul %78, %79, %cst_23 {dimension_numbers = #tpu.dot_dimension_numbers<[1], [0], [0], [1], [0, 0, 1, 1], [], []>} : vector<8x128xf32>, vector<128x48xf32>, vector<8x48xf32> -> vector<8x48xf32>
    %c0_24 = arith.constant 0 : index
    %c0_25 = arith.constant 0 : index
    %81 = vector.load %arg8[%c0_24, %c0_25] : memref<1x48xf32, #tpu.memory_space<vmem>>, vector<1x48xf32>
    %82 = vector.broadcast %81 : vector<1x48xf32> to vector<8x48xf32>
    %83 = arith.addf %80, %82 : vector<8x48xf32>
    %cst_26 = arith.constant 0.000000e+00 : f32
    %84 = vector.broadcast %cst_26 : f32 to vector<8x48xf32>
    %85 = arith.cmpf ogt, %83, %84 : vector<8x48xf32>
    %cst_27 = arith.constant 2.000000e-01 : f32
    %86 = vector.broadcast %cst_27 : f32 to vector<8x48xf32>
    %87 = arith.mulf %86, %83 : vector<8x48xf32>
    %88 = arith.select %85, %83, %87 : vector<8x48xi1>, vector<8x48xf32>
    %c0_28 = arith.constant 0 : index
    %c0_29 = arith.constant 0 : index
    %89 = vector.load %arg9[%c0_28, %c0_29] : memref<48x24xf32, #tpu.memory_space<vmem>>, vector<48x24xf32>
    %cst_30 = arith.constant dense<0.000000e+00> : vector<8x24xf32>
    %90 = tpu.matmul %88, %89, %cst_30 {dimension_numbers = #tpu.dot_dimension_numbers<[1], [0], [0], [1], [0, 0, 1, 1], [], []>} : vector<8x48xf32>, vector<48x24xf32>, vector<8x24xf32> -> vector<8x24xf32>
    %c0_31 = arith.constant 0 : index
    %c0_32 = arith.constant 0 : index
    %91 = vector.load %arg10[%c0_31, %c0_32] : memref<1x24xf32, #tpu.memory_space<vmem>>, vector<1x24xf32>
    %92 = vector.broadcast %91 : vector<1x24xf32> to vector<8x24xf32>
    %93 = arith.addf %90, %92 : vector<8x24xf32>
    %cst_33 = arith.constant 0.000000e+00 : f32
    %94 = vector.broadcast %cst_33 : f32 to vector<8x24xf32>
    %95 = arith.cmpf ogt, %93, %94 : vector<8x24xf32>
    %cst_34 = arith.constant 2.000000e-01 : f32
    %96 = vector.broadcast %cst_34 : f32 to vector<8x24xf32>
    %97 = arith.mulf %96, %93 : vector<8x24xf32>
    %98 = arith.select %95, %93, %97 : vector<8x24xi1>, vector<8x24xf32>
    %c0_35 = arith.constant 0 : index
    %c0_36 = arith.constant 0 : index
    %99 = vector.load %arg11[%c0_35, %c0_36] : memref<24x128xf32, #tpu.memory_space<vmem>>, vector<24x128xf32>
    %cst_37 = arith.constant dense<0.000000e+00> : vector<8x128xf32>
    %100 = tpu.matmul %98, %99, %cst_37 {dimension_numbers = #tpu.dot_dimension_numbers<[1], [0], [0], [1], [0, 0, 1, 1], [], []>} : vector<8x24xf32>, vector<24x128xf32>, vector<8x128xf32> -> vector<8x128xf32>
    %c0_38 = arith.constant 0 : index
    %c0_39 = arith.constant 0 : index
    %101 = vector.load %arg12[%c0_38, %c0_39] : memref<1x128xf32, #tpu.memory_space<vmem>>, vector<1x128xf32>
    %102 = vector.broadcast %101 : vector<1x128xf32> to vector<8x128xf32>
    %103 = arith.addf %100, %102 : vector<8x128xf32>
    %104 = arith.mulf %103, %103 : vector<8x128xf32>
    %c0_40 = arith.constant 0 : index
    %c0_41 = arith.constant 0 : index
    %105 = vector.load %arg13[%c0_40, %c0_41] : memref<128x128xf32, #tpu.memory_space<vmem>>, vector<128x128xf32>
    %cst_42 = arith.constant dense<0.000000e+00> : vector<8x128xf32>
    %106 = tpu.matmul %104, %105, %cst_42 {dimension_numbers = #tpu.dot_dimension_numbers<[1], [0], [0], [1], [0, 0, 1, 1], [], []>} : vector<8x128xf32>, vector<128x128xf32>, vector<8x128xf32> -> vector<8x128xf32>
    %cst_43 = arith.constant 9.99999996E-13 : f32
    %107 = vector.broadcast %cst_43 : f32 to vector<8x128xf32>
    %108 = arith.maximumf %106, %107 : vector<8x128xf32>
    %109 = math.rsqrt %108 : vector<8x128xf32>
    %110 = arith.mulf %103, %109 : vector<8x128xf32>
    %c0_44 = arith.constant 0 : index
    %c0_45 = arith.constant 0 : index
    %111 = vector.load %arg14[%c0_44, %c0_45] : memref<8x128xf32, #tpu.memory_space<vmem>>, vector<8x128xf32>
    tpu.vector_store %arg14[%c0_44, %c0_45], %110 {strides = array<i32>} : memref<8x128xf32, #tpu.memory_space<vmem>>, vector<8x128xf32>,
    return
  }
}

</mosaic_0001>

<bundles_post_ra>
// kernel: prsnet_forward.1
= control target key start
LH: loop header
LB: loop body
LE: loop exit
PB: predicated region body
PF: predicated region fallthrough
CT: control target
= control target key end

     0   :  { %19 = vsyncpa [#allocation3], 0  ;;  %s7497_s0 = inlined_call_operand.vmem [shape: f32[8,512], index: 0, kind: input, shape index: {}]   ;;  %s7498_s1 = inlined_call_operand.hbm [shape: bf16[512,2048], index: 1, kind: input, shape index: {}]   ;;  %s7499_s2 = inlined_call_operand.hbm [shape: f32[1,256], index: 2, kind: input, shape index: {}]   ;;  %s7500_s3 = inlined_call_operand.hbm [shape: bf16[256,1024], index: 3, kind: input, shape index: {}]   ;;  %s7501_s4 = inlined_call_operand.hbm [shape: f32[1,128], index: 4, kind: input, shape index: {}]   ;;  %s7502_s5 = inlined_call_operand.hbm [shape: bf16[128,1024], index: 5, kind: input, shape index: {}]   ;;  %s7503_s6 = inlined_call_operand.hbm [shape: f32[1,128], index: 6, kind: input, shape index: {}]   ;;  %s7504_s7 = inlined_call_operand.vmem [shape: f32[128,48], index: 7, kind: input, shape index: {}]   ;;  %s7505_s8 = inlined_call_operand.hbm [shape: f32[1,48], index: 8, kind: input, shape index: {}]   ;;  %s7506_s9 = inlined_call_operand.vmem [shape: f32[48,24], index: 9, kind: input, shape index: {}]   ;;  %s7507_s10 = inlined_call_operand.hbm [shape: f32[1,24], index: 10, kind: input, shape index: {}]   ;;  %s7508_s11 = inlined_call_operand.hbm [shape: f32[24,128], index: 11, kind: input, shape index: {}]   ;;  %s7509_s12 = inlined_call_operand.hbm [shape: f32[1,128], index: 12, kind: input, shape index: {}]   ;;  %s7510_s13 = inlined_call_operand.hbm [shape: f32[128,128], index: 13, kind: input, shape index: {}]   ;;  %s7511_s14 = inlined_call_operand.vmem [shape: f32[8,128], index: 14, kind: output, shape index: {}]  }
   0x1   :  { %20 = vsyncpa [#allocation5], 0 }
   0x2   :  { %21 = vsyncpa [#allocation8], 0 }
   0x3   :  { %22 = vsyncpa [#allocation11], 0 }
   0x4   :  { %23 = vsyncpa [#allocation14], 0 }
   0x5   :  { %24 = vsyncpa [#allocation17], 0  ;;  %s7064_s29 = smov [#allocation4]   ;;  %s7065_s15 = smov [#allocation7]  }
   0x6   :  { %s45_s30 = sshll.u32 %s7064_s29, 4  ;;  %s67_s16 = sshll.u32 %s7065_s15, 4  ;;  %s46_s30 = int_to_ptr.vmem [resolvable:$true] %s45_s30  ;;  %s68_s16 = int_to_ptr.vmem [resolvable:$true] %s67_s16 }
   0x7   :  { %s6810_s19 = scalar_lea.hbm %s7499_s2, 32 }
   0x8   :  { %p6811_p0 = scmp.ne.s32.totalorder %s7499_s2, %s6810_s19  ;;  %p6814_p1 = scmp.lt.u32.totalorder %s6810_s19, %s7499_s2 }
   0xa   :  { %p6816_p2 = pnand %p6814_p1, %p6811_p0 }
   0xc   :  { %6819 = shalt.err (!%p6816_p2)
}
   0xd   :  { %s6820_s24 = scalar_lea.vmem %s46_s30, 32  ;;  %p6825_p4 = scmp.lt.s32.totalorder %s46_s30, %s46_s30 }
   0xe   :  { %p6821_p3 = scmp.ne.s32.totalorder %s46_s30, %s6820_s24  ;;  %p6826_p5 = scmp.lt.s32.totalorder %s6820_s24, %s6820_s24 }
  0x10   :  { %p6827_p6 = por %p6826_p5, %p6825_p4 }
  0x12   :  { %p6828_p7 = pnand %p6827_p6, %p6821_p3 }
  0x14   :  { %6831 = shalt.err (!%p6828_p7)
}
  0x15   :  { %48 = dma.hbm_to_vmem [thread:$0]  %s7499_s2, 32, %s46_s30, [#allocation5]  }
  0x16   :  { %s6832_s29 = scalar_lea.hbm %s7501_s4, 16 }
  0x17   :  { %p6833_p8 = scmp.ne.s32.totalorder %s7501_s4, %s6832_s29  ;;  %p6836_p9 = scmp.lt.u32.totalorder %s6832_s29, %s7501_s4 }
  0x19   :  { %p6838_p10 = pnand %p6836_p9, %p6833_p8 }
  0x1b   :  { %6841 = shalt.err (!%p6838_p10)
}
  0x1c   :  { %s6842_s20 = scalar_lea.vmem %s68_s16, 16  ;;  %s6846_s21 = scalar_lea.vmem %s68_s16, 32 }
  0x1d   :  { %p6843_p11 = scmp.ne.s32.totalorder %s68_s16, %s6842_s20  ;;  %p6847_p12 = scmp.lt.s32.totalorder %s68_s16, %s68_s16 }
  0x1e   :  { %p6848_p13 = scmp.lt.s32.totalorder %s6846_s21, %s6842_s20 }
  0x20   :  { %p6849_p0 = por %p6848_p13, %p6847_p12 }
  0x22   :  { %p6850_p1 = pnand %p6849_p0, %p6843_p11 }
  0x24   :  { %6853 = shalt.err (!%p6850_p1)
}
  0x25   :  { %70 = dma.hbm_to_vmem [thread:$0]  %s7501_s4, 16, %s68_s16, [#allocation8]  }
  0x26   :  { %s7066_s22 = smov [#allocation10]   ;;  %s7067_s24 = smov [#allocation13]  }
  0x27   :  { %s89_s23 = sshll.u32 %s7066_s22, 4  ;;  %s113_s25 = sshll.u32 %s7067_s24, 4  ;;  %s90_s23 = int_to_ptr.vmem [resolvable:$true] %s89_s23  ;;  %s114_s25 = int_to_ptr.vmem [resolvable:$true] %s113_s25 }
  0x28   :  { %s6854_s28 = scalar_lea.hbm %s7503_s6, 16 }
  0x29   :  { %p6855_p2 = scmp.ne.s32.totalorder %s7503_s6, %s6854_s28  ;;  %p6858_p3 = scmp.lt.u32.totalorder %s6854_s28, %s7503_s6 }
  0x2b   :  { %p6860_p4 = pnand %p6858_p3, %p6855_p2 }
  0x2d   :  { %6863 = shalt.err (!%p6860_p4)
}
  0x2e   :  { %s6864_s4 = scalar_lea.vmem %s90_s23, 16  ;;  %s6868_s16 = scalar_lea.vmem %s90_s23, 32 }
  0x2f   :  { %p6865_p5 = scmp.ne.s32.totalorder %s90_s23, %s6864_s4  ;;  %p6869_p6 = scmp.lt.s32.totalorder %s90_s23, %s90_s23 }
  0x30   :  { %p6870_p7 = scmp.lt.s32.totalorder %s6868_s16, %s6864_s4 }
  0x32   :  { %p6871_p8 = por %p6870_p7, %p6869_p6 }
  0x34   :  { %p6872_p9 = pnand %p6871_p8, %p6865_p5 }
  0x36   :  { %6875 = shalt.err (!%p6872_p9)
}
  0x37   :  { %92 = dma.hbm_to_vmem [thread:$0]  %s7503_s6, 16, %s90_s23, [#allocation11]  }
  0x38   :  { %s6876_s30 = scalar_lea.hbm %s7507_s10, 16 }
  0x39   :  { %p6877_p10 = scmp.ne.s32.totalorder %s7507_s10, %s6876_s30  ;;  %p6880_p11 = scmp.lt.u32.totalorder %s6876_s30, %s7507_s10 }
  0x3b   :  { %p6882_p12 = pnand %p6880_p11, %p6877_p10 }
  0x3d   :  { %6885 = shalt.err (!%p6882_p12)
}
  0x3e   :  { %s6886_s28 = scalar_lea.vmem %s114_s25, 16  ;;  %s6890_s29 = scalar_lea.vmem %s114_s25, 32 }
  0x3f   :  { %p6887_p13 = scmp.ne.s32.totalorder %s114_s25, %s6886_s28  ;;  %p6891_p0 = scmp.lt.s32.totalorder %s114_s25, %s114_s25 }
  0x40   :  { %p6892_p1 = scmp.lt.s32.totalorder %s6890_s29, %s6886_s28 }
  0x42   :  { %p6893_p2 = por %p6892_p1, %p6891_p0 }
  0x44   :  { %p6894_p3 = pnand %p6893_p2, %p6887_p13 }
  0x46   :  { %6897 = shalt.err (!%p6894_p3)
}
  0x47   :  { %116 = dma.hbm_to_vmem [thread:$0]  %s7507_s10, 16, %s114_s25, [#allocation14]  }
  0x48   :  { %s7068_s15 = smov [#allocation16]   ;;  %s7069_s18 = smov [#allocation2]  }
  0x49   :  { %s135_s17 = sshll.u32 %s7068_s15, 4  ;;  %s32_s4 = sshll.u32 %s7069_s18, 4  ;;  %s136_s17 = int_to_ptr.vmem [resolvable:$true] %s135_s17  ;;  %s7208_s4 = int_to_ptr.vmem [resolvable:$true] %s32_s4 }
  0x4a   :  { %s6898_s20 = scalar_lea.hbm %s7509_s12, 16 }
  0x4b   :  { %p6899_p4 = scmp.ne.s32.totalorder %s7509_s12, %s6898_s20  ;;  %p6902_p5 = scmp.lt.u32.totalorder %s6898_s20, %s7509_s12 }
  0x4d   :  { %p6904_p6 = pnand %p6902_p5, %p6899_p4 }
  0x4f   :  { %6907 = shalt.err (!%p6904_p6)
}
  0x50   :  { %s6908_s10 = scalar_lea.vmem %s136_s17, 16  ;;  %s6912_s25 = scalar_lea.vmem %s136_s17, 32 }
  0x51   :  { %p6909_p7 = scmp.ne.s32.totalorder %s136_s17, %s6908_s10  ;;  %p6913_p8 = scmp.lt.s32.totalorder %s136_s17, %s136_s17 }
  0x52   :  { %p6914_p9 = scmp.lt.s32.totalorder %s6912_s25, %s6908_s10 }
  0x54   :  { %p6915_p10 = por %p6914_p9, %p6913_p8 }
  0x56   :  { %p6916_p11 = pnand %p6915_p10, %p6909_p7 }
  0x58   :  { %6919 = shalt.err (!%p6916_p11)
}
  0x59   :  { %138 = dma.hbm_to_vmem [thread:$0]  %s7509_s12, 16, %s136_s17, [#allocation17]  }
  0x5a   :  { %s6920_s29 = scalar_lea.hbm %s7498_s1, 65536 }
  0x5b   :  { %p6921_p12 = scmp.ne.s32.totalorder %s7498_s1, %s6920_s29  ;;  %p6924_p13 = scmp.lt.u32.totalorder %s6920_s29, %s7498_s1 }
  0x5d   :  { %p6926_p0 = pnand %p6924_p13, %p6921_p12 }
  0x5f   :  { %6929 = shalt.err (!%p6926_p0)
}
  0x60   :  { %s6930_s16 = scalar_lea.vmem %s7208_s4, 65536  ;;  %p6935_p2 = scmp.lt.s32.totalorder %s7208_s4, %s7208_s4 }
  0x61   :  { %p6931_p1 = scmp.ne.s32.totalorder %s7208_s4, %s6930_s16  ;;  %p6936_p3 = scmp.lt.s32.totalorder %s6930_s16, %s6930_s16 }
  0x63   :  { %p6937_p4 = por %p6936_p3, %p6935_p2 }
  0x65   :  { %p6938_p5 = pnand %p6937_p4, %p6931_p1 }
  0x67   :  { %6941 = shalt.err (!%p6938_p5)
}
  0x68   :  { %s7070_s12 = smov 1024   ;;  %s7071_s17 = smov 64  }
  0x69   :  { %38 = dma.hbm_to_vmem [thread:$0]  %s7498_s1, 65536, %s7208_s4, [#allocation3], %s7070_s12, %s7070_s12, %s7071_s17  }
  0x6a   :  { %s7072_s21 = smov [#allocation6]   ;;  %s6942_s10 = scalar_lea.hbm %s7500_s3, 16384 }
  0x6b   :  { %s54_s2 = sshll.u32 %s7072_s21, 4  ;;  %p6943_p6 = scmp.ne.s32.totalorder %s7500_s3, %s6942_s10  ;;  %s55_s2 = int_to_ptr.vmem [resolvable:$true] %s54_s2 }
  0x6c   :  { %p6946_p7 = scmp.lt.u32.totalorder %s6942_s10, %s7500_s3 }
  0x6e   :  { %p6948_p8 = pnand %p6946_p7, %p6943_p6 }
  0x70   :  { %6951 = shalt.err (!%p6948_p8)
}
  0x71   :  { %s6952_s28 = scalar_lea.vmem %s55_s2, 16384  ;;  %p6957_p10 = scmp.lt.s32.totalorder %s55_s2, %s55_s2 }
  0x72   :  { %p6953_p9 = scmp.ne.s32.totalorder %s55_s2, %s6952_s28  ;;  %p6958_p11 = scmp.lt.s32.totalorder %s6952_s28, %s6952_s28 }
  0x74   :  { %p6959_p12 = por %p6958_p11, %p6957_p10 }
  0x76   :  { %p6960_p13 = pnand %p6959_p12, %p6953_p9 }
  0x78   :  { %6963 = shalt.err (!%p6960_p13)
}
  0x79   :  { %s7073_s1 = smov 512   ;;  %s7074_s4 = smov 32  }
  0x7a   :  { %60 = dma.hbm_to_vmem [thread:$0]  %s7500_s3, 16384, %s55_s2, [#allocation5], %s7073_s1, %s7073_s1, %s7074_s4  }
  0x7b   :  { %s7075_s23 = smov [#allocation9]   ;;  %s7076_s18 = smov [#allocation12]  }
  0x7c   :  { %s76_s15 = sshll.u32 %s7075_s23, 4  ;;  %s101_s16 = sshll.u32 %s7076_s18, 4  ;;  %s77_s15 = int_to_ptr.vmem [resolvable:$true] %s76_s15  ;;  %s102_s16 = int_to_ptr.vmem [resolvable:$true] %s101_s16 }
  0x7d   :  { %s6964_s19 = scalar_lea.hbm %s7502_s5, 8192 }
  0x7e   :  { %p6965_p0 = scmp.ne.s32.totalorder %s7502_s5, %s6964_s19  ;;  %p6968_p1 = scmp.lt.u32.totalorder %s6964_s19, %s7502_s5 }
  0x80   :  { %p6970_p2 = pnand %p6968_p1, %p6965_p0 }
  0x82   :  { %6973 = shalt.err (!%p6970_p2)
}
  0x83   :  { %s6974_s3 = scalar_lea.vmem %s77_s15, 8192  ;;  %p6979_p4 = scmp.lt.s32.totalorder %s77_s15, %s77_s15 }
  0x84   :  { %p6975_p3 = scmp.ne.s32.totalorder %s77_s15, %s6974_s3  ;;  %p6980_p5 = scmp.lt.s32.totalorder %s6974_s3, %s6974_s3 }
  0x86   :  { %p6981_p6 = por %p6980_p5, %p6979_p4 }
  0x88   :  { %p6982_p7 = pnand %p6981_p6, %p6975_p3 }
  0x8a   :  { %6985 = shalt.err (!%p6982_p7)
}
  0x8b   :  { %82 = dma.hbm_to_vmem [thread:$0]  %s7502_s5, 8192, %s77_s15, [#allocation8], %s7073_s1, %s7073_s1, %s7074_s4  }
  0x8c   :  { %s6986_s26 = scalar_lea.hbm %s7505_s8, 16 }
  0x8d   :  { %p6987_p8 = scmp.ne.s32.totalorder %s7505_s8, %s6986_s26  ;;  %p6990_p9 = scmp.lt.u32.totalorder %s6986_s26, %s7505_s8 }
  0x8f   :  { %p6992_p10 = pnand %p6990_p9, %p6987_p8 }
  0x91   :  { %6995 = shalt.err (!%p6992_p10)
}
  0x92   :  { %s6996_s23 = scalar_lea.vmem %s102_s16, 16  ;;  %s7000_s18 = scalar_lea.vmem %s102_s16, 32 }
  0x93   :  { %p6997_p11 = scmp.ne.s32.totalorder %s102_s16, %s6996_s23  ;;  %p7001_p12 = scmp.lt.s32.totalorder %s102_s16, %s102_s16 }
  0x94   :  { %p7002_p13 = scmp.lt.s32.totalorder %s7000_s18, %s6996_s23 }
  0x96   :  { %p7003_p0 = por %p7002_p13, %p7001_p12 }
  0x98   :  { %p7004_p1 = pnand %p7003_p0, %p6997_p11 }
  0x9a   :  { %7007 = shalt.err (!%p7004_p1)
}
  0x9b   :  { %104 = dma.hbm_to_vmem [thread:$0]  %s7505_s8, 16, %s102_s16, [#allocation11]  }
  0x9c   :  { %s7077_s4 = smov [#allocation15]   ;;  %s7008_s19 = scalar_lea.hbm %s7508_s11, 384 }
  0x9d   :  { %s122_s15 = sshll.u32 %s7077_s4, 4  ;;  %p7009_p2 = scmp.ne.s32.totalorder %s7508_s11, %s7008_s19  ;;  %s123_s15 = int_to_ptr.vmem [resolvable:$true] %s122_s15 }
  0x9e   :  { %p7012_p3 = scmp.lt.u32.totalorder %s7008_s19, %s7508_s11 }
  0xa0   :  { %p7014_p4 = pnand %p7012_p3, %p7009_p2 }
  0xa2   :  { %7017 = shalt.err (!%p7014_p4)
}
  0xa3   :  { %s7018_s3 = scalar_lea.vmem %s123_s15, 384  ;;  %p7023_p6 = scmp.lt.s32.totalorder %s123_s15, %s123_s15 }
  0xa4   :  { %p7019_p5 = scmp.ne.s32.totalorder %s123_s15, %s7018_s3  ;;  %p7024_p7 = scmp.lt.s32.totalorder %s7018_s3, %s7018_s3 }
  0xa6   :  { %p7025_p8 = por %p7024_p7, %p7023_p6 }
  0xa8   :  { %p7026_p9 = pnand %p7025_p8, %p7019_p5 }
  0xaa   :  { %7029 = shalt.err (!%p7026_p9)
}
  0xab   :  { %s7078_s8 = smov 128   ;;  %s7079_s16 = smov 8  }
  0xac   :  { %128 = dma.hbm_to_vmem [thread:$0]  %s7508_s11, 384, %s123_s15, [#allocation14], %s7078_s8, %s7078_s8, %s7079_s16  }
  0xad   :  { %s7080_s25 = smov [#allocation18]   ;;  %s7030_s28 = scalar_lea.hbm %s7510_s13, 2048 }
  0xae   :  { %s144_s24 = sshll.u32 %s7080_s25, 4  ;;  %p7031_p10 = scmp.ne.s32.totalorder %s7510_s13, %s7030_s28  ;;  %s145_s24 = int_to_ptr.vmem [resolvable:$true] %s144_s24 }
  0xaf   :  { %p7034_p11 = scmp.lt.u32.totalorder %s7030_s28, %s7510_s13 }
  0xb1   :  { %p7036_p12 = pnand %p7034_p11, %p7031_p10 }
  0xb3   :  { %7039 = shalt.err (!%p7036_p12)
}
  0xb4   :  { %s7040_s5 = scalar_lea.vmem %s145_s24, 2048  ;;  %p7045_p0 = scmp.lt.s32.totalorder %s145_s24, %s145_s24 }
  0xb5   :  { %p7041_p13 = scmp.ne.s32.totalorder %s145_s24, %s7040_s5  ;;  %p7046_p1 = scmp.lt.s32.totalorder %s7040_s5, %s7040_s5 }
  0xb7   :  { %p7047_p2 = por %p7046_p1, %p7045_p0 }
  0xb9   :  { %p7048_p3 = pnand %p7047_p2, %p7041_p13 }
  0xbb   :  { %7051 = shalt.err (!%p7048_p3)
}
  0xbc   :  { %150 = dma.hbm_to_vmem [thread:$0]  %s7510_s13, 2048, %s145_s24, [#allocation17], %s7078_s8, %s7078_s8, %s7079_s16  }
  0xbd   :  { %7052 = dma.done.wait [#allocation3], 65536  }
  0xbe   :  { %7053 = vsyncadd [#allocation3], 4294901760 }
  0xbf   :  { %7054 = dma.done.wait [#allocation5], 16416  }
  0xc0   :  { %7055 = vsyncadd [#allocation5], 4294950880 }
  0xc1   :  { %7056 = dma.done.wait [#allocation8], 8208  }
  0xc2   :  { %7057 = vsyncadd [#allocation8], 4294959088 }
  0xc3   :  { %7058 = dma.done.wait [#allocation11], 32  }
  0xc4   :  { %7059 = vsyncadd [#allocation11], 4294967264 }
  0xc5   :  { %7060 = dma.done.wait [#allocation14], 400  }
  0xc6   :  { %7061 = vsyncadd [#allocation14], 4294966896 }
  0xc7   :  { %7062 = dma.done.wait [#allocation17], 2064  }
  0xc8   :  { %7063 = vsyncadd [#allocation17], 4294965232  ;;  %v193_v0 = vld [vmem:[#allocation2] sm:$0xff]  ;;  %v194_v2 = vld [vmem:[#allocation2 + $0x8] sm:$0xff]  ;;  %vm7083_vm3 = vmmov 0   ;;  %vm5583_vm6 = vcmask 392192  }
  0xc9   :  { %v201_v1 = vld [vmem:[#allocation2 + $0x40] sm:$0xff]  ;;  %v202_v4 = vld [vmem:[#allocation2 + $0x48] sm:$0xff]  ;;  %vm5670_vm8 = vcmask 195584  }
  0xca   :  { %v5846_v3 = vcombine.high %v193_v0, %v201_v1  ;;  %v5845_v5 = vcombine.low %v193_v0, %v201_v1  ;;  %v209_v6 = vld [vmem:[#allocation2 + $0x80] sm:$0xff]  ;;  %v5848_v8 = vcombine.high %v194_v2, %v202_v4  ;;  %v5847_v9 = vcombine.low %v194_v2, %v202_v4  ;;  %v210_v11 = vld [vmem:[#allocation2 + $0x88] sm:$0xff] }
  0xcb   :  { %v217_v7 = vld [vmem:[#allocation2 + $0xc0] sm:$0xff]  ;;  %v218_v12 = vld [vmem:[#allocation2 + $0xc8] sm:$0xff] }
  0xcc   :  { %v5862_v10 = vcombine.high %v209_v6, %v217_v7  ;;  %v225_v13 = vld [vmem:[#allocation2 + $0x100] sm:$0xff]  ;;  %3265 = vmatprep.subr.bf16.mxu0 %v5846_v3  ;;  %v5864_v14 = vcombine.high %v210_v11, %v218_v12  ;;  %v226_v16 = vld [vmem:[#allocation2 + $0x108] sm:$0xff]  ;;  %3347 = vmatprep.subr.bf16.mxu1 %v5848_v8  ;;  %v5861_v18 = vcombine.low %v209_v6, %v217_v7 }
  0xcd   :  { %v233_v15 = vld [vmem:[#allocation2 + $0x140] sm:$0xff]  ;;  %v234_v17 = vld [vmem:[#allocation2 + $0x148] sm:$0xff]  ;;  %3266 = vmatpush1.bf16.msra.mxu0 %v5845_v5  ;;  %3348 = vmatpush1.bf16.msra.mxu1 %v5847_v9  ;;  %v5863_v19 = vcombine.low %v210_v11, %v218_v12 }
  0xce   :  { %3267 = vmatprep.subr.bf16.mxu0 %v5862_v10  ;;  %v5878_v20 = vcombine.high %v225_v13, %v233_v15  ;;  %3349 = vmatprep.subr.bf16.mxu1 %v5864_v14  ;;  %v5880_v21 = vcombine.high %v226_v16, %v234_v17  ;;  %v241_v22 = vld [vmem:[#allocation2 + $0x180] sm:$0xff]  ;;  %v242_v24 = vld [vmem:[#allocation2 + $0x188] sm:$0xff]  ;;  %v5877_v26 = vcombine.low %v225_v13, %v233_v15 }
  0xcf   :  { %v249_v23 = vld [vmem:[#allocation2 + $0x1c0] sm:$0xff]  ;;  %v250_v25 = vld [vmem:[#allocation2 + $0x1c8] sm:$0xff]  ;;  %v5879_v27 = vcombine.low %v226_v16, %v234_v17 }
  0xd0   :  { %v5894_v28 = vcombine.high %v241_v22, %v249_v23  ;;  %v5896_v29 = vcombine.high %v242_v24, %v250_v25  ;;  %v257_v30 = vld [vmem:[#allocation2 + $0x200] sm:$0xff]  ;;  %v258_v32 = vld [vmem:[#allocation2 + $0x208] sm:$0xff]  ;;  %v5893_v34 = vcombine.low %v241_v22, %v249_v23  ;;  %v5895_v35 = vcombine.low %v242_v24, %v250_v25 }
  0xd1   :  { %3268 = vmatpush1.bf16.msra.mxu0 %v5861_v18  ;;  %3350 = vmatpush1.bf16.msra.mxu1 %v5863_v19  ;;  %v265_v31 = vld [vmem:[#allocation2 + $0x240] sm:$0xff]  ;;  %v266_v33 = vld [vmem:[#allocation2 + $0x248] sm:$0xff] }
  0xd2   :  { %3269 = vmatprep.subr.bf16.mxu0 %v5878_v20  ;;  %3351 = vmatprep.subr.bf16.mxu1 %v5880_v21  ;;  %v5910_v36 = vcombine.high %v257_v30, %v265_v31  ;;  %v5912_v37 = vcombine.high %v258_v32, %v266_v33  ;;  %v273_v38 = vld [vmem:[#allocation2 + $0x280] sm:$0xff]  ;;  %v274_v40 = vld [vmem:[#allocation2 + $0x288] sm:$0xff]  ;;  %v5909_v42 = vcombine.low %v257_v30, %v265_v31 }
  0xd3   :  { %v281_v39 = vld [vmem:[#allocation2 + $0x2c0] sm:$0xff]  ;;  %v282_v41 = vld [vmem:[#allocation2 + $0x2c8] sm:$0xff]  ;;  %v5911_v43 = vcombine.low %v258_v32, %v266_v33 }
  0xd4   :  { %v5926_v44 = vcombine.high %v273_v38, %v281_v39  ;;  %v5928_v45 = vcombine.high %v274_v40, %v282_v41  ;;  %v289_v46 = vld [vmem:[#allocation2 + $0x300] sm:$0xff]  ;;  %v290_v48 = vld [vmem:[#allocation2 + $0x308] sm:$0xff]  ;;  %v5925_v50 = vcombine.low %v273_v38, %v281_v39  ;;  %v5927_v51 = vcombine.low %v274_v40, %v282_v41 }
  0xd5   :  { %3270 = vmatpush1.bf16.msra.mxu0 %v5877_v26  ;;  %3352 = vmatpush1.bf16.msra.mxu1 %v5879_v27  ;;  %v297_v47 = vld [vmem:[#allocation2 + $0x340] sm:$0xff]  ;;  %v298_v49 = vld [vmem:[#allocation2 + $0x348] sm:$0xff] }
  0xd6   :  { %3271 = vmatprep.subr.bf16.mxu0 %v5894_v28  ;;  %3353 = vmatprep.subr.bf16.mxu1 %v5896_v29  ;;  %v5942_v52 = vcombine.high %v289_v46, %v297_v47  ;;  %v186_v53 = vld [vmem:[%s7497_s0 + $0x8] sm:$0xff]  ;;  %v5944_v54 = vcombine.high %v290_v48, %v298_v49  ;;  %v305_v55 = vld [vmem:[#allocation2 + $0x380] sm:$0xff]  ;;  %v5941_v60 = vcombine.low %v289_v46, %v297_v47 }
  0xd7   :  { %v313_v56 = vld [vmem:[#allocation2 + $0x3c0] sm:$0xff]  ;;  %v7302_v57 = vpack.c.bf16 %v186_v53, %v186_v53  ;;  %v306_v58 = vld [vmem:[#allocation2 + $0x388] sm:$0xff]  ;;  %v5943_v61 = vcombine.low %v290_v48, %v298_v49 }
  0xd8   :  { %v314_v59 = vld [vmem:[#allocation2 + $0x3c8] sm:$0xff]  ;;  %v5958_v62 = vcombine.high %v305_v55, %v313_v56  ;;  %v321_v0 = vld [vmem:[#allocation2 + $0x400] sm:$0xff]  ;;  %v5957_v4 = vcombine.low %v305_v55, %v313_v56 }
  0xd9   :  { %3272 = vmatpush1.bf16.msra.mxu0 %v5893_v34  ;;  %3354 = vmatpush1.bf16.msra.mxu1 %v5895_v35  ;;  %v5960_v63 = vcombine.high %v306_v58, %v314_v59  ;;  %v329_v1 = vld [vmem:[#allocation2 + $0x440] sm:$0xff]  ;;  %v322_v2 = vld [vmem:[#allocation2 + $0x408] sm:$0xff]  ;;  %v5959_v5 = vcombine.low %v306_v58, %v314_v59 }
  0xda   :  { %3273 = vmatprep.subr.bf16.mxu0 %v5910_v36  ;;  %3355 = vmatprep.subr.bf16.mxu1 %v5912_v37  ;;  %v330_v3 = vld [vmem:[#allocation2 + $0x448] sm:$0xff]  ;;  %v5974_v6 = vcombine.high %v321_v0, %v329_v1  ;;  %v337_v8 = vld [vmem:[#allocation2 + $0x480] sm:$0xff]  ;;  %v5973_v12 = vcombine.low %v321_v0, %v329_v1 }
  0xdb   :  { %3297 = vmatprep.mubr.bf16.mxu0 %v7302_v57  ;;  %3379 = vmatprep.mubr.bf16.mxu1 %v7302_v57  ;;  %v5976_v7 = vcombine.high %v322_v2, %v330_v3  ;;  %v345_v9 = vld [vmem:[#allocation2 + $0x4c0] sm:$0xff]  ;;  %v338_v10 = vld [vmem:[#allocation2 + $0x488] sm:$0xff]  ;;  %v5975_v13 = vcombine.low %v322_v2, %v330_v3 }
  0xdc   :  { %v346_v11 = vld [vmem:[#allocation2 + $0x4c8] sm:$0xff]  ;;  %v5990_v14 = vcombine.high %v337_v8, %v345_v9  ;;  %v353_v16 = vld [vmem:[#allocation2 + $0x500] sm:$0xff]  ;;  %v5989_v20 = vcombine.low %v337_v8, %v345_v9 }
  0xdd   :  { %3274 = vmatpush1.bf16.msra.mxu0 %v5909_v42  ;;  %3356 = vmatpush1.bf16.msra.mxu1 %v5911_v43  ;;  %v5992_v15 = vcombine.high %v338_v10, %v346_v11  ;;  %v361_v17 = vld [vmem:[#allocation2 + $0x540] sm:$0xff]  ;;  %v354_v18 = vld [vmem:[#allocation2 + $0x508] sm:$0xff]  ;;  %v5991_v21 = vcombine.low %v338_v10, %v346_v11 }
  0xde   :  { %3275 = vmatprep.subr.bf16.mxu0 %v5926_v44  ;;  %3357 = vmatprep.subr.bf16.mxu1 %v5928_v45  ;;  %v362_v19 = vld [vmem:[#allocation2 + $0x548] sm:$0xff]  ;;  %v6006_v22 = vcombine.high %v353_v16, %v361_v17  ;;  %v369_v24 = vld [vmem:[#allocation2 + $0x580] sm:$0xff]  ;;  %v6005_v28 = vcombine.low %v353_v16, %v361_v17 }
  0xdf   :  { %v6008_v23 = vcombine.high %v354_v18, %v362_v19  ;;  %v377_v25 = vld [vmem:[#allocation2 + $0x5c0] sm:$0xff]  ;;  %v370_v26 = vld [vmem:[#allocation2 + $0x588] sm:$0xff]  ;;  %v6007_v29 = vcombine.low %v354_v18, %v362_v19 }
  0xe0   :  { %v378_v27 = vld [vmem:[#allocation2 + $0x5c8] sm:$0xff]  ;;  %v6022_v30 = vcombine.high %v369_v24, %v377_v25  ;;  %v385_v32 = vld [vmem:[#allocation2 + $0x600] sm:$0xff]  ;;  %v6021_v36 = vcombine.low %v369_v24, %v377_v25 }
  0xe1   :  { %3276 = vmatpush1.bf16.msra.mxu0 %v5925_v50  ;;  %3358 = vmatpush1.bf16.msra.mxu1 %v5927_v51  ;;  %v6024_v31 = vcombine.high %v370_v26, %v378_v27  ;;  %v393_v33 = vld [vmem:[#allocation2 + $0x640] sm:$0xff]  ;;  %v386_v34 = vld [vmem:[#allocation2 + $0x608] sm:$0xff]  ;;  %v6023_v37 = vcombine.low %v370_v26, %v378_v27 }
  0xe2   :  { %3277 = vmatprep.subr.bf16.mxu0 %v5942_v52  ;;  %3359 = vmatprep.subr.bf16.mxu1 %v5944_v54  ;;  %v394_v35 = vld [vmem:[#allocation2 + $0x648] sm:$0xff]  ;;  %v6038_v38 = vcombine.high %v385_v32, %v393_v33  ;;  %v401_v40 = vld [vmem:[#allocation2 + $0x680] sm:$0xff]  ;;  %v6037_v44 = vcombine.low %v385_v32, %v393_v33 }
  0xe3   :  { %v6040_v39 = vcombine.high %v386_v34, %v394_v35  ;;  %v409_v41 = vld [vmem:[#allocation2 + $0x6c0] sm:$0xff]  ;;  %v402_v42 = vld [vmem:[#allocation2 + $0x688] sm:$0xff]  ;;  %v6039_v45 = vcombine.low %v386_v34, %v394_v35 }
  0xe4   :  { %v410_v43 = vld [vmem:[#allocation2 + $0x6c8] sm:$0xff]  ;;  %v6054_v46 = vcombine.high %v401_v40, %v409_v41  ;;  %v417_v48 = vld [vmem:[#allocation2 + $0x700] sm:$0xff]  ;;  %v6053_v52 = vcombine.low %v401_v40, %v409_v41 }
  0xe5   :  { %3278 = vmatpush1.bf16.msra.mxu0 %v5941_v60  ;;  %3360 = vmatpush1.bf16.msra.mxu1 %v5943_v61  ;;  %v6056_v47 = vcombine.high %v402_v42, %v410_v43  ;;  %v425_v49 = vld [vmem:[#allocation2 + $0x740] sm:$0xff]  ;;  %v418_v50 = vld [vmem:[#allocation2 + $0x708] sm:$0xff]  ;;  %v6055_v53 = vcombine.low %v402_v42, %v410_v43 }
  0xe6   :  { %3279 = vmatprep.subr.bf16.mxu0 %v5958_v62  ;;  %3361 = vmatprep.subr.bf16.mxu1 %v5960_v63  ;;  %v426_v51 = vld [vmem:[#allocation2 + $0x748] sm:$0xff]  ;;  %v6070_v54 = vcombine.high %v417_v48, %v425_v49  ;;  %v433_v56 = vld [vmem:[#allocation2 + $0x780] sm:$0xff]  ;;  %v6069_v61 = vcombine.low %v417_v48, %v425_v49 }
  0xe7   :  { %v6072_v55 = vcombine.high %v418_v50, %v426_v51  ;;  %v441_v58 = vld [vmem:[#allocation2 + $0x7c0] sm:$0xff]  ;;  %v434_v59 = vld [vmem:[#allocation2 + $0x788] sm:$0xff]  ;;  %v6071_v62 = vcombine.low %v418_v50, %v426_v51 }
  0xe8   :  { %v442_v60 = vld [vmem:[#allocation2 + $0x7c8] sm:$0xff]  ;;  %v6086_v63 = vcombine.high %v433_v56, %v441_v58  ;;  %v449_v1 = vld [vmem:[#allocation2 + $0x800] sm:$0xff] }
  0xe9   :  { %3280 = vmatpush1.bf16.msra.mxu0 %v5957_v4  ;;  %3362 = vmatpush1.bf16.msra.mxu1 %v5959_v5  ;;  %v6088_v0 = vcombine.high %v434_v59, %v442_v60  ;;  %v457_v2 = vld [vmem:[#allocation2 + $0x840] sm:$0xff]  ;;  %v450_v3 = vld [vmem:[#allocation2 + $0x808] sm:$0xff]  ;;  %v6085_v5 = vcombine.low %v433_v56, %v441_v58 }
  0xea   :  { %3281 = vmatprep.subr.bf16.mxu0 %v5974_v6  ;;  %3363 = vmatprep.subr.bf16.mxu1 %v5976_v7  ;;  %v458_v4 = vld [vmem:[#allocation2 + $0x848] sm:$0xff]  ;;  %v185_v6 = vld [vmem:[%s7497_s0] sm:$0xff]  ;;  %v6087_v7 = vcombine.low %v434_v59, %v442_v60  ;;  %v6102_v8 = vcombine.high %v449_v1, %v457_v2  ;;  %v6101_v16 = vcombine.low %v449_v1, %v457_v2 }
  0xeb   :  { %v6104_v9 = vcombine.high %v450_v3, %v458_v4  ;;  %v465_v10 = vld [vmem:[#allocation2 + $0x880] sm:$0xff]  ;;  %v6103_v17 = vcombine.low %v450_v3, %v458_v4  ;;  %v490_v24 = vld [vmem:[#allocation2 + $0x948] sm:$0xff] }
  0xec   :  { %v473_v11 = vld [vmem:[#allocation2 + $0x8c0] sm:$0xff]  ;;  %v506_v32 = vld [vmem:[#allocation2 + $0x9c8] sm:$0xff] }
  0xed   :  { %3282 = vmatpush1.bf16.msra.mxu0 %v5973_v12  ;;  %3364 = vmatpush1.bf16.msra.mxu1 %v5975_v13  ;;  %v7309_v12 = vpack.c.bf16 %v185_v6, %v185_v6  ;;  %v466_v13 = vld [vmem:[#allocation2 + $0x888] sm:$0xff]  ;;  %v6118_v18 = vcombine.high %v465_v10, %v473_v11  ;;  %v6117_v25 = vcombine.low %v465_v10, %v473_v11  ;;  %v577_v6 = vld [vmem:[#allocation2 + $0xc00] sm:$0xff] }
  0xee   :  { %3283 = vmatprep.subr.bf16.mxu0 %v5990_v14  ;;  %3365 = vmatprep.subr.bf16.mxu1 %v5992_v15  ;;  %v474_v14 = vld [vmem:[#allocation2 + $0x8c8] sm:$0xff]  ;;  %v188_v15 = vld [vmem:[%s7497_s0 + $0x18] sm:$0xff] }
  0xef   :  { %v6120_v19 = vcombine.high %v466_v13, %v474_v14  ;;  %v6119_v26 = vcombine.low %v466_v13, %v474_v14  ;;  %v522_v40 = vld [vmem:[#allocation2 + $0xa48] sm:$0xff] }
  0xf0   :  { %v538_v48 = vld [vmem:[#allocation2 + $0xac8] sm:$0xff] }
  0xf1   :  { %3284 = vmatpush1.bf16.msra.mxu0 %v5989_v20  ;;  %3366 = vmatpush1.bf16.msra.mxu1 %v5991_v21  ;;  %v481_v20 = vld [vmem:[#allocation2 + $0x900] sm:$0xff]  ;;  %v554_v56 = vld [vmem:[#allocation2 + $0xb48] sm:$0xff] }
  0xf2   :  { %3285 = vmatprep.subr.bf16.mxu0 %v6006_v22  ;;  %3367 = vmatprep.subr.bf16.mxu1 %v6008_v23  ;;  %v489_v21 = vld [vmem:[#allocation2 + $0x940] sm:$0xff]  ;;  %v7314_v22 = vpack.c.bf16 %v188_v15, %v188_v15  ;;  %v482_v23 = vld [vmem:[#allocation2 + $0x908] sm:$0xff] }
  0xf3   :  { %v6134_v27 = vcombine.high %v481_v20, %v489_v21  ;;  %v6133_v33 = vcombine.low %v481_v20, %v489_v21  ;;  %v6135_v34 = vcombine.low %v482_v23, %v490_v24  ;;  %v570_v1 = vld [vmem:[#allocation2 + $0xbc8] sm:$0xff]  ;;  %v593_v15 = vld [vmem:[#allocation2 + $0xc80] sm:$0xff] }
  0xf5   :  { %3286 = vmatpush1.bf16.msra.mxu0 %v6005_v28  ;;  %3368 = vmatpush1.bf16.msra.mxu1 %v6007_v29  ;;  %v6136_v28 = vcombine.high %v482_v23, %v490_v24  ;;  %v497_v29 = vld [vmem:[#allocation2 + $0x980] sm:$0xff] }
  0xf6   :  { %3287 = vmatprep.subr.bf16.mxu0 %v6022_v30  ;;  %3369 = vmatprep.subr.bf16.mxu1 %v6024_v31  ;;  %v505_v30 = vld [vmem:[#allocation2 + $0x9c0] sm:$0xff]  ;;  %v498_v31 = vld [vmem:[#allocation2 + $0x988] sm:$0xff] }
  0xf7   :  { %v6150_v35 = vcombine.high %v497_v29, %v505_v30  ;;  %v6149_v41 = vcombine.low %v497_v29, %v505_v30  ;;  %v6151_v42 = vcombine.low %v498_v31, %v506_v32  ;;  %v609_v24 = vld [vmem:[#allocation2 + $0xd00] sm:$0xff] }
  0xf9   :  { %3288 = vmatpush1.bf16.msra.mxu0 %v6021_v36  ;;  %3370 = vmatpush1.bf16.msra.mxu1 %v6023_v37  ;;  %v6152_v36 = vcombine.high %v498_v31, %v506_v32  ;;  %v513_v37 = vld [vmem:[#allocation2 + $0xa00] sm:$0xff] }
  0xfa   :  { %3289 = vmatprep.subr.bf16.mxu0 %v6038_v38  ;;  %3371 = vmatprep.subr.bf16.mxu1 %v6040_v39  ;;  %v521_v38 = vld [vmem:[#allocation2 + $0xa40] sm:$0xff]  ;;  %v514_v39 = vld [vmem:[#allocation2 + $0xa08] sm:$0xff] }
  0xfb   :  { %v6166_v43 = vcombine.high %v513_v37, %v521_v38  ;;  %v6165_v49 = vcombine.low %v513_v37, %v521_v38  ;;  %v6167_v50 = vcombine.low %v514_v39, %v522_v40  ;;  %v625_v32 = vld [vmem:[#allocation2 + $0xd80] sm:$0xff] }
  0xfd   :  { %3290 = vmatpush1.bf16.msra.mxu0 %v6037_v44  ;;  %3372 = vmatpush1.bf16.msra.mxu1 %v6039_v45  ;;  %v6168_v44 = vcombine.high %v514_v39, %v522_v40  ;;  %v529_v45 = vld [vmem:[#allocation2 + $0xa80] sm:$0xff] }
  0xfe   :  { %3291 = vmatprep.subr.bf16.mxu0 %v6054_v46  ;;  %3373 = vmatprep.subr.bf16.mxu1 %v6056_v47  ;;  %v537_v46 = vld [vmem:[#allocation2 + $0xac0] sm:$0xff]  ;;  %v530_v47 = vld [vmem:[#allocation2 + $0xa88] sm:$0xff] }
  0xff   :  { %v6182_v51 = vcombine.high %v529_v45, %v537_v46  ;;  %v6181_v58 = vcombine.low %v529_v45, %v537_v46  ;;  %v6183_v59 = vcombine.low %v530_v47, %v538_v48  ;;  %v641_v40 = vld [vmem:[#allocation2 + $0xe00] sm:$0xff] }
 0x101   :  { %3292 = vmatpush1.bf16.msra.mxu0 %v6053_v52  ;;  %3374 = vmatpush1.bf16.msra.mxu1 %v6055_v53  ;;  %v6184_v52 = vcombine.high %v530_v47, %v538_v48  ;;  %v545_v53 = vld [vmem:[#allocation2 + $0xb00] sm:$0xff] }
 0x102   :  { %3293 = vmatprep.subr.bf16.mxu0 %v6070_v54  ;;  %3375 = vmatprep.subr.bf16.mxu1 %v6072_v55  ;;  %v553_v54 = vld [vmem:[#allocation2 + $0xb40] sm:$0xff]  ;;  %v546_v55 = vld [vmem:[#allocation2 + $0xb08] sm:$0xff] }
 0x103   :  { %v6198_v60 = vcombine.high %v545_v53, %v553_v54  ;;  %v6197_v2 = vcombine.low %v545_v53, %v553_v54  ;;  %v6199_v3 = vcombine.low %v546_v55, %v554_v56  ;;  %v657_v48 = vld [vmem:[#allocation2 + $0xe80] sm:$0xff] }
 0x105   :  { %3294 = vmatpush1.bf16.msra.mxu0 %v6069_v61  ;;  %3376 = vmatpush1.bf16.msra.mxu1 %v6071_v62  ;;  %v6200_v61 = vcombine.high %v546_v55, %v554_v56  ;;  %v561_v62 = vld [vmem:[#allocation2 + $0xb80] sm:$0xff] }
 0x106   :  { %3295 = vmatprep.subr.bf16.mxu0 %v6086_v63  ;;  %3377 = vmatprep.subr.bf16.mxu1 %v6088_v0  ;;  %v569_v63 = vld [vmem:[#allocation2 + $0xbc0] sm:$0xff]  ;;  %v562_v0 = vld [vmem:[#allocation2 + $0xb88] sm:$0xff] }
 0x107   :  { %v6214_v4 = vcombine.high %v561_v62, %v569_v63  ;;  %v6213_v10 = vcombine.low %v561_v62, %v569_v63  ;;  %v6215_v11 = vcombine.low %v562_v0, %v570_v1  ;;  %v673_v56 = vld [vmem:[#allocation2 + $0xf00] sm:$0xff] }
 0x109   :  { %3296 = vmatpush1.bf16.msra.mxu0 %v6085_v5  ;;  %3378 = vmatpush1.bf16.msra.mxu1 %v6087_v7  ;;  %v6216_v5 = vcombine.high %v562_v0, %v570_v1  ;;  %v585_v7 = vld [vmem:[#allocation2 + $0xc40] sm:$0xff] }
 0x10a   :  { %3306 = vmatprep.subr.bf16.mxu0 %v6102_v8  ;;  %3388 = vmatprep.subr.bf16.mxu1 %v6104_v9  ;;  %v578_v8 = vld [vmem:[#allocation2 + $0xc08] sm:$0xff]  ;;  %v6230_v13 = vcombine.high %v577_v6, %v585_v7  ;;  %v689_v1 = vld [vmem:[#allocation2 + $0xf80] sm:$0xff] }
 0x10b   :  { %v586_v9 = vld [vmem:[#allocation2 + $0xc48] sm:$0xff] }
 0x10c   :  { %3298 = vmatmul.mubr.bf16.vlgmr.msra.gmra.mrb[0].mxu0 %v7309_v12  ;;  %3380 = vmatmul.mubr.bf16.vlgmr.msra.gmra.mrb[0].mxu1 %v7309_v12  ;;  %v6232_v14 = vcombine.high %v578_v8, %v586_v9  ;;  %v6231_v20 = vcombine.low %v578_v8, %v586_v9  ;;  %v195_v9 = vld [vmem:[#allocation2 + $0x10] sm:$0xff] }
 0x10d   :  { %3307 = vmatpush1.bf16.msra.mxu0 %v6101_v16  ;;  %3389 = vmatpush1.bf16.msra.mxu1 %v6103_v17  ;;  %v601_v16 = vld [vmem:[#allocation2 + $0xcc0] sm:$0xff]  ;;  %v594_v17 = vld [vmem:[#allocation2 + $0xc88] sm:$0xff] }
 0x10e   :  { %3308 = vmatprep.subr.bf16.mxu0 %v6118_v18  ;;  %3390 = vmatprep.subr.bf16.mxu1 %v6120_v19  ;;  %v602_v18 = vld [vmem:[#allocation2 + $0xcc8] sm:$0xff]  ;;  %v6229_v19 = vcombine.low %v577_v6, %v585_v7  ;;  %v6246_v21 = vcombine.high %v593_v15, %v601_v16 }
 0x10f   :  { %3338 = vmatprep.mubr.bf16.mxu0 %v7314_v22  ;;  %3420 = vmatprep.mubr.bf16.mxu1 %v7314_v22  ;;  %v6248_v23 = vcombine.high %v594_v17, %v602_v18  ;;  %v6247_v29 = vcombine.low %v594_v17, %v602_v18 }
 0x111   :  { %3309 = vmatpush1.bf16.msra.mxu0 %v6117_v25  ;;  %3391 = vmatpush1.bf16.msra.mxu1 %v6119_v26  ;;  %v617_v25 = vld [vmem:[#allocation2 + $0xd40] sm:$0xff]  ;;  %v610_v26 = vld [vmem:[#allocation2 + $0xd08] sm:$0xff] }
 0x112   :  { %3310 = vmatprep.subr.bf16.mxu0 %v6134_v27  ;;  %3392 = vmatprep.subr.bf16.mxu1 %v6136_v28  ;;  %v618_v27 = vld [vmem:[#allocation2 + $0xd48] sm:$0xff]  ;;  %v6245_v28 = vcombine.low %v593_v15, %v601_v16  ;;  %v6262_v30 = vcombine.high %v609_v24, %v617_v25  ;;  %v187_v15 = vld [vmem:[%s7497_s0 + $0x10] sm:$0xff] }
 0x113   :  { %v6264_v31 = vcombine.high %v610_v26, %v618_v27  ;;  %v6263_v37 = vcombine.low %v610_v26, %v618_v27 }
 0x115   :  { %3311 = vmatpush1.bf16.msra.mxu0 %v6133_v33  ;;  %3393 = vmatpush1.bf16.msra.mxu1 %v6135_v34  ;;  %v633_v33 = vld [vmem:[#allocation2 + $0xdc0] sm:$0xff]  ;;  %v626_v34 = vld [vmem:[#allocation2 + $0xd88] sm:$0xff] }
 0x116   :  { %3312 = vmatprep.subr.bf16.mxu0 %v6150_v35  ;;  %3394 = vmatprep.subr.bf16.mxu1 %v6152_v36  ;;  %v634_v35 = vld [vmem:[#allocation2 + $0xdc8] sm:$0xff]  ;;  %v6261_v36 = vcombine.low %v609_v24, %v617_v25  ;;  %v6278_v38 = vcombine.high %v625_v32, %v633_v33  ;;  %v220_v24 = vld [vmem:[#allocation2 + $0xd8] sm:$0xff] }
 0x117   :  { %v6280_v39 = vcombine.high %v626_v34, %v634_v35  ;;  %v6279_v45 = vcombine.low %v626_v34, %v634_v35 }
 0x119   :  { %3313 = vmatpush1.bf16.msra.mxu0 %v6149_v41  ;;  %3395 = vmatpush1.bf16.msra.mxu1 %v6151_v42  ;;  %v649_v41 = vld [vmem:[#allocation2 + $0xe40] sm:$0xff]  ;;  %v642_v42 = vld [vmem:[#allocation2 + $0xe08] sm:$0xff] }
 0x11a   :  { %3314 = vmatprep.subr.bf16.mxu0 %v6166_v43  ;;  %3396 = vmatprep.subr.bf16.mxu1 %v6168_v44  ;;  %v650_v43 = vld [vmem:[#allocation2 + $0xe48] sm:$0xff]  ;;  %v6277_v44 = vcombine.low %v625_v32, %v633_v33  ;;  %v6294_v46 = vcombine.high %v641_v40, %v649_v41  ;;  %v236_v32 = vld [vmem:[#allocation2 + $0x158] sm:$0xff] }
 0x11b   :  { %v6296_v47 = vcombine.high %v642_v42, %v650_v43  ;;  %v6295_v53 = vcombine.low %v642_v42, %v650_v43 }
 0x11d   :  { %3315 = vmatpush1.bf16.msra.mxu0 %v6165_v49  ;;  %3397 = vmatpush1.bf16.msra.mxu1 %v6167_v50  ;;  %v665_v49 = vld [vmem:[#allocation2 + $0xec0] sm:$0xff]  ;;  %v658_v50 = vld [vmem:[#allocation2 + $0xe88] sm:$0xff] }
 0x11e   :  { %3316 = vmatprep.subr.bf16.mxu0 %v6182_v51  ;;  %3398 = vmatprep.subr.bf16.mxu1 %v6184_v52  ;;  %v666_v51 = vld [vmem:[#allocation2 + $0xec8] sm:$0xff]  ;;  %v6293_v52 = vcombine.low %v641_v40, %v649_v41  ;;  %v6310_v54 = vcombine.high %v657_v48, %v665_v49  ;;  %v252_v40 = vld [vmem:[#allocation2 + $0x1d8] sm:$0xff] }
 0x11f   :  { %v6312_v55 = vcombine.high %v658_v50, %v666_v51  ;;  %v6311_v62 = vcombine.low %v658_v50, %v666_v51 }
 0x121   :  { %3317 = vmatpush1.bf16.msra.mxu0 %v6181_v58  ;;  %3399 = vmatpush1.bf16.msra.mxu1 %v6183_v59  ;;  %v681_v58 = vld [vmem:[#allocation2 + $0xf40] sm:$0xff]  ;;  %v674_v59 = vld [vmem:[#allocation2 + $0xf08] sm:$0xff] }
 0x122   :  { %3318 = vmatprep.subr.bf16.mxu0 %v6198_v60  ;;  %3400 = vmatprep.subr.bf16.mxu1 %v6200_v61  ;;  %v682_v60 = vld [vmem:[#allocation2 + $0xf48] sm:$0xff]  ;;  %v6309_v61 = vcombine.low %v657_v48, %v665_v49  ;;  %v6326_v63 = vcombine.high %v673_v56, %v681_v58  ;;  %v268_v48 = vld [vmem:[#allocation2 + $0x258] sm:$0xff] }
 0x123   :  { %v6328_v0 = vcombine.high %v674_v59, %v682_v60  ;;  %v6327_v6 = vcombine.low %v674_v59, %v682_v60 }
 0x125   :  { %3319 = vmatpush1.bf16.msra.mxu0 %v6197_v2  ;;  %3401 = vmatpush1.bf16.msra.mxu1 %v6199_v3  ;;  %v697_v2 = vld [vmem:[#allocation2 + $0xfc0] sm:$0xff]  ;;  %v690_v3 = vld [vmem:[#allocation2 + $0xf88] sm:$0xff] }
 0x126   :  { %3320 = vmatprep.subr.bf16.mxu0 %v6214_v4  ;;  %3402 = vmatprep.subr.bf16.mxu1 %v6216_v5  ;;  %v698_v4 = vld [vmem:[#allocation2 + $0xfc8] sm:$0xff]  ;;  %v6325_v5 = vcombine.low %v673_v56, %v681_v58  ;;  %v6342_v7 = vcombine.high %v689_v1, %v697_v2  ;;  %v284_v56 = vld [vmem:[#allocation2 + $0x2d8] sm:$0xff] }
 0x127   :  { %v6344_v8 = vcombine.high %v690_v3, %v698_v4  ;;  %v6343_v16 = vcombine.low %v690_v3, %v698_v4 }
 0x129   :  { %3321 = vmatpush1.bf16.msra.mxu0 %v6213_v10  ;;  %3403 = vmatpush1.bf16.msra.mxu1 %v6215_v11  ;;  %v203_v10 = vld [vmem:[#allocation2 + $0x50] sm:$0xff]  ;;  %v196_v11 = vld [vmem:[#allocation2 + $0x18] sm:$0xff] }
 0x12a   :  { %3322 = vmatprep.subr.bf16.mxu0 %v6230_v13  ;;  %3404 = vmatprep.subr.bf16.mxu1 %v6232_v14  ;;  %v204_v13 = vld [vmem:[#allocation2 + $0x58] sm:$0xff]  ;;  %v6341_v14 = vcombine.low %v689_v1, %v697_v2  ;;  %v5850_v17 = vcombine.high %v195_v9, %v203_v10  ;;  %v5849_v25 = vcombine.low %v195_v9, %v203_v10 }
 0x12b   :  { %v5852_v18 = vcombine.high %v196_v11, %v204_v13  ;;  %v5851_v26 = vcombine.low %v196_v11, %v204_v13  ;;  %v300_v1 = vld [vmem:[#allocation2 + $0x358] sm:$0xff] }
 0x12c   :  { %v316_v9 = vld [vmem:[#allocation2 + $0x3d8] sm:$0xff] }
 0x12d   :  { %3323 = vmatpush1.bf16.msra.mxu0 %v6229_v19  ;;  %3405 = vmatpush1.bf16.msra.mxu1 %v6231_v20  ;;  %v211_v19 = vld [vmem:[#allocation2 + $0x90] sm:$0xff] }
 0x12e   :  { %3324 = vmatprep.subr.bf16.mxu0 %v6246_v21  ;;  %3406 = vmatprep.subr.bf16.mxu1 %v6248_v23  ;;  %v219_v20 = vld [vmem:[#allocation2 + $0xd0] sm:$0xff]  ;;  %v7323_v21 = vpack.c.bf16 %v187_v15, %v187_v15  ;;  %v212_v23 = vld [vmem:[#allocation2 + $0x98] sm:$0xff] }
 0x12f   :  { %v5866_v27 = vcombine.high %v211_v19, %v219_v20  ;;  %v5865_v33 = vcombine.low %v211_v19, %v219_v20  ;;  %v5867_v34 = vcombine.low %v212_v23, %v220_v24  ;;  %v323_v15 = vld [vmem:[#allocation2 + $0x410] sm:$0xff] }
 0x131   :  { %3325 = vmatpush1.bf16.msra.mxu0 %v6245_v28  ;;  %3407 = vmatpush1.bf16.msra.mxu1 %v6247_v29  ;;  %v5868_v28 = vcombine.high %v212_v23, %v220_v24  ;;  %v227_v29 = vld [vmem:[#allocation2 + $0x110] sm:$0xff] }
 0x132   :  { %3326 = vmatprep.subr.bf16.mxu0 %v6262_v30  ;;  %3408 = vmatprep.subr.bf16.mxu1 %v6264_v31  ;;  %v235_v30 = vld [vmem:[#allocation2 + $0x150] sm:$0xff]  ;;  %v228_v31 = vld [vmem:[#allocation2 + $0x118] sm:$0xff] }
 0x133   :  { %v5882_v35 = vcombine.high %v227_v29, %v235_v30  ;;  %v5881_v41 = vcombine.low %v227_v29, %v235_v30  ;;  %v5883_v42 = vcombine.low %v228_v31, %v236_v32 }
 0x135   :  { %3327 = vmatpush1.bf16.msra.mxu0 %v6261_v36  ;;  %3409 = vmatpush1.bf16.msra.mxu1 %v6263_v37  ;;  %v5884_v36 = vcombine.high %v228_v31, %v236_v32  ;;  %v243_v37 = vld [vmem:[#allocation2 + $0x190] sm:$0xff] }
 0x136   :  { %3328 = vmatprep.subr.bf16.mxu0 %v6278_v38  ;;  %3410 = vmatprep.subr.bf16.mxu1 %v6280_v39  ;;  %v251_v38 = vld [vmem:[#allocation2 + $0x1d0] sm:$0xff]  ;;  %v244_v39 = vld [vmem:[#allocation2 + $0x198] sm:$0xff] }
 0x137   :  { %v5898_v43 = vcombine.high %v243_v37, %v251_v38  ;;  %v5897_v49 = vcombine.low %v243_v37, %v251_v38  ;;  %v5899_v50 = vcombine.low %v244_v39, %v252_v40 }
 0x139   :  { %3329 = vmatpush1.bf16.msra.mxu0 %v6277_v44  ;;  %3411 = vmatpush1.bf16.msra.mxu1 %v6279_v45  ;;  %v5900_v44 = vcombine.high %v244_v39, %v252_v40  ;;  %v259_v45 = vld [vmem:[#allocation2 + $0x210] sm:$0xff] }
 0x13a   :  { %3330 = vmatprep.subr.bf16.mxu0 %v6294_v46  ;;  %3412 = vmatprep.subr.bf16.mxu1 %v6296_v47  ;;  %v267_v46 = vld [vmem:[#allocation2 + $0x250] sm:$0xff]  ;;  %v260_v47 = vld [vmem:[#allocation2 + $0x218] sm:$0xff] }
 0x13b   :  { %v5914_v51 = vcombine.high %v259_v45, %v267_v46  ;;  %v5913_v58 = vcombine.low %v259_v45, %v267_v46  ;;  %v5915_v59 = vcombine.low %v260_v47, %v268_v48 }
 0x13d   :  { %3331 = vmatpush1.bf16.msra.mxu0 %v6293_v52  ;;  %3413 = vmatpush1.bf16.msra.mxu1 %v6295_v53  ;;  %v5916_v52 = vcombine.high %v260_v47, %v268_v48  ;;  %v275_v53 = vld [vmem:[#allocation2 + $0x290] sm:$0xff] }
 0x13e   :  { %3332 = vmatprep.subr.bf16.mxu0 %v6310_v54  ;;  %3414 = vmatprep.subr.bf16.mxu1 %v6312_v55  ;;  %v283_v54 = vld [vmem:[#allocation2 + $0x2d0] sm:$0xff]  ;;  %v276_v55 = vld [vmem:[#allocation2 + $0x298] sm:$0xff] }
 0x13f   :  { %v5930_v60 = vcombine.high %v275_v53, %v283_v54  ;;  %v5929_v2 = vcombine.low %v275_v53, %v283_v54  ;;  %v5931_v3 = vcombine.low %v276_v55, %v284_v56 }
 0x141   :  { %3333 = vmatpush1.bf16.msra.mxu0 %v6309_v61  ;;  %3415 = vmatpush1.bf16.msra.mxu1 %v6311_v62  ;;  %v5932_v61 = vcombine.high %v276_v55, %v284_v56  ;;  %v291_v62 = vld [vmem:[#allocation2 + $0x310] sm:$0xff] }
 0x142   :  { %3334 = vmatprep.subr.bf16.mxu0 %v6326_v63  ;;  %3416 = vmatprep.subr.bf16.mxu1 %v6328_v0  ;;  %v299_v63 = vld [vmem:[#allocation2 + $0x350] sm:$0xff]  ;;  %v292_v0 = vld [vmem:[#allocation2 + $0x318] sm:$0xff] }
 0x143   :  { %v5946_v4 = vcombine.high %v291_v62, %v299_v63  ;;  %v5945_v10 = vcombine.low %v291_v62, %v299_v63  ;;  %v5947_v11 = vcombine.low %v292_v0, %v300_v1 }
 0x145   :  { %3335 = vmatpush1.bf16.msra.mxu0 %v6325_v5  ;;  %3417 = vmatpush1.bf16.msra.mxu1 %v6327_v6  ;;  %v5948_v5 = vcombine.high %v292_v0, %v300_v1  ;;  %v307_v6 = vld [vmem:[#allocation2 + $0x390] sm:$0xff] }
 0x146   :  { %3336 = vmatprep.subr.bf16.mxu0 %v6342_v7  ;;  %3418 = vmatprep.subr.bf16.mxu1 %v6344_v8  ;;  %v315_v7 = vld [vmem:[#allocation2 + $0x3d0] sm:$0xff]  ;;  %v308_v8 = vld [vmem:[#allocation2 + $0x398] sm:$0xff] }
 0x147   :  { %v5962_v13 = vcombine.high %v307_v6, %v315_v7  ;;  %v5961_v19 = vcombine.low %v307_v6, %v315_v7  ;;  %v5963_v20 = vcombine.low %v308_v8, %v316_v9 }
 0x149   :  { %3337 = vmatpush1.bf16.msra.mxu0 %v6341_v14  ;;  %3419 = vmatpush1.bf16.msra.mxu1 %v6343_v16  ;;  %v5964_v14 = vcombine.high %v308_v8, %v316_v9  ;;  %v331_v16 = vld [vmem:[#allocation2 + $0x450] sm:$0xff] }
 0x14a   :  { %3429 = vmatprep.subr.bf16.mxu0 %v5850_v17  ;;  %3511 = vmatprep.subr.bf16.mxu1 %v5852_v18  ;;  %v324_v17 = vld [vmem:[#allocation2 + $0x418] sm:$0xff]  ;;  %v5978_v23 = vcombine.high %v323_v15, %v331_v16  ;;  %v5977_v29 = vcombine.low %v323_v15, %v331_v16 }
 0x14b   :  { %v332_v18 = vld [vmem:[#allocation2 + $0x458] sm:$0xff] }
 0x14c   :  { %3339 = vmatmul.mubr.bf16.vlgmr.msra.gmra.mrb[0].mxu0 %v7323_v21  ;;  %3421 = vmatmul.mubr.bf16.vlgmr.msra.gmra.mrb[0].mxu1 %v7323_v21  ;;  %v5980_v24 = vcombine.high %v324_v17, %v332_v18  ;;  %v5979_v30 = vcombine.low %v324_v17, %v332_v18 }
 0x14d   :  { %3430 = vmatpush1.bf16.msra.mxu0 %v5849_v25  ;;  %3512 = vmatpush1.bf16.msra.mxu1 %v5851_v26  ;;  %v339_v25 = vld [vmem:[#allocation2 + $0x490] sm:$0xff] }
 0x14e   :  { %3431 = vmatprep.subr.bf16.mxu0 %v5866_v27  ;;  %3513 = vmatprep.subr.bf16.mxu1 %v5868_v28  ;;  %v347_v26 = vld [vmem:[#allocation2 + $0x4d0] sm:$0xff]  ;;  %v340_v27 = vld [vmem:[#allocation2 + $0x498] sm:$0xff] }
 0x14f   :  { %3461 = vmatprep.mubr.bf16.mxu0 %v7302_v57  ;;  %3543 = vmatprep.mubr.bf16.mxu1 %v7302_v57  ;;  %v348_v28 = vld [vmem:[#allocation2 + $0x4d8] sm:$0xff]  ;;  %v5994_v31 = vcombine.high %v339_v25, %v347_v26  ;;  %v5993_v37 = vcombine.low %v339_v25, %v347_v26 }
 0x150   :  { %v5996_v32 = vcombine.high %v340_v27, %v348_v28  ;;  %v5995_v38 = vcombine.low %v340_v27, %v348_v28 }
 0x151   :  { %3432 = vmatpush1.bf16.msra.mxu0 %v5865_v33  ;;  %3514 = vmatpush1.bf16.msra.mxu1 %v5867_v34  ;;  %v355_v33 = vld [vmem:[#allocation2 + $0x510] sm:$0xff] }
 0x152   :  { %3433 = vmatprep.subr.bf16.mxu0 %v5882_v35  ;;  %3515 = vmatprep.subr.bf16.mxu1 %v5884_v36  ;;  %v363_v34 = vld [vmem:[#allocation2 + $0x550] sm:$0xff]  ;;  %v356_v35 = vld [vmem:[#allocation2 + $0x518] sm:$0xff] }
 0x153   :  { %v364_v36 = vld [vmem:[#allocation2 + $0x558] sm:$0xff]  ;;  %v6010_v39 = vcombine.high %v355_v33, %v363_v34  ;;  %v6009_v45 = vcombine.low %v355_v33, %v363_v34 }
 0x154   :  { %v6012_v40 = vcombine.high %v356_v35, %v364_v36  ;;  %v6011_v46 = vcombine.low %v356_v35, %v364_v36 }
 0x155   :  { %3434 = vmatpush1.bf16.msra.mxu0 %v5881_v41  ;;  %3516 = vmatpush1.bf16.msra.mxu1 %v5883_v42  ;;  %v371_v41 = vld [vmem:[#allocation2 + $0x590] sm:$0xff] }
 0x156   :  { %3435 = vmatprep.subr.bf16.mxu0 %v5898_v43  ;;  %3517 = vmatprep.subr.bf16.mxu1 %v5900_v44  ;;  %v379_v42 = vld [vmem:[#allocation2 + $0x5d0] sm:$0xff]  ;;  %v372_v43 = vld [vmem:[#allocation2 + $0x598] sm:$0xff] }
 0x157   :  { %v380_v44 = vld [vmem:[#allocation2 + $0x5d8] sm:$0xff]  ;;  %v6026_v47 = vcombine.high %v371_v41, %v379_v42  ;;  %v6025_v53 = vcombine.low %v371_v41, %v379_v42 }
 0x158   :  { %v6028_v48 = vcombine.high %v372_v43, %v380_v44  ;;  %v6027_v54 = vcombine.low %v372_v43, %v380_v44 }
 0x159   :  { %3436 = vmatpush1.bf16.msra.mxu0 %v5897_v49  ;;  %3518 = vmatpush1.bf16.msra.mxu1 %v5899_v50  ;;  %v387_v49 = vld [vmem:[#allocation2 + $0x610] sm:$0xff] }
 0x15a   :  { %3437 = vmatprep.subr.bf16.mxu0 %v5914_v51  ;;  %3519 = vmatprep.subr.bf16.mxu1 %v5916_v52  ;;  %v395_v50 = vld [vmem:[#allocation2 + $0x650] sm:$0xff]  ;;  %v388_v51 = vld [vmem:[#allocation2 + $0x618] sm:$0xff] }
 0x15b   :  { %v396_v52 = vld [vmem:[#allocation2 + $0x658] sm:$0xff]  ;;  %v6042_v55 = vcombine.high %v387_v49, %v395_v50  ;;  %v6041_v62 = vcombine.low %v387_v49, %v395_v50 }
 0x15c   :  { %v6044_v56 = vcombine.high %v388_v51, %v396_v52  ;;  %v6043_v63 = vcombine.low %v388_v51, %v396_v52 }
 0x15d   :  { %3438 = vmatpush1.bf16.msra.mxu0 %v5913_v58  ;;  %3520 = vmatpush1.bf16.msra.mxu1 %v5915_v59  ;;  %v403_v58 = vld [vmem:[#allocation2 + $0x690] sm:$0xff] }
 0x15e   :  { %3439 = vmatprep.subr.bf16.mxu0 %v5930_v60  ;;  %3521 = vmatprep.subr.bf16.mxu1 %v5932_v61  ;;  %v411_v59 = vld [vmem:[#allocation2 + $0x6d0] sm:$0xff]  ;;  %v404_v60 = vld [vmem:[#allocation2 + $0x698] sm:$0xff] }
 0x15f   :  { %v412_v61 = vld [vmem:[#allocation2 + $0x6d8] sm:$0xff]  ;;  %v6058_v0 = vcombine.high %v403_v58, %v411_v59  ;;  %v6057_v6 = vcombine.low %v403_v58, %v411_v59 }
 0x160   :  { %v6060_v1 = vcombine.high %v404_v60, %v412_v61  ;;  %v6059_v7 = vcombine.low %v404_v60, %v412_v61 }
 0x161   :  { %3440 = vmatpush1.bf16.msra.mxu0 %v5929_v2  ;;  %3522 = vmatpush1.bf16.msra.mxu1 %v5931_v3  ;;  %v419_v2 = vld [vmem:[#allocation2 + $0x710] sm:$0xff] }
 0x162   :  { %3441 = vmatprep.subr.bf16.mxu0 %v5946_v4  ;;  %3523 = vmatprep.subr.bf16.mxu1 %v5948_v5  ;;  %v427_v3 = vld [vmem:[#allocation2 + $0x750] sm:$0xff]  ;;  %v420_v4 = vld [vmem:[#allocation2 + $0x718] sm:$0xff] }
 0x163   :  { %v428_v5 = vld [vmem:[#allocation2 + $0x758] sm:$0xff]  ;;  %v6074_v8 = vcombine.high %v419_v2, %v427_v3  ;;  %v6073_v15 = vcombine.low %v419_v2, %v427_v3 }
 0x164   :  { %v6076_v9 = vcombine.high %v420_v4, %v428_v5  ;;  %v6075_v16 = vcombine.low %v420_v4, %v428_v5 }
 0x165   :  { %3442 = vmatpush1.bf16.msra.mxu0 %v5945_v10  ;;  %3524 = vmatpush1.bf16.msra.mxu1 %v5947_v11  ;;  %v435_v10 = vld [vmem:[#allocation2 + $0x790] sm:$0xff] }
 0x166   :  { %3443 = vmatprep.subr.bf16.mxu0 %v5962_v13  ;;  %3525 = vmatprep.subr.bf16.mxu1 %v5964_v14  ;;  %v443_v11 = vld [vmem:[#allocation2 + $0x7d0] sm:$0xff]  ;;  %v436_v13 = vld [vmem:[#allocation2 + $0x798] sm:$0xff] }
 0x167   :  { %v444_v14 = vld [vmem:[#allocation2 + $0x7d8] sm:$0xff]  ;;  %v6090_v17 = vcombine.high %v435_v10, %v443_v11  ;;  %v6089_v25 = vcombine.low %v435_v10, %v443_v11 }
 0x168   :  { %v6092_v18 = vcombine.high %v436_v13, %v444_v14  ;;  %v6091_v26 = vcombine.low %v436_v13, %v444_v14 }
 0x169   :  { %3444 = vmatpush1.bf16.msra.mxu0 %v5961_v19  ;;  %3526 = vmatpush1.bf16.msra.mxu1 %v5963_v20  ;;  %v451_v19 = vld [vmem:[#allocation2 + $0x810] sm:$0xff] }
 0x16a   :  { %3445 = vmatprep.subr.bf16.mxu0 %v5978_v23  ;;  %3527 = vmatprep.subr.bf16.mxu1 %v5980_v24  ;;  %v459_v20 = vld [vmem:[#allocation2 + $0x850] sm:$0xff]  ;;  %v452_v23 = vld [vmem:[#allocation2 + $0x818] sm:$0xff] }
 0x16b   :  { %v460_v24 = vld [vmem:[#allocation2 + $0x858] sm:$0xff]  ;;  %v6106_v27 = vcombine.high %v451_v19, %v459_v20  ;;  %v6105_v33 = vcombine.low %v451_v19, %v459_v20 }
 0x16c   :  { %v6108_v28 = vcombine.high %v452_v23, %v460_v24  ;;  %v6107_v34 = vcombine.low %v452_v23, %v460_v24 }
 0x16d   :  { %3446 = vmatpush1.bf16.msra.mxu0 %v5977_v29  ;;  %3528 = vmatpush1.bf16.msra.mxu1 %v5979_v30  ;;  %v467_v29 = vld [vmem:[#allocation2 + $0x890] sm:$0xff] }
 0x16e   :  { %3447 = vmatprep.subr.bf16.mxu0 %v5994_v31  ;;  %3529 = vmatprep.subr.bf16.mxu1 %v5996_v32  ;;  %v475_v30 = vld [vmem:[#allocation2 + $0x8d0] sm:$0xff]  ;;  %v468_v31 = vld [vmem:[#allocation2 + $0x898] sm:$0xff] }
 0x16f   :  { %v476_v32 = vld [vmem:[#allocation2 + $0x8d8] sm:$0xff]  ;;  %v6122_v35 = vcombine.high %v467_v29, %v475_v30  ;;  %v6121_v41 = vcombine.low %v467_v29, %v475_v30 }
 0x170   :  { %v6124_v36 = vcombine.high %v468_v31, %v476_v32  ;;  %v6123_v42 = vcombine.low %v468_v31, %v476_v32 }
 0x171   :  { %3448 = vmatpush1.bf16.msra.mxu0 %v5993_v37  ;;  %3530 = vmatpush1.bf16.msra.mxu1 %v5995_v38  ;;  %v483_v37 = vld [vmem:[#allocation2 + $0x910] sm:$0xff] }
 0x172   :  { %3449 = vmatprep.subr.bf16.mxu0 %v6010_v39  ;;  %3531 = vmatprep.subr.bf16.mxu1 %v6012_v40  ;;  %v491_v38 = vld [vmem:[#allocation2 + $0x950] sm:$0xff]  ;;  %v484_v39 = vld [vmem:[#allocation2 + $0x918] sm:$0xff] }
 0x173   :  { %v492_v40 = vld [vmem:[#allocation2 + $0x958] sm:$0xff]  ;;  %v6138_v43 = vcombine.high %v483_v37, %v491_v38  ;;  %v6137_v49 = vcombine.low %v483_v37, %v491_v38 }
 0x174   :  { %v6140_v44 = vcombine.high %v484_v39, %v492_v40  ;;  %v6139_v50 = vcombine.low %v484_v39, %v492_v40 }
 0x175   :  { %3450 = vmatpush1.bf16.msra.mxu0 %v6009_v45  ;;  %3532 = vmatpush1.bf16.msra.mxu1 %v6011_v46  ;;  %v499_v45 = vld [vmem:[#allocation2 + $0x990] sm:$0xff] }
 0x176   :  { %3451 = vmatprep.subr.bf16.mxu0 %v6026_v47  ;;  %3533 = vmatprep.subr.bf16.mxu1 %v6028_v48  ;;  %v507_v46 = vld [vmem:[#allocation2 + $0x9d0] sm:$0xff]  ;;  %v500_v47 = vld [vmem:[#allocation2 + $0x998] sm:$0xff] }
 0x177   :  { %v508_v48 = vld [vmem:[#allocation2 + $0x9d8] sm:$0xff]  ;;  %v6154_v51 = vcombine.high %v499_v45, %v507_v46  ;;  %v6153_v58 = vcombine.low %v499_v45, %v507_v46 }
 0x178   :  { %v6156_v52 = vcombine.high %v500_v47, %v508_v48  ;;  %v6155_v59 = vcombine.low %v500_v47, %v508_v48 }
 0x179   :  { %3452 = vmatpush1.bf16.msra.mxu0 %v6025_v53  ;;  %3534 = vmatpush1.bf16.msra.mxu1 %v6027_v54  ;;  %v515_v53 = vld [vmem:[#allocation2 + $0xa10] sm:$0xff] }
 0x17a   :  { %3453 = vmatprep.subr.bf16.mxu0 %v6042_v55  ;;  %3535 = vmatprep.subr.bf16.mxu1 %v6044_v56  ;;  %v523_v54 = vld [vmem:[#allocation2 + $0xa50] sm:$0xff]  ;;  %v516_v55 = vld [vmem:[#allocation2 + $0xa18] sm:$0xff] }
 0x17b   :  { %v524_v56 = vld [vmem:[#allocation2 + $0xa58] sm:$0xff]  ;;  %v6170_v60 = vcombine.high %v515_v53, %v523_v54  ;;  %v6169_v2 = vcombine.low %v515_v53, %v523_v54 }
 0x17c   :  { %v6172_v61 = vcombine.high %v516_v55, %v524_v56  ;;  %v6171_v3 = vcombine.low %v516_v55, %v524_v56 }
 0x17d   :  { %3454 = vmatpush1.bf16.msra.mxu0 %v6041_v62  ;;  %3536 = vmatpush1.bf16.msra.mxu1 %v6043_v63  ;;  %v531_v62 = vld [vmem:[#allocation2 + $0xa90] sm:$0xff] }
 0x17e   :  { %3455 = vmatprep.subr.bf16.mxu0 %v6058_v0  ;;  %3537 = vmatprep.subr.bf16.mxu1 %v6060_v1  ;;  %v539_v63 = vld [vmem:[#allocation2 + $0xad0] sm:$0xff]  ;;  %v532_v0 = vld [vmem:[#allocation2 + $0xa98] sm:$0xff] }
 0x17f   :  { %v540_v1 = vld [vmem:[#allocation2 + $0xad8] sm:$0xff]  ;;  %v6186_v4 = vcombine.high %v531_v62, %v539_v63  ;;  %v6185_v10 = vcombine.low %v531_v62, %v539_v63 }
 0x180   :  { %v6188_v5 = vcombine.high %v532_v0, %v540_v1  ;;  %v6187_v11 = vcombine.low %v532_v0, %v540_v1 }
 0x181   :  { %3456 = vmatpush1.bf16.msra.mxu0 %v6057_v6  ;;  %3538 = vmatpush1.bf16.msra.mxu1 %v6059_v7  ;;  %v547_v6 = vld [vmem:[#allocation2 + $0xb10] sm:$0xff] }
 0x182   :  { %3457 = vmatprep.subr.bf16.mxu0 %v6074_v8  ;;  %3539 = vmatprep.subr.bf16.mxu1 %v6076_v9  ;;  %v555_v7 = vld [vmem:[#allocation2 + $0xb50] sm:$0xff]  ;;  %v548_v8 = vld [vmem:[#allocation2 + $0xb18] sm:$0xff] }
 0x183   :  { %v556_v9 = vld [vmem:[#allocation2 + $0xb58] sm:$0xff]  ;;  %v6202_v13 = vcombine.high %v547_v6, %v555_v7  ;;  %v6201_v19 = vcombine.low %v547_v6, %v555_v7 }
 0x184   :  { %v6204_v14 = vcombine.high %v548_v8, %v556_v9  ;;  %v6203_v20 = vcombine.low %v548_v8, %v556_v9 }
 0x185   :  { %3458 = vmatpush1.bf16.msra.mxu0 %v6073_v15  ;;  %3540 = vmatpush1.bf16.msra.mxu1 %v6075_v16  ;;  %v563_v15 = vld [vmem:[#allocation2 + $0xb90] sm:$0xff] }
 0x186   :  { %3459 = vmatprep.subr.bf16.mxu0 %v6090_v17  ;;  %3541 = vmatprep.subr.bf16.mxu1 %v6092_v18  ;;  %v571_v16 = vld [vmem:[#allocation2 + $0xbd0] sm:$0xff]  ;;  %v564_v17 = vld [vmem:[#allocation2 + $0xb98] sm:$0xff] }
 0x187   :  { %v572_v18 = vld [vmem:[#allocation2 + $0xbd8] sm:$0xff]  ;;  %v6218_v23 = vcombine.high %v563_v15, %v571_v16  ;;  %v6217_v29 = vcombine.low %v563_v15, %v571_v16 }
 0x188   :  { %v6220_v24 = vcombine.high %v564_v17, %v572_v18  ;;  %v6219_v30 = vcombine.low %v564_v17, %v572_v18 }
 0x189   :  { %3460 = vmatpush1.bf16.msra.mxu0 %v6089_v25  ;;  %3542 = vmatpush1.bf16.msra.mxu1 %v6091_v26  ;;  %v579_v25 = vld [vmem:[#allocation2 + $0xc10] sm:$0xff] }
 0x18a   :  { %3470 = vmatprep.subr.bf16.mxu0 %v6106_v27  ;;  %3552 = vmatprep.subr.bf16.mxu1 %v6108_v28  ;;  %v587_v26 = vld [vmem:[#allocation2 + $0xc50] sm:$0xff]  ;;  %v580_v27 = vld [vmem:[#allocation2 + $0xc18] sm:$0xff] }
 0x18b   :  { %v588_v28 = vld [vmem:[#allocation2 + $0xc58] sm:$0xff]  ;;  %v6234_v31 = vcombine.high %v579_v25, %v587_v26  ;;  %v6233_v37 = vcombine.low %v579_v25, %v587_v26 }
 0x18c   :  { %3462 = vmatmul.mubr.bf16.vlgmr.msra.gmra.mrb[4].mxu0 %v7309_v12  ;;  %3544 = vmatmul.mubr.bf16.vlgmr.msra.gmra.mrb[4].mxu1 %v7309_v12  ;;  %v6236_v32 = vcombine.high %v580_v27, %v588_v28  ;;  %v6235_v38 = vcombine.low %v580_v27, %v588_v28 }
 0x18d   :  { %3471 = vmatpush1.bf16.msra.mxu0 %v6105_v33  ;;  %3553 = vmatpush1.bf16.msra.mxu1 %v6107_v34  ;;  %v595_v33 = vld [vmem:[#allocation2 + $0xc90] sm:$0xff] }
 0x18e   :  { %3472 = vmatprep.subr.bf16.mxu0 %v6122_v35  ;;  %3554 = vmatprep.subr.bf16.mxu1 %v6124_v36  ;;  %v603_v34 = vld [vmem:[#allocation2 + $0xcd0] sm:$0xff]  ;;  %v596_v35 = vld [vmem:[#allocation2 + $0xc98] sm:$0xff] }
 0x18f   :  { %3502 = vmatprep.mubr.bf16.mxu0 %v7314_v22  ;;  %3584 = vmatprep.mubr.bf16.mxu1 %v7314_v22  ;;  %v604_v36 = vld [vmem:[#allocation2 + $0xcd8] sm:$0xff]  ;;  %v6250_v39 = vcombine.high %v595_v33, %v603_v34  ;;  %v6249_v45 = vcombine.low %v595_v33, %v603_v34 }
 0x190   :  { %v6252_v40 = vcombine.high %v596_v35, %v604_v36  ;;  %v6251_v46 = vcombine.low %v596_v35, %v604_v36 }
 0x191   :  { %3473 = vmatpush1.bf16.msra.mxu0 %v6121_v41  ;;  %3555 = vmatpush1.bf16.msra.mxu1 %v6123_v42  ;;  %v611_v41 = vld [vmem:[#allocation2 + $0xd10] sm:$0xff] }
 0x192   :  { %3474 = vmatprep.subr.bf16.mxu0 %v6138_v43  ;;  %3556 = vmatprep.subr.bf16.mxu1 %v6140_v44  ;;  %v619_v42 = vld [vmem:[#allocation2 + $0xd50] sm:$0xff]  ;;  %v612_v43 = vld [vmem:[#allocation2 + $0xd18] sm:$0xff] }
 0x193   :  { %v620_v44 = vld [vmem:[#allocation2 + $0xd58] sm:$0xff]  ;;  %v6266_v47 = vcombine.high %v611_v41, %v619_v42  ;;  %v6265_v53 = vcombine.low %v611_v41, %v619_v42 }
 0x194   :  { %v6268_v48 = vcombine.high %v612_v43, %v620_v44  ;;  %v6267_v54 = vcombine.low %v612_v43, %v620_v44 }
 0x195   :  { %3475 = vmatpush1.bf16.msra.mxu0 %v6137_v49  ;;  %3557 = vmatpush1.bf16.msra.mxu1 %v6139_v50  ;;  %v627_v49 = vld [vmem:[#allocation2 + $0xd90] sm:$0xff] }
 0x196   :  { %3476 = vmatprep.subr.bf16.mxu0 %v6154_v51  ;;  %3558 = vmatprep.subr.bf16.mxu1 %v6156_v52  ;;  %v635_v50 = vld [vmem:[#allocation2 + $0xdd0] sm:$0xff]  ;;  %v628_v51 = vld [vmem:[#allocation2 + $0xd98] sm:$0xff] }
 0x197   :  { %v636_v52 = vld [vmem:[#allocation2 + $0xdd8] sm:$0xff]  ;;  %v6282_v55 = vcombine.high %v627_v49, %v635_v50  ;;  %v6281_v62 = vcombine.low %v627_v49, %v635_v50 }
 0x198   :  { %v6284_v56 = vcombine.high %v628_v51, %v636_v52  ;;  %v6283_v63 = vcombine.low %v628_v51, %v636_v52 }
 0x199   :  { %3477 = vmatpush1.bf16.msra.mxu0 %v6153_v58  ;;  %3559 = vmatpush1.bf16.msra.mxu1 %v6155_v59  ;;  %v643_v58 = vld [vmem:[#allocation2 + $0xe10] sm:$0xff] }
 0x19a   :  { %3478 = vmatprep.subr.bf16.mxu0 %v6170_v60  ;;  %3560 = vmatprep.subr.bf16.mxu1 %v6172_v61  ;;  %v651_v59 = vld [vmem:[#allocation2 + $0xe50] sm:$0xff]  ;;  %v644_v60 = vld [vmem:[#allocation2 + $0xe18] sm:$0xff] }
 0x19b   :  { %v652_v61 = vld [vmem:[#allocation2 + $0xe58] sm:$0xff]  ;;  %v6298_v0 = vcombine.high %v643_v58, %v651_v59  ;;  %v6297_v6 = vcombine.low %v643_v58, %v651_v59 }
 0x19c   :  { %v6300_v1 = vcombine.high %v644_v60, %v652_v61  ;;  %v6299_v7 = vcombine.low %v644_v60, %v652_v61 }
 0x19d   :  { %3479 = vmatpush1.bf16.msra.mxu0 %v6169_v2  ;;  %3561 = vmatpush1.bf16.msra.mxu1 %v6171_v3  ;;  %v659_v2 = vld [vmem:[#allocation2 + $0xe90] sm:$0xff] }
 0x19e   :  { %3480 = vmatprep.subr.bf16.mxu0 %v6186_v4  ;;  %3562 = vmatprep.subr.bf16.mxu1 %v6188_v5  ;;  %v667_v3 = vld [vmem:[#allocation2 + $0xed0] sm:$0xff]  ;;  %v660_v4 = vld [vmem:[#allocation2 + $0xe98] sm:$0xff] }
 0x19f   :  { %v668_v5 = vld [vmem:[#allocation2 + $0xed8] sm:$0xff]  ;;  %v6314_v8 = vcombine.high %v659_v2, %v667_v3  ;;  %v6313_v15 = vcombine.low %v659_v2, %v667_v3 }
 0x1a0   :  { %v6316_v9 = vcombine.high %v660_v4, %v668_v5  ;;  %v6315_v16 = vcombine.low %v660_v4, %v668_v5 }
 0x1a1   :  { %3481 = vmatpush1.bf16.msra.mxu0 %v6185_v10  ;;  %3563 = vmatpush1.bf16.msra.mxu1 %v6187_v11  ;;  %v675_v10 = vld [vmem:[#allocation2 + $0xf10] sm:$0xff] }
 0x1a2   :  { %3482 = vmatprep.subr.bf16.mxu0 %v6202_v13  ;;  %3564 = vmatprep.subr.bf16.mxu1 %v6204_v14  ;;  %v683_v11 = vld [vmem:[#allocation2 + $0xf50] sm:$0xff]  ;;  %v676_v13 = vld [vmem:[#allocation2 + $0xf18] sm:$0xff] }
 0x1a3   :  { %v684_v14 = vld [vmem:[#allocation2 + $0xf58] sm:$0xff]  ;;  %v6330_v17 = vcombine.high %v675_v10, %v683_v11  ;;  %v6329_v25 = vcombine.low %v675_v10, %v683_v11 }
 0x1a4   :  { %v6332_v18 = vcombine.high %v676_v13, %v684_v14  ;;  %v6331_v26 = vcombine.low %v676_v13, %v684_v14 }
 0x1a5   :  { %3483 = vmatpush1.bf16.msra.mxu0 %v6201_v19  ;;  %3565 = vmatpush1.bf16.msra.mxu1 %v6203_v20  ;;  %v691_v19 = vld [vmem:[#allocation2 + $0xf90] sm:$0xff] }
 0x1a6   :  { %3484 = vmatprep.subr.bf16.mxu0 %v6218_v23  ;;  %3566 = vmatprep.subr.bf16.mxu1 %v6220_v24  ;;  %v699_v20 = vld [vmem:[#allocation2 + $0xfd0] sm:$0xff]  ;;  %v692_v23 = vld [vmem:[#allocation2 + $0xf98] sm:$0xff] }
 0x1a7   :  { %v700_v24 = vld [vmem:[#allocation2 + $0xfd8] sm:$0xff]  ;;  %v6346_v27 = vcombine.high %v691_v19, %v699_v20  ;;  %v6345_v33 = vcombine.low %v691_v19, %v699_v20 }
 0x1a8   :  { %v6348_v28 = vcombine.high %v692_v23, %v700_v24  ;;  %v6347_v34 = vcombine.low %v692_v23, %v700_v24 }
 0x1a9   :  { %3485 = vmatpush1.bf16.msra.mxu0 %v6217_v29  ;;  %3567 = vmatpush1.bf16.msra.mxu1 %v6219_v30  ;;  %v197_v29 = vld [vmem:[#allocation2 + $0x20] sm:$0xff] }
 0x1aa   :  { %3486 = vmatprep.subr.bf16.mxu0 %v6234_v31  ;;  %3568 = vmatprep.subr.bf16.mxu1 %v6236_v32  ;;  %v205_v30 = vld [vmem:[#allocation2 + $0x60] sm:$0xff]  ;;  %v198_v31 = vld [vmem:[#allocation2 + $0x28] sm:$0xff] }
 0x1ab   :  { %v206_v32 = vld [vmem:[#allocation2 + $0x68] sm:$0xff]  ;;  %v5854_v35 = vcombine.high %v197_v29, %v205_v30  ;;  %v5853_v41 = vcombine.low %v197_v29, %v205_v30 }
 0x1ac   :  { %v5856_v36 = vcombine.high %v198_v31, %v206_v32  ;;  %v5855_v42 = vcombine.low %v198_v31, %v206_v32 }
 0x1ad   :  { %3487 = vmatpush1.bf16.msra.mxu0 %v6233_v37  ;;  %3569 = vmatpush1.bf16.msra.mxu1 %v6235_v38  ;;  %v213_v37 = vld [vmem:[#allocation2 + $0xa0] sm:$0xff] }
 0x1ae   :  { %3488 = vmatprep.subr.bf16.mxu0 %v6250_v39  ;;  %3570 = vmatprep.subr.bf16.mxu1 %v6252_v40  ;;  %v221_v38 = vld [vmem:[#allocation2 + $0xe0] sm:$0xff]  ;;  %v214_v39 = vld [vmem:[#allocation2 + $0xa8] sm:$0xff] }
 0x1af   :  { %v222_v40 = vld [vmem:[#allocation2 + $0xe8] sm:$0xff]  ;;  %v5870_v43 = vcombine.high %v213_v37, %v221_v38  ;;  %v5869_v49 = vcombine.low %v213_v37, %v221_v38 }
 0x1b0   :  { %v5872_v44 = vcombine.high %v214_v39, %v222_v40  ;;  %v5871_v50 = vcombine.low %v214_v39, %v222_v40 }
 0x1b1   :  { %3489 = vmatpush1.bf16.msra.mxu0 %v6249_v45  ;;  %3571 = vmatpush1.bf16.msra.mxu1 %v6251_v46  ;;  %v229_v45 = vld [vmem:[#allocation2 + $0x120] sm:$0xff] }
 0x1b2   :  { %3490 = vmatprep.subr.bf16.mxu0 %v6266_v47  ;;  %3572 = vmatprep.subr.bf16.mxu1 %v6268_v48  ;;  %v237_v46 = vld [vmem:[#allocation2 + $0x160] sm:$0xff]  ;;  %v230_v47 = vld [vmem:[#allocation2 + $0x128] sm:$0xff] }
 0x1b3   :  { %v238_v48 = vld [vmem:[#allocation2 + $0x168] sm:$0xff]  ;;  %v5886_v51 = vcombine.high %v229_v45, %v237_v46  ;;  %v5885_v58 = vcombine.low %v229_v45, %v237_v46 }
 0x1b4   :  { %v5888_v52 = vcombine.high %v230_v47, %v238_v48  ;;  %v5887_v59 = vcombine.low %v230_v47, %v238_v48 }
 0x1b5   :  { %3491 = vmatpush1.bf16.msra.mxu0 %v6265_v53  ;;  %3573 = vmatpush1.bf16.msra.mxu1 %v6267_v54  ;;  %v245_v53 = vld [vmem:[#allocation2 + $0x1a0] sm:$0xff] }
 0x1b6   :  { %3492 = vmatprep.subr.bf16.mxu0 %v6282_v55  ;;  %3574 = vmatprep.subr.bf16.mxu1 %v6284_v56  ;;  %v253_v54 = vld [vmem:[#allocation2 + $0x1e0] sm:$0xff]  ;;  %v246_v55 = vld [vmem:[#allocation2 + $0x1a8] sm:$0xff] }
 0x1b7   :  { %v254_v56 = vld [vmem:[#allocation2 + $0x1e8] sm:$0xff]  ;;  %v5902_v60 = vcombine.high %v245_v53, %v253_v54  ;;  %v5901_v2 = vcombine.low %v245_v53, %v253_v54 }
 0x1b8   :  { %v5904_v61 = vcombine.high %v246_v55, %v254_v56  ;;  %v5903_v3 = vcombine.low %v246_v55, %v254_v56 }
 0x1b9   :  { %3493 = vmatpush1.bf16.msra.mxu0 %v6281_v62  ;;  %3575 = vmatpush1.bf16.msra.mxu1 %v6283_v63  ;;  %v261_v62 = vld [vmem:[#allocation2 + $0x220] sm:$0xff] }
 0x1ba   :  { %3494 = vmatprep.subr.bf16.mxu0 %v6298_v0  ;;  %3576 = vmatprep.subr.bf16.mxu1 %v6300_v1  ;;  %v269_v63 = vld [vmem:[#allocation2 + $0x260] sm:$0xff]  ;;  %v262_v0 = vld [vmem:[#allocation2 + $0x228] sm:$0xff] }
 0x1bb   :  { %v270_v1 = vld [vmem:[#allocation2 + $0x268] sm:$0xff]  ;;  %v5918_v4 = vcombine.high %v261_v62, %v269_v63  ;;  %v5917_v10 = vcombine.low %v261_v62, %v269_v63 }
 0x1bc   :  { %v5920_v5 = vcombine.high %v262_v0, %v270_v1  ;;  %v5919_v11 = vcombine.low %v262_v0, %v270_v1 }
 0x1bd   :  { %3495 = vmatpush1.bf16.msra.mxu0 %v6297_v6  ;;  %3577 = vmatpush1.bf16.msra.mxu1 %v6299_v7  ;;  %v277_v6 = vld [vmem:[#allocation2 + $0x2a0] sm:$0xff] }
 0x1be   :  { %3496 = vmatprep.subr.bf16.mxu0 %v6314_v8  ;;  %3578 = vmatprep.subr.bf16.mxu1 %v6316_v9  ;;  %v285_v7 = vld [vmem:[#allocation2 + $0x2e0] sm:$0xff]  ;;  %v278_v8 = vld [vmem:[#allocation2 + $0x2a8] sm:$0xff] }
 0x1bf   :  { %v286_v9 = vld [vmem:[#allocation2 + $0x2e8] sm:$0xff]  ;;  %v5934_v13 = vcombine.high %v277_v6, %v285_v7  ;;  %v5933_v19 = vcombine.low %v277_v6, %v285_v7 }
 0x1c0   :  { %v5936_v14 = vcombine.high %v278_v8, %v286_v9  ;;  %v5935_v20 = vcombine.low %v278_v8, %v286_v9 }
 0x1c1   :  { %3497 = vmatpush1.bf16.msra.mxu0 %v6313_v15  ;;  %3579 = vmatpush1.bf16.msra.mxu1 %v6315_v16  ;;  %v293_v15 = vld [vmem:[#allocation2 + $0x320] sm:$0xff] }
 0x1c2   :  { %3498 = vmatprep.subr.bf16.mxu0 %v6330_v17  ;;  %3580 = vmatprep.subr.bf16.mxu1 %v6332_v18  ;;  %v301_v16 = vld [vmem:[#allocation2 + $0x360] sm:$0xff]  ;;  %v294_v17 = vld [vmem:[#allocation2 + $0x328] sm:$0xff] }
 0x1c3   :  { %v302_v18 = vld [vmem:[#allocation2 + $0x368] sm:$0xff]  ;;  %v5950_v23 = vcombine.high %v293_v15, %v301_v16  ;;  %v5949_v29 = vcombine.low %v293_v15, %v301_v16 }
 0x1c4   :  { %v5952_v24 = vcombine.high %v294_v17, %v302_v18  ;;  %v5951_v30 = vcombine.low %v294_v17, %v302_v18 }
 0x1c5   :  { %3499 = vmatpush1.bf16.msra.mxu0 %v6329_v25  ;;  %3581 = vmatpush1.bf16.msra.mxu1 %v6331_v26  ;;  %v309_v25 = vld [vmem:[#allocation2 + $0x3a0] sm:$0xff] }
 0x1c6   :  { %3500 = vmatprep.subr.bf16.mxu0 %v6346_v27  ;;  %3582 = vmatprep.subr.bf16.mxu1 %v6348_v28  ;;  %v317_v26 = vld [vmem:[#allocation2 + $0x3e0] sm:$0xff]  ;;  %v310_v27 = vld [vmem:[#allocation2 + $0x3a8] sm:$0xff] }
 0x1c7   :  { %v318_v28 = vld [vmem:[#allocation2 + $0x3e8] sm:$0xff]  ;;  %v5966_v31 = vcombine.high %v309_v25, %v317_v26  ;;  %v5965_v37 = vcombine.low %v309_v25, %v317_v26 }
 0x1c8   :  { %v5968_v32 = vcombine.high %v310_v27, %v318_v28  ;;  %v5967_v38 = vcombine.low %v310_v27, %v318_v28 }
 0x1c9   :  { %3501 = vmatpush1.bf16.msra.mxu0 %v6345_v33  ;;  %3583 = vmatpush1.bf16.msra.mxu1 %v6347_v34  ;;  %v325_v33 = vld [vmem:[#allocation2 + $0x420] sm:$0xff] }
 0x1ca   :  { %3593 = vmatprep.subr.bf16.mxu0 %v5854_v35  ;;  %3675 = vmatprep.subr.bf16.mxu1 %v5856_v36  ;;  %v333_v34 = vld [vmem:[#allocation2 + $0x460] sm:$0xff]  ;;  %v326_v35 = vld [vmem:[#allocation2 + $0x428] sm:$0xff] }
 0x1cb   :  { %v334_v36 = vld [vmem:[#allocation2 + $0x468] sm:$0xff]  ;;  %v5982_v39 = vcombine.high %v325_v33, %v333_v34  ;;  %v5981_v45 = vcombine.low %v325_v33, %v333_v34 }
 0x1cc   :  { %3503 = vmatmul.mubr.bf16.vlgmr.msra.gmra.mrb[4].mxu0 %v7323_v21  ;;  %3585 = vmatmul.mubr.bf16.vlgmr.msra.gmra.mrb[4].mxu1 %v7323_v21  ;;  %v5984_v40 = vcombine.high %v326_v35, %v334_v36  ;;  %v5983_v46 = vcombine.low %v326_v35, %v334_v36 }
 0x1cd   :  { %3594 = vmatpush1.bf16.msra.mxu0 %v5853_v41  ;;  %3676 = vmatpush1.bf16.msra.mxu1 %v5855_v42  ;;  %v341_v41 = vld [vmem:[#allocation2 + $0x4a0] sm:$0xff] }
 0x1ce   :  { %3595 = vmatprep.subr.bf16.mxu0 %v5870_v43  ;;  %3677 = vmatprep.subr.bf16.mxu1 %v5872_v44  ;;  %v349_v42 = vld [vmem:[#allocation2 + $0x4e0] sm:$0xff]  ;;  %v342_v43 = vld [vmem:[#allocation2 + $0x4a8] sm:$0xff] }
 0x1cf   :  { %3625 = vmatprep.mubr.bf16.mxu0 %v7302_v57  ;;  %3707 = vmatprep.mubr.bf16.mxu1 %v7302_v57  ;;  %v350_v44 = vld [vmem:[#allocation2 + $0x4e8] sm:$0xff]  ;;  %v5998_v47 = vcombine.high %v341_v41, %v349_v42  ;;  %v5997_v53 = vcombine.low %v341_v41, %v349_v42 }
 0x1d0   :  { %v6000_v48 = vcombine.high %v342_v43, %v350_v44  ;;  %v5999_v54 = vcombine.low %v342_v43, %v350_v44 }
 0x1d1   :  { %3596 = vmatpush1.bf16.msra.mxu0 %v5869_v49  ;;  %3678 = vmatpush1.bf16.msra.mxu1 %v5871_v50  ;;  %v357_v49 = vld [vmem:[#allocation2 + $0x520] sm:$0xff] }
 0x1d2   :  { %3597 = vmatprep.subr.bf16.mxu0 %v5886_v51  ;;  %3679 = vmatprep.subr.bf16.mxu1 %v5888_v52  ;;  %v365_v50 = vld [vmem:[#allocation2 + $0x560] sm:$0xff]  ;;  %v358_v51 = vld [vmem:[#allocation2 + $0x528] sm:$0xff] }
 0x1d3   :  { %v366_v52 = vld [vmem:[#allocation2 + $0x568] sm:$0xff]  ;;  %v6014_v55 = vcombine.high %v357_v49, %v365_v50  ;;  %v6013_v62 = vcombine.low %v357_v49, %v365_v50 }
 0x1d4   :  { %v6016_v56 = vcombine.high %v358_v51, %v366_v52  ;;  %v6015_v63 = vcombine.low %v358_v51, %v366_v52 }
 0x1d5   :  { %3598 = vmatpush1.bf16.msra.mxu0 %v5885_v58  ;;  %3680 = vmatpush1.bf16.msra.mxu1 %v5887_v59  ;;  %v373_v58 = vld [vmem:[#allocation2 + $0x5a0] sm:$0xff] }
 0x1d6   :  { %3599 = vmatprep.subr.bf16.mxu0 %v5902_v60  ;;  %3681 = vmatprep.subr.bf16.mxu1 %v5904_v61  ;;  %v381_v59 = vld [vmem:[#allocation2 + $0x5e0] sm:$0xff]  ;;  %v374_v60 = vld [vmem:[#allocation2 + $0x5a8] sm:$0xff] }
 0x1d7   :  { %v382_v61 = vld [vmem:[#allocation2 + $0x5e8] sm:$0xff]  ;;  %v6030_v0 = vcombine.high %v373_v58, %v381_v59  ;;  %v6029_v6 = vcombine.low %v373_v58, %v381_v59 }
 0x1d8   :  { %v6032_v1 = vcombine.high %v374_v60, %v382_v61  ;;  %v6031_v7 = vcombine.low %v374_v60, %v382_v61 }
 0x1d9   :  { %3600 = vmatpush1.bf16.msra.mxu0 %v5901_v2  ;;  %3682 = vmatpush1.bf16.msra.mxu1 %v5903_v3  ;;  %v389_v2 = vld [vmem:[#allocation2 + $0x620] sm:$0xff] }
 0x1da   :  { %3601 = vmatprep.subr.bf16.mxu0 %v5918_v4  ;;  %3683 = vmatprep.subr.bf16.mxu1 %v5920_v5  ;;  %v397_v3 = vld [vmem:[#allocation2 + $0x660] sm:$0xff]  ;;  %v390_v4 = vld [vmem:[#allocation2 + $0x628] sm:$0xff] }
 0x1db   :  { %v398_v5 = vld [vmem:[#allocation2 + $0x668] sm:$0xff]  ;;  %v6046_v8 = vcombine.high %v389_v2, %v397_v3  ;;  %v6045_v15 = vcombine.low %v389_v2, %v397_v3 }
 0x1dc   :  { %v6048_v9 = vcombine.high %v390_v4, %v398_v5  ;;  %v6047_v16 = vcombine.low %v390_v4, %v398_v5 }
 0x1dd   :  { %3602 = vmatpush1.bf16.msra.mxu0 %v5917_v10  ;;  %3684 = vmatpush1.bf16.msra.mxu1 %v5919_v11  ;;  %v405_v10 = vld [vmem:[#allocation2 + $0x6a0] sm:$0xff] }
 0x1de   :  { %3603 = vmatprep.subr.bf16.mxu0 %v5934_v13  ;;  %3685 = vmatprep.subr.bf16.mxu1 %v5936_v14  ;;  %v413_v11 = vld [vmem:[#allocation2 + $0x6e0] sm:$0xff]  ;;  %v406_v13 = vld [vmem:[#allocation2 + $0x6a8] sm:$0xff] }
 0x1df   :  { %v414_v14 = vld [vmem:[#allocation2 + $0x6e8] sm:$0xff]  ;;  %v6062_v17 = vcombine.high %v405_v10, %v413_v11  ;;  %v6061_v25 = vcombine.low %v405_v10, %v413_v11 }
 0x1e0   :  { %v6064_v18 = vcombine.high %v406_v13, %v414_v14  ;;  %v6063_v26 = vcombine.low %v406_v13, %v414_v14 }
 0x1e1   :  { %3604 = vmatpush1.bf16.msra.mxu0 %v5933_v19  ;;  %3686 = vmatpush1.bf16.msra.mxu1 %v5935_v20  ;;  %v421_v19 = vld [vmem:[#allocation2 + $0x720] sm:$0xff] }
 0x1e2   :  { %3605 = vmatprep.subr.bf16.mxu0 %v5950_v23  ;;  %3687 = vmatprep.subr.bf16.mxu1 %v5952_v24  ;;  %v429_v20 = vld [vmem:[#allocation2 + $0x760] sm:$0xff]  ;;  %v422_v23 = vld [vmem:[#allocation2 + $0x728] sm:$0xff] }
 0x1e3   :  { %v430_v24 = vld [vmem:[#allocation2 + $0x768] sm:$0xff]  ;;  %v6078_v27 = vcombine.high %v421_v19, %v429_v20  ;;  %v6077_v33 = vcombine.low %v421_v19, %v429_v20 }
 0x1e4   :  { %v6080_v28 = vcombine.high %v422_v23, %v430_v24  ;;  %v6079_v34 = vcombine.low %v422_v23, %v430_v24 }
 0x1e5   :  { %3606 = vmatpush1.bf16.msra.mxu0 %v5949_v29  ;;  %3688 = vmatpush1.bf16.msra.mxu1 %v5951_v30  ;;  %v437_v29 = vld [vmem:[#allocation2 + $0x7a0] sm:$0xff] }
 0x1e6   :  { %3607 = vmatprep.subr.bf16.mxu0 %v5966_v31  ;;  %3689 = vmatprep.subr.bf16.mxu1 %v5968_v32  ;;  %v445_v30 = vld [vmem:[#allocation2 + $0x7e0] sm:$0xff]  ;;  %v438_v31 = vld [vmem:[#allocation2 + $0x7a8] sm:$0xff] }
 0x1e7   :  { %v446_v32 = vld [vmem:[#allocation2 + $0x7e8] sm:$0xff]  ;;  %v6094_v35 = vcombine.high %v437_v29, %v445_v30  ;;  %v6093_v41 = vcombine.low %v437_v29, %v445_v30 }
 0x1e8   :  { %v6096_v36 = vcombine.high %v438_v31, %v446_v32  ;;  %v6095_v42 = vcombine.low %v438_v31, %v446_v32 }
 0x1e9   :  { %3608 = vmatpush1.bf16.msra.mxu0 %v5965_v37  ;;  %3690 = vmatpush1.bf16.msra.mxu1 %v5967_v38  ;;  %v453_v37 = vld [vmem:[#allocation2 + $0x820] sm:$0xff] }
 0x1ea   :  { %3609 = vmatprep.subr.bf16.mxu0 %v5982_v39  ;;  %3691 = vmatprep.subr.bf16.mxu1 %v5984_v40  ;;  %v461_v38 = vld [vmem:[#allocation2 + $0x860] sm:$0xff]  ;;  %v454_v39 = vld [vmem:[#allocation2 + $0x828] sm:$0xff] }
 0x1eb   :  { %v462_v40 = vld [vmem:[#allocation2 + $0x868] sm:$0xff]  ;;  %v6110_v43 = vcombine.high %v453_v37, %v461_v38  ;;  %v6109_v49 = vcombine.low %v453_v37, %v461_v38 }
 0x1ec   :  { %v6112_v44 = vcombine.high %v454_v39, %v462_v40  ;;  %v6111_v50 = vcombine.low %v454_v39, %v462_v40  ;;  %v566_v38 = vld [vmem:[#allocation2 + $0xba8] sm:$0xff] }
 0x1ed   :  { %3610 = vmatpush1.bf16.msra.mxu0 %v5981_v45  ;;  %3692 = vmatpush1.bf16.msra.mxu1 %v5983_v46  ;;  %v469_v45 = vld [vmem:[#allocation2 + $0x8a0] sm:$0xff]  ;;  %v574_v39 = vld [vmem:[#allocation2 + $0xbe8] sm:$0xff] }
 0x1ee   :  { %3611 = vmatprep.subr.bf16.mxu0 %v5998_v47  ;;  %3693 = vmatprep.subr.bf16.mxu1 %v6000_v48  ;;  %v477_v46 = vld [vmem:[#allocation2 + $0x8e0] sm:$0xff]  ;;  %v470_v47 = vld [vmem:[#allocation2 + $0x8a8] sm:$0xff] }
 0x1ef   :  { %v478_v48 = vld [vmem:[#allocation2 + $0x8e8] sm:$0xff]  ;;  %v6126_v51 = vcombine.high %v469_v45, %v477_v46  ;;  %v6125_v58 = vcombine.low %v469_v45, %v477_v46 }
 0x1f0   :  { %v6128_v52 = vcombine.high %v470_v47, %v478_v48  ;;  %v6127_v59 = vcombine.low %v470_v47, %v478_v48 }
 0x1f1   :  { %3612 = vmatpush1.bf16.msra.mxu0 %v5997_v53  ;;  %3694 = vmatpush1.bf16.msra.mxu1 %v5999_v54  ;;  %v485_v53 = vld [vmem:[#allocation2 + $0x920] sm:$0xff] }
 0x1f2   :  { %3613 = vmatprep.subr.bf16.mxu0 %v6014_v55  ;;  %3695 = vmatprep.subr.bf16.mxu1 %v6016_v56  ;;  %v493_v54 = vld [vmem:[#allocation2 + $0x960] sm:$0xff]  ;;  %v486_v55 = vld [vmem:[#allocation2 + $0x928] sm:$0xff] }
 0x1f3   :  { %v494_v56 = vld [vmem:[#allocation2 + $0x968] sm:$0xff]  ;;  %v6142_v60 = vcombine.high %v485_v53, %v493_v54  ;;  %v6141_v2 = vcombine.low %v485_v53, %v493_v54 }
 0x1f4   :  { %v6144_v61 = vcombine.high %v486_v55, %v494_v56  ;;  %v6143_v3 = vcombine.low %v486_v55, %v494_v56  ;;  %v582_v53 = vld [vmem:[#allocation2 + $0xc28] sm:$0xff]  ;;  %v6223_v56 = vcombine.low %v566_v38, %v574_v39 }
 0x1f5   :  { %3614 = vmatpush1.bf16.msra.mxu0 %v6013_v62  ;;  %3696 = vmatpush1.bf16.msra.mxu1 %v6015_v63  ;;  %v501_v62 = vld [vmem:[#allocation2 + $0x9a0] sm:$0xff]  ;;  %v590_v54 = vld [vmem:[#allocation2 + $0xc68] sm:$0xff] }
 0x1f6   :  { %3615 = vmatprep.subr.bf16.mxu0 %v6030_v0  ;;  %3697 = vmatprep.subr.bf16.mxu1 %v6032_v1  ;;  %v509_v63 = vld [vmem:[#allocation2 + $0x9e0] sm:$0xff]  ;;  %v502_v0 = vld [vmem:[#allocation2 + $0x9a8] sm:$0xff] }
 0x1f7   :  { %v510_v1 = vld [vmem:[#allocation2 + $0x9e8] sm:$0xff]  ;;  %v6158_v4 = vcombine.high %v501_v62, %v509_v63  ;;  %v6157_v10 = vcombine.low %v501_v62, %v509_v63 }
 0x1f8   :  { %v6160_v5 = vcombine.high %v502_v0, %v510_v1  ;;  %v6159_v11 = vcombine.low %v502_v0, %v510_v1  ;;  %v598_v62 = vld [vmem:[#allocation2 + $0xca8] sm:$0xff]  ;;  %v6239_v1 = vcombine.low %v582_v53, %v590_v54 }
 0x1f9   :  { %3616 = vmatpush1.bf16.msra.mxu0 %v6029_v6  ;;  %3698 = vmatpush1.bf16.msra.mxu1 %v6031_v7  ;;  %v517_v6 = vld [vmem:[#allocation2 + $0xa20] sm:$0xff]  ;;  %v606_v63 = vld [vmem:[#allocation2 + $0xce8] sm:$0xff] }
 0x1fa   :  { %3617 = vmatprep.subr.bf16.mxu0 %v6046_v8  ;;  %3699 = vmatprep.subr.bf16.mxu1 %v6048_v9  ;;  %v525_v7 = vld [vmem:[#allocation2 + $0xa60] sm:$0xff]  ;;  %v518_v8 = vld [vmem:[#allocation2 + $0xa28] sm:$0xff] }
 0x1fb   :  { %v526_v9 = vld [vmem:[#allocation2 + $0xa68] sm:$0xff]  ;;  %v6174_v13 = vcombine.high %v517_v6, %v525_v7  ;;  %v6173_v19 = vcombine.low %v517_v6, %v525_v7 }
 0x1fc   :  { %v6176_v14 = vcombine.high %v518_v8, %v526_v9  ;;  %v6175_v20 = vcombine.low %v518_v8, %v526_v9  ;;  %v614_v6 = vld [vmem:[#allocation2 + $0xd28] sm:$0xff]  ;;  %v6255_v9 = vcombine.low %v598_v62, %v606_v63 }
 0x1fd   :  { %3618 = vmatpush1.bf16.msra.mxu0 %v6045_v15  ;;  %3700 = vmatpush1.bf16.msra.mxu1 %v6047_v16  ;;  %v533_v15 = vld [vmem:[#allocation2 + $0xaa0] sm:$0xff]  ;;  %v622_v7 = vld [vmem:[#allocation2 + $0xd68] sm:$0xff] }
 0x1fe   :  { %3619 = vmatprep.subr.bf16.mxu0 %v6062_v17  ;;  %3701 = vmatprep.subr.bf16.mxu1 %v6064_v18  ;;  %v541_v16 = vld [vmem:[#allocation2 + $0xae0] sm:$0xff]  ;;  %v534_v17 = vld [vmem:[#allocation2 + $0xaa8] sm:$0xff] }
 0x1ff   :  { %v542_v18 = vld [vmem:[#allocation2 + $0xae8] sm:$0xff]  ;;  %v6190_v23 = vcombine.high %v533_v15, %v541_v16  ;;  %v6189_v29 = vcombine.low %v533_v15, %v541_v16 }
 0x200   :  { %v6192_v24 = vcombine.high %v534_v17, %v542_v18  ;;  %v6191_v30 = vcombine.low %v534_v17, %v542_v18  ;;  %v630_v15 = vld [vmem:[#allocation2 + $0xda8] sm:$0xff]  ;;  %v6271_v18 = vcombine.low %v614_v6, %v622_v7 }
 0x201   :  { %3620 = vmatpush1.bf16.msra.mxu0 %v6061_v25  ;;  %3702 = vmatpush1.bf16.msra.mxu1 %v6063_v26  ;;  %v549_v25 = vld [vmem:[#allocation2 + $0xb20] sm:$0xff]  ;;  %v638_v16 = vld [vmem:[#allocation2 + $0xde8] sm:$0xff] }
 0x202   :  { %3621 = vmatprep.subr.bf16.mxu0 %v6078_v27  ;;  %3703 = vmatprep.subr.bf16.mxu1 %v6080_v28  ;;  %v557_v26 = vld [vmem:[#allocation2 + $0xb60] sm:$0xff]  ;;  %v550_v27 = vld [vmem:[#allocation2 + $0xb28] sm:$0xff] }
 0x203   :  { %v558_v28 = vld [vmem:[#allocation2 + $0xb68] sm:$0xff]  ;;  %v6206_v31 = vcombine.high %v549_v25, %v557_v26 }
 0x204   :  { %v6207_v47 = vcombine.low %v550_v27, %v558_v28 }
 0x205   :  { %3622 = vmatpush1.bf16.msra.mxu0 %v6077_v33  ;;  %3704 = vmatpush1.bf16.msra.mxu1 %v6079_v34  ;;  %v6208_v33 = vcombine.high %v550_v27, %v558_v28  ;;  %v565_v34 = vld [vmem:[#allocation2 + $0xba0] sm:$0xff]  ;;  %v6287_v28 = vcombine.low %v630_v15, %v638_v16 }
 0x206   :  { %3623 = vmatprep.subr.bf16.mxu0 %v6094_v35  ;;  %3705 = vmatprep.subr.bf16.mxu1 %v6096_v36  ;;  %v573_v35 = vld [vmem:[#allocation2 + $0xbe0] sm:$0xff] }
 0x207   :  { %v6222_v48 = vcombine.high %v565_v34, %v573_v35  ;;  %v6221_v55 = vcombine.low %v565_v34, %v573_v35  ;;  %v662_v34 = vld [vmem:[#allocation2 + $0xea8] sm:$0xff] }
 0x208   :  { %v670_v35 = vld [vmem:[#allocation2 + $0xee8] sm:$0xff] }
 0x209   :  { %3624 = vmatpush1.bf16.msra.mxu0 %v6093_v41  ;;  %3706 = vmatpush1.bf16.msra.mxu1 %v6095_v42 }
 0x20a   :  { %3634 = vmatprep.subr.bf16.mxu0 %v6110_v43  ;;  %3716 = vmatprep.subr.bf16.mxu1 %v6112_v44  ;;  %v6205_v43 = vcombine.low %v549_v25, %v557_v26  ;;  %v646_v25 = vld [vmem:[#allocation2 + $0xe28] sm:$0xff] }
 0x20b   :  { %v654_v26 = vld [vmem:[#allocation2 + $0xe68] sm:$0xff] }
 0x20c   :  { %3626 = vmatmul.mubr.bf16.vlgmr.msra.gmra.mrb[8].mxu0 %v7309_v12  ;;  %3708 = vmatmul.mubr.bf16.vlgmr.msra.gmra.mrb[8].mxu1 %v7309_v12 }
 0x20d   :  { %3635 = vmatpush1.bf16.msra.mxu0 %v6109_v49  ;;  %3717 = vmatpush1.bf16.msra.mxu1 %v6111_v50  ;;  %v6224_v50 = vcombine.high %v566_v38, %v574_v39  ;;  %v6303_v39 = vcombine.low %v646_v25, %v654_v26 }
 0x20e   :  { %3636 = vmatprep.subr.bf16.mxu0 %v6126_v51  ;;  %3718 = vmatprep.subr.bf16.mxu1 %v6128_v52  ;;  %v581_v51 = vld [vmem:[#allocation2 + $0xc20] sm:$0xff] }
 0x20f   :  { %3666 = vmatprep.mubr.bf16.mxu0 %v7314_v22  ;;  %3748 = vmatprep.mubr.bf16.mxu1 %v7314_v22  ;;  %v589_v52 = vld [vmem:[#allocation2 + $0xc60] sm:$0xff] }
 0x210   :  { %v6237_v0 = vcombine.low %v581_v51, %v589_v52 }
 0x211   :  { %3637 = vmatpush1.bf16.msra.mxu0 %v6125_v58  ;;  %3719 = vmatpush1.bf16.msra.mxu1 %v6127_v59  ;;  %v6238_v58 = vcombine.high %v581_v51, %v589_v52  ;;  %v6240_v59 = vcombine.high %v582_v53, %v590_v54  ;;  %v693_v53 = vld [vmem:[#allocation2 + $0xfa0] sm:$0xff] }
 0x212   :  { %3638 = vmatprep.subr.bf16.mxu0 %v6142_v60  ;;  %3720 = vmatprep.subr.bf16.mxu1 %v6144_v61  ;;  %v597_v60 = vld [vmem:[#allocation2 + $0xca0] sm:$0xff] }
 0x213   :  { %v605_v61 = vld [vmem:[#allocation2 + $0xce0] sm:$0xff] }
 0x214   :  { %v6253_v8 = vcombine.low %v597_v60, %v605_v61  ;;  %v701_v54 = vld [vmem:[#allocation2 + $0xfe0] sm:$0xff] }
 0x215   :  { %3639 = vmatpush1.bf16.msra.mxu0 %v6141_v2  ;;  %3721 = vmatpush1.bf16.msra.mxu1 %v6143_v3  ;;  %v6254_v2 = vcombine.high %v597_v60, %v605_v61  ;;  %v6256_v3 = vcombine.high %v598_v62, %v606_v63  ;;  %v6350_v60 = vcombine.high %v693_v53, %v701_v54  ;;  %v199_v62 = vld [vmem:[#allocation2 + $0x30] sm:$0xff] }
 0x216   :  { %3640 = vmatprep.subr.bf16.mxu0 %v6158_v4  ;;  %3722 = vmatprep.subr.bf16.mxu1 %v6160_v5  ;;  %v613_v4 = vld [vmem:[#allocation2 + $0xd20] sm:$0xff]  ;;  %v207_v63 = vld [vmem:[#allocation2 + $0x70] sm:$0xff] }
 0x217   :  { %v621_v5 = vld [vmem:[#allocation2 + $0xd60] sm:$0xff] }
 0x218   :  { %v6269_v17 = vcombine.low %v613_v4, %v621_v5 }
 0x219   :  { %3641 = vmatpush1.bf16.msra.mxu0 %v6157_v10  ;;  %3723 = vmatpush1.bf16.msra.mxu1 %v6159_v11  ;;  %v6270_v10 = vcombine.high %v613_v4, %v621_v5  ;;  %v6272_v11 = vcombine.high %v614_v6, %v622_v7  ;;  %v5858_v4 = vcombine.high %v199_v62, %v207_v63  ;;  %v215_v6 = vld [vmem:[#allocation2 + $0xb0] sm:$0xff] }
 0x21a   :  { %3642 = vmatprep.subr.bf16.mxu0 %v6174_v13  ;;  %3724 = vmatprep.subr.bf16.mxu1 %v6176_v14  ;;  %v629_v13 = vld [vmem:[#allocation2 + $0xda0] sm:$0xff]  ;;  %v223_v7 = vld [vmem:[#allocation2 + $0xf0] sm:$0xff] }
 0x21b   :  { %v637_v14 = vld [vmem:[#allocation2 + $0xde0] sm:$0xff] }
 0x21c   :  { %v6285_v27 = vcombine.low %v629_v13, %v637_v14 }
 0x21d   :  { %3643 = vmatpush1.bf16.msra.mxu0 %v6173_v19  ;;  %3725 = vmatpush1.bf16.msra.mxu1 %v6175_v20  ;;  %v6286_v19 = vcombine.high %v629_v13, %v637_v14  ;;  %v6288_v20 = vcombine.high %v630_v15, %v638_v16  ;;  %v5874_v13 = vcombine.high %v215_v6, %v223_v7  ;;  %v231_v15 = vld [vmem:[#allocation2 + $0x130] sm:$0xff] }
 0x21e   :  { %3644 = vmatprep.subr.bf16.mxu0 %v6190_v23  ;;  %3726 = vmatprep.subr.bf16.mxu1 %v6192_v24  ;;  %v645_v23 = vld [vmem:[#allocation2 + $0xe20] sm:$0xff]  ;;  %v239_v16 = vld [vmem:[#allocation2 + $0x170] sm:$0xff] }
 0x21f   :  { %v7341_v32 = vpop.f32.mrb[0].mxu0  ;;  %v7343_v36 = vpop.f32.mrb[0].mxu1  ;;  %v653_v24 = vld [vmem:[#allocation2 + $0xe60] sm:$0xff] }
 0x220   :  { %v7345_v37 = vpop.f32.mrb[1].mxu0  ;;  %v3921_v40 = vmax.f32 %v7341_v32, %v7343_v36  ;;  %v7349_v41 = vpop.f32.mrb[1].mxu1  ;;  %v6301_v38 = vcombine.low %v645_v23, %v653_v24 }
 0x221   :  { %v3344_v42 = vpop.f32.mrb[2].mxu0  ;;  %3645 = vmatpush1.bf16.msra.mxu0 %v6189_v29  ;;  %v3922_v44 = vmax.f32 %v7345_v37, %v7349_v41  ;;  %v3426_v45 = vpop.f32.mrb[2].mxu1  ;;  %3727 = vmatpush1.bf16.msra.mxu1 %v6191_v30  ;;  %v6302_v29 = vcombine.high %v645_v23, %v653_v24  ;;  %v6304_v30 = vcombine.high %v646_v25, %v654_v26  ;;  %v247_v25 = vld [vmem:[#allocation2 + $0x1b0] sm:$0xff] }
 0x222   :  { %v3345_v46 = vpop.f32.mrb[3].mxu0  ;;  %3646 = vmatprep.subr.bf16.mxu0 %v6206_v31  ;;  %v3427_v49 = vpop.f32.mrb[3].mxu1  ;;  %3728 = vmatprep.subr.bf16.mxu1 %v6208_v33  ;;  %v661_v31 = vld [vmem:[#allocation2 + $0xea0] sm:$0xff]  ;;  %v5890_v23 = vcombine.high %v231_v15, %v239_v16  ;;  %v255_v26 = vld [vmem:[#allocation2 + $0x1f0] sm:$0xff] }
 0x223   :  { %v669_v33 = vld [vmem:[#allocation2 + $0xee0] sm:$0xff] }
 0x224   :  { %v6318_v42 = vcombine.high %v661_v31, %v669_v33  ;;  %v677_v45 = vld [vmem:[#allocation2 + $0xf20] sm:$0xff]  ;;  %v6317_v49 = vcombine.low %v661_v31, %v669_v33  ;;  %v5906_v31 = vcombine.high %v247_v25, %v255_v26 }
 0x225   :  { %3647 = vmatpush1.bf16.msra.mxu0 %v6205_v43  ;;  %3729 = vmatpush1.bf16.msra.mxu1 %v6207_v47  ;;  %v6320_v43 = vcombine.high %v662_v34, %v670_v35  ;;  %v685_v46 = vld [vmem:[#allocation2 + $0xf60] sm:$0xff]  ;;  %v678_v47 = vld [vmem:[#allocation2 + $0xf28] sm:$0xff] }
 0x226   :  { %3648 = vmatprep.subr.bf16.mxu0 %v6222_v48  ;;  %3730 = vmatprep.subr.bf16.mxu1 %v6224_v50  ;;  %v686_v48 = vld [vmem:[#allocation2 + $0xf68] sm:$0xff]  ;;  %v6319_v50 = vcombine.low %v662_v34, %v670_v35  ;;  %v6334_v51 = vcombine.high %v677_v45, %v685_v46  ;;  %v263_v34 = vld [vmem:[#allocation2 + $0x230] sm:$0xff] }
 0x227   :  { %v6336_v52 = vcombine.high %v678_v47, %v686_v48  ;;  %v271_v35 = vld [vmem:[#allocation2 + $0x270] sm:$0xff] }
 0x229   :  { %3649 = vmatpush1.bf16.msra.mxu0 %v6221_v55  ;;  %3731 = vmatpush1.bf16.msra.mxu1 %v6223_v56  ;;  %v694_v55 = vld [vmem:[#allocation2 + $0xfa8] sm:$0xff] }
 0x22a   :  { %3650 = vmatprep.subr.bf16.mxu0 %v6238_v58  ;;  %3732 = vmatprep.subr.bf16.mxu1 %v6240_v59  ;;  %v702_v56 = vld [vmem:[#allocation2 + $0xfe8] sm:$0xff]  ;;  %v6333_v58 = vcombine.low %v677_v45, %v685_v46  ;;  %v6335_v59 = vcombine.low %v678_v47, %v686_v48  ;;  %v5922_v45 = vcombine.high %v263_v34, %v271_v35  ;;  %v279_v46 = vld [vmem:[#allocation2 + $0x2b0] sm:$0xff]  ;;  %v280_v48 = vld [vmem:[#allocation2 + $0x2b8] sm:$0xff] }
 0x22b   :  { %v6352_v61 = vcombine.high %v694_v55, %v702_v56  ;;  %v287_v47 = vld [vmem:[#allocation2 + $0x2f0] sm:$0xff] }
 0x22d   :  { %3651 = vmatpush1.bf16.msra.mxu0 %v6237_v0  ;;  %3733 = vmatpush1.bf16.msra.mxu1 %v6239_v1  ;;  %v200_v0 = vld [vmem:[#allocation2 + $0x38] sm:$0xff] }
 0x22e   :  { %3652 = vmatprep.subr.bf16.mxu0 %v6254_v2  ;;  %3734 = vmatprep.subr.bf16.mxu1 %v6256_v3  ;;  %v208_v1 = vld [vmem:[#allocation2 + $0x78] sm:$0xff]  ;;  %v6349_v2 = vcombine.low %v693_v53, %v701_v54  ;;  %v6351_v3 = vcombine.low %v694_v55, %v702_v56  ;;  %v295_v54 = vld [vmem:[#allocation2 + $0x330] sm:$0xff] }
 0x22f   :  { %v5860_v5 = vcombine.high %v200_v0, %v208_v1  ;;  %v303_v55 = vld [vmem:[#allocation2 + $0x370] sm:$0xff]  ;;  %v296_v56 = vld [vmem:[#allocation2 + $0x338] sm:$0xff] }
 0x231   :  { %3653 = vmatpush1.bf16.msra.mxu0 %v6253_v8  ;;  %3735 = vmatpush1.bf16.msra.mxu1 %v6255_v9  ;;  %v216_v8 = vld [vmem:[#allocation2 + $0xb8] sm:$0xff] }
 0x232   :  { %3654 = vmatprep.subr.bf16.mxu0 %v6270_v10  ;;  %3736 = vmatprep.subr.bf16.mxu1 %v6272_v11  ;;  %v224_v9 = vld [vmem:[#allocation2 + $0xf8] sm:$0xff]  ;;  %v5857_v10 = vcombine.low %v199_v62, %v207_v63  ;;  %v5859_v11 = vcombine.low %v200_v0, %v208_v1  ;;  %v311_v63 = vld [vmem:[#allocation2 + $0x3b0] sm:$0xff] }
 0x233   :  { %v5876_v14 = vcombine.high %v216_v8, %v224_v9  ;;  %v319_v0 = vld [vmem:[#allocation2 + $0x3f0] sm:$0xff]  ;;  %v312_v1 = vld [vmem:[#allocation2 + $0x3b8] sm:$0xff] }
 0x235   :  { %3655 = vmatpush1.bf16.msra.mxu0 %v6269_v17  ;;  %3737 = vmatpush1.bf16.msra.mxu1 %v6271_v18  ;;  %v232_v17 = vld [vmem:[#allocation2 + $0x138] sm:$0xff] }
 0x236   :  { %3656 = vmatprep.subr.bf16.mxu0 %v6286_v19  ;;  %3738 = vmatprep.subr.bf16.mxu1 %v6288_v20  ;;  %v240_v18 = vld [vmem:[#allocation2 + $0x178] sm:$0xff]  ;;  %v5873_v19 = vcombine.low %v215_v6, %v223_v7  ;;  %v5875_v20 = vcombine.low %v216_v8, %v224_v9  ;;  %v327_v7 = vld [vmem:[#allocation2 + $0x430] sm:$0xff] }
 0x237   :  { %v5892_v24 = vcombine.high %v232_v17, %v240_v18  ;;  %v335_v8 = vld [vmem:[#allocation2 + $0x470] sm:$0xff]  ;;  %v328_v9 = vld [vmem:[#allocation2 + $0x438] sm:$0xff] }
 0x239   :  { %3657 = vmatpush1.bf16.msra.mxu0 %v6285_v27  ;;  %3739 = vmatpush1.bf16.msra.mxu1 %v6287_v28  ;;  %v248_v27 = vld [vmem:[#allocation2 + $0x1b8] sm:$0xff] }
 0x23a   :  { %3658 = vmatprep.subr.bf16.mxu0 %v6302_v29  ;;  %3740 = vmatprep.subr.bf16.mxu1 %v6304_v30  ;;  %v256_v28 = vld [vmem:[#allocation2 + $0x1f8] sm:$0xff]  ;;  %v5889_v29 = vcombine.low %v231_v15, %v239_v16  ;;  %v5891_v30 = vcombine.low %v232_v17, %v240_v18  ;;  %v343_v16 = vld [vmem:[#allocation2 + $0x4b0] sm:$0xff] }
 0x23b   :  { %v5908_v33 = vcombine.high %v248_v27, %v256_v28  ;;  %v351_v17 = vld [vmem:[#allocation2 + $0x4f0] sm:$0xff]  ;;  %v344_v18 = vld [vmem:[#allocation2 + $0x4b8] sm:$0xff] }
 0x23d   :  { %3659 = vmatpush1.bf16.msra.mxu0 %v6301_v38  ;;  %3741 = vmatpush1.bf16.msra.mxu1 %v6303_v39  ;;  %v264_v38 = vld [vmem:[#allocation2 + $0x238] sm:$0xff] }
 0x23e   :  { %3660 = vmatprep.subr.bf16.mxu0 %v6318_v42  ;;  %3742 = vmatprep.subr.bf16.mxu1 %v6320_v43  ;;  %v272_v39 = vld [vmem:[#allocation2 + $0x278] sm:$0xff]  ;;  %v5905_v42 = vcombine.low %v247_v25, %v255_v26  ;;  %v5907_v43 = vcombine.low %v248_v27, %v256_v28  ;;  %v359_v26 = vld [vmem:[#allocation2 + $0x530] sm:$0xff] }
 0x23f   :  { %v367_v27 = vld [vmem:[#allocation2 + $0x570] sm:$0xff]  ;;  %v360_v28 = vld [vmem:[#allocation2 + $0x538] sm:$0xff] }
 0x241   :  { %3661 = vmatpush1.bf16.msra.mxu0 %v6317_v49  ;;  %3743 = vmatpush1.bf16.msra.mxu1 %v6319_v50  ;;  %v288_v49 = vld [vmem:[#allocation2 + $0x2f8] sm:$0xff]  ;;  %v5921_v50 = vcombine.low %v263_v34, %v271_v35  ;;  %v375_v35 = vld [vmem:[#allocation2 + $0x5b0] sm:$0xff] }
 0x242   :  { %3662 = vmatprep.subr.bf16.mxu0 %v6334_v51  ;;  %3744 = vmatprep.subr.bf16.mxu1 %v6336_v52  ;;  %v5923_v51 = vcombine.low %v264_v38, %v272_v39  ;;  %v5938_v52 = vcombine.high %v279_v46, %v287_v47  ;;  %v5940_v53 = vcombine.high %v280_v48, %v288_v49 }
 0x245   :  { %3663 = vmatpush1.bf16.msra.mxu0 %v6333_v58  ;;  %3745 = vmatpush1.bf16.msra.mxu1 %v6335_v59  ;;  %v304_v58 = vld [vmem:[#allocation2 + $0x378] sm:$0xff]  ;;  %v5937_v59 = vcombine.low %v279_v46, %v287_v47  ;;  %v391_v47 = vld [vmem:[#allocation2 + $0x630] sm:$0xff] }
 0x246   :  { %3664 = vmatprep.subr.bf16.mxu0 %v6350_v60  ;;  %3746 = vmatprep.subr.bf16.mxu1 %v6352_v61  ;;  %v5939_v60 = vcombine.low %v280_v48, %v288_v49  ;;  %v5954_v61 = vcombine.high %v295_v54, %v303_v55  ;;  %v5956_v62 = vcombine.high %v296_v56, %v304_v58  ;;  %v399_v48 = vld [vmem:[#allocation2 + $0x670] sm:$0xff]  ;;  %v392_v49 = vld [vmem:[#allocation2 + $0x638] sm:$0xff] }
 0x249   :  { %3665 = vmatpush1.bf16.msra.mxu0 %v6349_v2  ;;  %3747 = vmatpush1.bf16.msra.mxu1 %v6351_v3  ;;  %v320_v2 = vld [vmem:[#allocation2 + $0x3f8] sm:$0xff]  ;;  %v5953_v3 = vcombine.low %v295_v54, %v303_v55  ;;  %v407_v55 = vld [vmem:[#allocation2 + $0x6b0] sm:$0xff] }
 0x24a   :  { %3757 = vmatprep.subr.bf16.mxu0 %v5858_v4  ;;  %3839 = vmatprep.subr.bf16.mxu1 %v5860_v5  ;;  %v5955_v4 = vcombine.low %v296_v56, %v304_v58  ;;  %v5970_v5 = vcombine.high %v311_v63, %v319_v0  ;;  %v5972_v6 = vcombine.high %v312_v1, %v320_v2  ;;  %v415_v56 = vld [vmem:[#allocation2 + $0x6f0] sm:$0xff]  ;;  %v408_v58 = vld [vmem:[#allocation2 + $0x6b8] sm:$0xff] }
 0x24c   :  { %3667 = vmatmul.mubr.bf16.vlgmr.msra.gmra.mrb[8].mxu0 %v7323_v21  ;;  %3749 = vmatmul.mubr.bf16.vlgmr.msra.gmra.mrb[8].mxu1 %v7323_v21 }
 0x24d   :  { %3758 = vmatpush1.bf16.msra.mxu0 %v5857_v10  ;;  %3840 = vmatpush1.bf16.msra.mxu1 %v5859_v11  ;;  %v336_v10 = vld [vmem:[#allocation2 + $0x478] sm:$0xff]  ;;  %v5969_v11 = vcombine.low %v311_v63, %v319_v0  ;;  %v423_v0 = vld [vmem:[#allocation2 + $0x730] sm:$0xff] }
 0x24e   :  { %3759 = vmatprep.subr.bf16.mxu0 %v5874_v13  ;;  %3841 = vmatprep.subr.bf16.mxu1 %v5876_v14  ;;  %v5971_v13 = vcombine.low %v312_v1, %v320_v2  ;;  %v5986_v14 = vcombine.high %v327_v7, %v335_v8  ;;  %v5988_v15 = vcombine.high %v328_v9, %v336_v10  ;;  %v431_v1 = vld [vmem:[#allocation2 + $0x770] sm:$0xff]  ;;  %v424_v2 = vld [vmem:[#allocation2 + $0x738] sm:$0xff] }
 0x24f   :  { %3789 = vmatprep.mubr.bf16.mxu0 %v7302_v57  ;;  %3871 = vmatprep.mubr.bf16.mxu1 %v7302_v57  ;;  %v5924_v57 = vcombine.high %v264_v38, %v272_v39  ;;  %v383_v38 = vld [vmem:[#allocation2 + $0x5f0] sm:$0xff]  ;;  %v376_v39 = vld [vmem:[#allocation2 + $0x5b8] sm:$0xff] }
 0x251   :  { %3760 = vmatpush1.bf16.msra.mxu0 %v5873_v19  ;;  %3842 = vmatpush1.bf16.msra.mxu1 %v5875_v20  ;;  %v352_v19 = vld [vmem:[#allocation2 + $0x4f8] sm:$0xff]  ;;  %v5985_v20 = vcombine.low %v327_v7, %v335_v8  ;;  %v439_v8 = vld [vmem:[#allocation2 + $0x7b0] sm:$0xff] }
 0x252   :  { %3761 = vmatprep.subr.bf16.mxu0 %v5890_v23  ;;  %3843 = vmatprep.subr.bf16.mxu1 %v5892_v24  ;;  %v5987_v23 = vcombine.low %v328_v9, %v336_v10  ;;  %v6002_v24 = vcombine.high %v343_v16, %v351_v17  ;;  %v6004_v25 = vcombine.high %v344_v18, %v352_v19  ;;  %v447_v9 = vld [vmem:[#allocation2 + $0x7f0] sm:$0xff]  ;;  %v440_v10 = vld [vmem:[#allocation2 + $0x7b8] sm:$0xff] }
 0x255   :  { %3762 = vmatpush1.bf16.msra.mxu0 %v5889_v29  ;;  %3844 = vmatpush1.bf16.msra.mxu1 %v5891_v30  ;;  %v368_v29 = vld [vmem:[#allocation2 + $0x578] sm:$0xff]  ;;  %v6001_v30 = vcombine.low %v343_v16, %v351_v17  ;;  %v455_v17 = vld [vmem:[#allocation2 + $0x830] sm:$0xff] }
 0x256   :  { %3763 = vmatprep.subr.bf16.mxu0 %v5906_v31  ;;  %3845 = vmatprep.subr.bf16.mxu1 %v5908_v33  ;;  %v6003_v31 = vcombine.low %v344_v18, %v352_v19  ;;  %v6018_v33 = vcombine.high %v359_v26, %v367_v27  ;;  %v6020_v34 = vcombine.high %v360_v28, %v368_v29  ;;  %v463_v18 = vld [vmem:[#allocation2 + $0x870] sm:$0xff]  ;;  %v456_v19 = vld [vmem:[#allocation2 + $0x838] sm:$0xff] }
 0x259   :  { %3764 = vmatpush1.bf16.msra.mxu0 %v5905_v42  ;;  %3846 = vmatpush1.bf16.msra.mxu1 %v5907_v43  ;;  %v384_v42 = vld [vmem:[#allocation2 + $0x5f8] sm:$0xff]  ;;  %v6017_v43 = vcombine.low %v359_v26, %v367_v27  ;;  %v471_v27 = vld [vmem:[#allocation2 + $0x8b0] sm:$0xff] }
 0x25a   :  { %3765 = vmatprep.subr.bf16.mxu0 %v5922_v45  ;;  %3847 = vmatprep.subr.bf16.mxu1 %v5924_v57  ;;  %v6019_v45 = vcombine.low %v360_v28, %v368_v29  ;;  %v6034_v57 = vcombine.high %v375_v35, %v383_v38  ;;  %v6036_v46 = vcombine.high %v376_v39, %v384_v42  ;;  %v479_v28 = vld [vmem:[#allocation2 + $0x8f0] sm:$0xff]  ;;  %v472_v29 = vld [vmem:[#allocation2 + $0x8b8] sm:$0xff] }
 0x25d   :  { %3766 = vmatpush1.bf16.msra.mxu0 %v5921_v50  ;;  %3848 = vmatpush1.bf16.msra.mxu1 %v5923_v51  ;;  %v400_v50 = vld [vmem:[#allocation2 + $0x678] sm:$0xff]  ;;  %v6033_v51 = vcombine.low %v375_v35, %v383_v38  ;;  %v487_v38 = vld [vmem:[#allocation2 + $0x930] sm:$0xff] }
 0x25e   :  { %3767 = vmatprep.subr.bf16.mxu0 %v5938_v52  ;;  %3849 = vmatprep.subr.bf16.mxu1 %v5940_v53  ;;  %v6035_v52 = vcombine.low %v376_v39, %v384_v42  ;;  %v6050_v53 = vcombine.high %v391_v47, %v399_v48  ;;  %v6052_v54 = vcombine.high %v392_v49, %v400_v50  ;;  %v495_v39 = vld [vmem:[#allocation2 + $0x970] sm:$0xff]  ;;  %v488_v42 = vld [vmem:[#allocation2 + $0x938] sm:$0xff] }
 0x261   :  { %3768 = vmatpush1.bf16.msra.mxu0 %v5937_v59  ;;  %3850 = vmatpush1.bf16.msra.mxu1 %v5939_v60  ;;  %v416_v59 = vld [vmem:[#allocation2 + $0x6f8] sm:$0xff]  ;;  %v6049_v60 = vcombine.low %v391_v47, %v399_v48  ;;  %v503_v48 = vld [vmem:[#allocation2 + $0x9b0] sm:$0xff] }
 0x262   :  { %3769 = vmatprep.subr.bf16.mxu0 %v5954_v61  ;;  %3851 = vmatprep.subr.bf16.mxu1 %v5956_v62  ;;  %v6051_v61 = vcombine.low %v392_v49, %v400_v50  ;;  %v6066_v62 = vcombine.high %v407_v55, %v415_v56  ;;  %v6068_v63 = vcombine.high %v408_v58, %v416_v59  ;;  %v511_v49 = vld [vmem:[#allocation2 + $0x9f0] sm:$0xff]  ;;  %v504_v50 = vld [vmem:[#allocation2 + $0x9b8] sm:$0xff] }
 0x265   :  { %3770 = vmatpush1.bf16.msra.mxu0 %v5953_v3  ;;  %3852 = vmatpush1.bf16.msra.mxu1 %v5955_v4  ;;  %v432_v3 = vld [vmem:[#allocation2 + $0x778] sm:$0xff]  ;;  %v6065_v4 = vcombine.low %v407_v55, %v415_v56  ;;  %v519_v55 = vld [vmem:[#allocation2 + $0xa30] sm:$0xff] }
 0x266   :  { %3771 = vmatprep.subr.bf16.mxu0 %v5970_v5  ;;  %3853 = vmatprep.subr.bf16.mxu1 %v5972_v6  ;;  %v6067_v5 = vcombine.low %v408_v58, %v416_v59  ;;  %v6082_v6 = vcombine.high %v423_v0, %v431_v1  ;;  %v6084_v7 = vcombine.high %v424_v2, %v432_v3  ;;  %v527_v56 = vld [vmem:[#allocation2 + $0xa70] sm:$0xff]  ;;  %v520_v58 = vld [vmem:[#allocation2 + $0xa38] sm:$0xff] }
 0x267   :  { %v528_v59 = vld [vmem:[#allocation2 + $0xa78] sm:$0xff] }
 0x269   :  { %3772 = vmatpush1.bf16.msra.mxu0 %v5969_v11  ;;  %3854 = vmatpush1.bf16.msra.mxu1 %v5971_v13  ;;  %v448_v11 = vld [vmem:[#allocation2 + $0x7f8] sm:$0xff]  ;;  %v6081_v13 = vcombine.low %v423_v0, %v431_v1  ;;  %v543_v0 = vld [vmem:[#allocation2 + $0xaf0] sm:$0xff] }
 0x26a   :  { %3773 = vmatprep.subr.bf16.mxu0 %v5986_v14  ;;  %3855 = vmatprep.subr.bf16.mxu1 %v5988_v15  ;;  %v6083_v14 = vcombine.low %v424_v2, %v432_v3  ;;  %v6098_v15 = vcombine.high %v439_v8, %v447_v9  ;;  %v6100_v16 = vcombine.high %v440_v10, %v448_v11  ;;  %v536_v1 = vld [vmem:[#allocation2 + $0xab8] sm:$0xff] }
 0x26b   :  { %v544_v2 = vld [vmem:[#allocation2 + $0xaf8] sm:$0xff]  ;;  %v6177_v3 = vcombine.low %v519_v55, %v527_v56 }
 0x26d   :  { %3774 = vmatpush1.bf16.msra.mxu0 %v5985_v20  ;;  %3856 = vmatpush1.bf16.msra.mxu1 %v5987_v23  ;;  %v464_v20 = vld [vmem:[#allocation2 + $0x878] sm:$0xff]  ;;  %v6097_v23 = vcombine.low %v439_v8, %v447_v9  ;;  %v559_v8 = vld [vmem:[#allocation2 + $0xb70] sm:$0xff] }
 0x26e   :  { %3775 = vmatprep.subr.bf16.mxu0 %v6002_v24  ;;  %3857 = vmatprep.subr.bf16.mxu1 %v6004_v25  ;;  %v6099_v24 = vcombine.low %v440_v10, %v448_v11  ;;  %v6114_v25 = vcombine.high %v455_v17, %v463_v18  ;;  %v6116_v26 = vcombine.high %v456_v19, %v464_v20  ;;  %v552_v9 = vld [vmem:[#allocation2 + $0xb38] sm:$0xff] }
 0x26f   :  { %v560_v10 = vld [vmem:[#allocation2 + $0xb78] sm:$0xff] }
 0x271   :  { %3776 = vmatpush1.bf16.msra.mxu0 %v6001_v30  ;;  %3858 = vmatpush1.bf16.msra.mxu1 %v6003_v31  ;;  %v480_v30 = vld [vmem:[#allocation2 + $0x8f8] sm:$0xff]  ;;  %v6113_v31 = vcombine.low %v455_v17, %v463_v18  ;;  %v567_v17 = vld [vmem:[#allocation2 + $0xbb0] sm:$0xff] }
 0x272   :  { %3777 = vmatprep.subr.bf16.mxu0 %v6018_v33  ;;  %3859 = vmatprep.subr.bf16.mxu1 %v6020_v34  ;;  %v6115_v33 = vcombine.low %v456_v19, %v464_v20  ;;  %v6130_v34 = vcombine.high %v471_v27, %v479_v28  ;;  %v6132_v35 = vcombine.high %v472_v29, %v480_v30  ;;  %v575_v18 = vld [vmem:[#allocation2 + $0xbf0] sm:$0xff] }
 0x275   :  { %3778 = vmatpush1.bf16.msra.mxu0 %v6017_v43  ;;  %3860 = vmatpush1.bf16.msra.mxu1 %v6019_v45  ;;  %v496_v43 = vld [vmem:[#allocation2 + $0x978] sm:$0xff]  ;;  %v6129_v45 = vcombine.low %v471_v27, %v479_v28 }
 0x276   :  { %3779 = vmatprep.subr.bf16.mxu0 %v6034_v57  ;;  %3861 = vmatprep.subr.bf16.mxu1 %v6036_v46  ;;  %v6131_v57 = vcombine.low %v472_v29, %v480_v30  ;;  %v6146_v46 = vcombine.high %v487_v38, %v495_v39  ;;  %v6148_v47 = vcombine.high %v488_v42, %v496_v43 }
 0x277   :  { %v6211_v30 = vcombine.low %v552_v9, %v560_v10 }
 0x279   :  { %3780 = vmatpush1.bf16.msra.mxu0 %v6033_v51  ;;  %3862 = vmatpush1.bf16.msra.mxu1 %v6035_v52  ;;  %v512_v51 = vld [vmem:[#allocation2 + $0x9f8] sm:$0xff]  ;;  %v6145_v52 = vcombine.low %v487_v38, %v495_v39  ;;  %v6225_v39 = vcombine.low %v567_v17, %v575_v18 }
 0x27a   :  { %3781 = vmatprep.subr.bf16.mxu0 %v6050_v53  ;;  %3863 = vmatprep.subr.bf16.mxu1 %v6052_v54  ;;  %v6162_v53 = vcombine.high %v503_v48, %v511_v49  ;;  %v6164_v54 = vcombine.high %v504_v50, %v512_v51  ;;  %v592_v38 = vld [vmem:[#allocation2 + $0xc78] sm:$0xff] }
 0x27d   :  { %3782 = vmatpush1.bf16.msra.mxu0 %v6049_v60  ;;  %3864 = vmatpush1.bf16.msra.mxu1 %v6051_v61  ;;  %v6161_v60 = vcombine.low %v503_v48, %v511_v49  ;;  %v6163_v61 = vcombine.low %v504_v50, %v512_v51  ;;  %v608_v48 = vld [vmem:[#allocation2 + $0xcf8] sm:$0xff] }
 0x27e   :  { %3783 = vmatprep.subr.bf16.mxu0 %v6066_v62  ;;  %3865 = vmatprep.subr.bf16.mxu1 %v6068_v63  ;;  %v6178_v62 = vcombine.high %v519_v55, %v527_v56  ;;  %v535_v63 = vld [vmem:[#allocation2 + $0xab0] sm:$0xff]  ;;  %v624_v55 = vld [vmem:[#allocation2 + $0xd78] sm:$0xff] }
 0x27f   :  { %v6193_v11 = vcombine.low %v535_v63, %v543_v0 }
 0x281   :  { %3784 = vmatpush1.bf16.msra.mxu0 %v6065_v4  ;;  %3866 = vmatpush1.bf16.msra.mxu1 %v6067_v5  ;;  %v6179_v4 = vcombine.low %v520_v58, %v528_v59  ;;  %v6194_v5 = vcombine.high %v535_v63, %v543_v0  ;;  %v640_v63 = vld [vmem:[#allocation2 + $0xdf8] sm:$0xff] }
 0x282   :  { %3785 = vmatprep.subr.bf16.mxu0 %v6082_v6  ;;  %3867 = vmatprep.subr.bf16.mxu1 %v6084_v7  ;;  %v6196_v6 = vcombine.high %v536_v1, %v544_v2  ;;  %v551_v7 = vld [vmem:[#allocation2 + $0xb30] sm:$0xff] }
 0x283   :  { %v6209_v29 = vcombine.low %v551_v7, %v559_v8 }
 0x285   :  { %3786 = vmatpush1.bf16.msra.mxu0 %v6081_v13  ;;  %3868 = vmatpush1.bf16.msra.mxu1 %v6083_v14  ;;  %v6195_v13 = vcombine.low %v536_v1, %v544_v2  ;;  %v6210_v14 = vcombine.high %v551_v7, %v559_v8  ;;  %v656_v7 = vld [vmem:[#allocation2 + $0xe78] sm:$0xff] }
 0x286   :  { %3787 = vmatprep.subr.bf16.mxu0 %v6098_v15  ;;  %3869 = vmatprep.subr.bf16.mxu1 %v6100_v16  ;;  %v6212_v16 = vcombine.high %v552_v9, %v560_v10 }
 0x289   :  { %3788 = vmatpush1.bf16.msra.mxu0 %v6097_v23  ;;  %3870 = vmatpush1.bf16.msra.mxu1 %v6099_v24  ;;  %v568_v24 = vld [vmem:[#allocation2 + $0xbb8] sm:$0xff] }
 0x28a   :  { %3798 = vmatprep.subr.bf16.mxu0 %v6114_v25  ;;  %3880 = vmatprep.subr.bf16.mxu1 %v6116_v26  ;;  %v576_v25 = vld [vmem:[#allocation2 + $0xbf8] sm:$0xff] }
 0x28b   :  { %v6228_v41 = vcombine.high %v568_v24, %v576_v25 }
 0x28c   :  { %3790 = vmatmul.mubr.bf16.vlgmr.msra.gmra.mrb[12].mxu0 %v7309_v12  ;;  %3872 = vmatmul.mubr.bf16.vlgmr.msra.gmra.mrb[12].mxu1 %v7309_v12  ;;  %v6147_v12 = vcombine.low %v488_v42, %v496_v43  ;;  %v6227_v42 = vcombine.low %v568_v24, %v576_v25  ;;  %v679_v25 = vld [vmem:[#allocation2 + $0xf30] sm:$0xff] }
 0x28d   :  { %3799 = vmatpush1.bf16.msra.mxu0 %v6113_v31  ;;  %3881 = vmatpush1.bf16.msra.mxu1 %v6115_v33  ;;  %v6226_v31 = vcombine.high %v567_v17, %v575_v18 }
 0x28e   :  { %3800 = vmatprep.subr.bf16.mxu0 %v6130_v34  ;;  %3882 = vmatprep.subr.bf16.mxu1 %v6132_v35  ;;  %v591_v34 = vld [vmem:[#allocation2 + $0xc70] sm:$0xff]  ;;  %v584_v35 = vld [vmem:[#allocation2 + $0xc38] sm:$0xff] }
 0x28f   :  { %3830 = vmatprep.mubr.bf16.mxu0 %v7314_v22  ;;  %3912 = vmatprep.mubr.bf16.mxu1 %v7314_v22  ;;  %v6180_v22 = vcombine.high %v520_v58, %v528_v59  ;;  %v6243_v50 = vcombine.low %v584_v35, %v592_v38 }
 0x291   :  { %3801 = vmatpush1.bf16.msra.mxu0 %v6129_v45  ;;  %3883 = vmatpush1.bf16.msra.mxu1 %v6131_v57  ;;  %v6244_v45 = vcombine.high %v584_v35, %v592_v38  ;;  %v599_v57 = vld [vmem:[#allocation2 + $0xcb0] sm:$0xff]  ;;  %v704_v35 = vld [vmem:[#allocation2 + $0xff8] sm:$0xff] }
 0x292   :  { %3802 = vmatprep.subr.bf16.mxu0 %v6146_v46  ;;  %3884 = vmatprep.subr.bf16.mxu1 %v6148_v47  ;;  %v607_v46 = vld [vmem:[#allocation2 + $0xcf0] sm:$0xff]  ;;  %v600_v47 = vld [vmem:[#allocation2 + $0xcb8] sm:$0xff] }
 0x293   :  { %v6258_v51 = vcombine.high %v599_v57, %v607_v46  ;;  %v6257_v56 = vcombine.low %v599_v57, %v607_v46  ;;  %v6259_v58 = vcombine.low %v600_v47, %v608_v48  ;;  %v3961_v57 = vld [vmem:[#allocation6 + $0x20] sm:$0xff]  ;;  %v3958_v46 = vld [vmem:[#allocation6 + $0x8] sm:$0xff] }
 0x295   :  { %3803 = vmatpush1.bf16.msra.mxu0 %v6145_v52  ;;  %3885 = vmatpush1.bf16.msra.mxu1 %v6147_v12  ;;  %v6260_v52 = vcombine.high %v600_v47, %v608_v48  ;;  %v615_v12 = vld [vmem:[#allocation2 + $0xd30] sm:$0xff] }
 0x296   :  { %3804 = vmatprep.subr.bf16.mxu0 %v6162_v53  ;;  %3886 = vmatprep.subr.bf16.mxu1 %v6164_v54  ;;  %v623_v53 = vld [vmem:[#allocation2 + $0xd70] sm:$0xff]  ;;  %v616_v54 = vld [vmem:[#allocation2 + $0xd38] sm:$0xff] }
 0x297   :  { %v6274_v59 = vcombine.high %v615_v12, %v623_v53  ;;  %v6273_v0 = vcombine.low %v615_v12, %v623_v53  ;;  %v6275_v1 = vcombine.low %v616_v54, %v624_v55  ;;  %v3962_v47 = vld [vmem:[#allocation6 + $0x28] sm:$0xff]  ;;  %v3969_v12 = vld [vmem:[#allocation6 + $0x60] sm:$0xff] }
 0x298   :  { %v3966_v53 = vld [vmem:[#allocation6 + $0x48] sm:$0xff] }
 0x299   :  { %3805 = vmatpush1.bf16.msra.mxu0 %v6161_v60  ;;  %3887 = vmatpush1.bf16.msra.mxu1 %v6163_v61  ;;  %v6276_v60 = vcombine.high %v616_v54, %v624_v55  ;;  %v631_v61 = vld [vmem:[#allocation2 + $0xdb0] sm:$0xff] }
 0x29a   :  { %3806 = vmatprep.subr.bf16.mxu0 %v6178_v62  ;;  %3888 = vmatprep.subr.bf16.mxu1 %v6180_v22  ;;  %v639_v62 = vld [vmem:[#allocation2 + $0xdf0] sm:$0xff]  ;;  %v632_v22 = vld [vmem:[#allocation2 + $0xdb8] sm:$0xff] }
 0x29b   :  { %v6290_v2 = vcombine.high %v631_v61, %v639_v62  ;;  %v6289_v8 = vcombine.low %v631_v61, %v639_v62  ;;  %v6291_v9 = vcombine.low %v632_v22, %v640_v63  ;;  %v3970_v54 = vld [vmem:[#allocation6 + $0x68] sm:$0xff]  ;;  %v3977_v61 = vld [vmem:[#allocation6 + $0xa0] sm:$0xff] }
 0x29c   :  { %v3974_v62 = vld [vmem:[#allocation6 + $0x88] sm:$0xff] }
 0x29d   :  { %3807 = vmatpush1.bf16.msra.mxu0 %v6177_v3  ;;  %3889 = vmatpush1.bf16.msra.mxu1 %v6179_v4  ;;  %v6292_v3 = vcombine.high %v632_v22, %v640_v63  ;;  %v647_v4 = vld [vmem:[#allocation2 + $0xe30] sm:$0xff] }
 0x29e   :  { %3808 = vmatprep.subr.bf16.mxu0 %v6194_v5  ;;  %3890 = vmatprep.subr.bf16.mxu1 %v6196_v6  ;;  %v655_v5 = vld [vmem:[#allocation2 + $0xe70] sm:$0xff]  ;;  %v648_v6 = vld [vmem:[#allocation2 + $0xe38] sm:$0xff] }
 0x29f   :  { %v3504_v15 = vpop.f32.mrb[4].mxu0  ;;  %v7366_v20 = vpop.f32.mrb[4].mxu1  ;;  %v6306_v10 = vcombine.high %v647_v4, %v655_v5  ;;  %v6305_v17 = vcombine.low %v647_v4, %v655_v5  ;;  %v6307_v18 = vcombine.low %v648_v6, %v656_v7  ;;  %v3978_v22 = vld [vmem:[#allocation6 + $0xa8] sm:$0xff]  ;;  %v3985_v4 = vld [vmem:[#allocation6 + $0xe0] sm:$0xff] }
 0x2a0   :  { %v7364_v19 = vmax.f32 %v3921_v40, %v3504_v15  ;;  %v3506_v23 = vpop.f32.mrb[5].mxu0  ;;  %v7373_v27 = vpop.f32.mrb[5].mxu1  ;;  %v664_v15 = vld [vmem:[#allocation2 + $0xeb8] sm:$0xff]  ;;  %v3982_v5 = vld [vmem:[#allocation6 + $0xc8] sm:$0xff] }
 0x2a1   :  { %v7371_v26 = vmax.f32 %v3922_v44, %v3506_v23  ;;  %v3508_v28 = vpop.f32.mrb[6].mxu0  ;;  %3809 = vmatpush1.bf16.msra.mxu0 %v6193_v11  ;;  %v3590_v36 = vpop.f32.mrb[6].mxu1  ;;  %3891 = vmatpush1.bf16.msra.mxu1 %v6195_v13  ;;  %v583_v44 = vld [vmem:[#allocation2 + $0xc30] sm:$0xff]  ;;  %v6308_v11 = vcombine.high %v648_v6, %v656_v7 }
 0x2a2   :  { %v3925_v32 = vmax.f32 %v7364_v19, %v7366_v20  ;;  %v3509_v40 = vpop.f32.mrb[7].mxu0  ;;  %3810 = vmatprep.subr.bf16.mxu0 %v6210_v14  ;;  %v3591_v37 = vpop.f32.mrb[7].mxu1  ;;  %3892 = vmatprep.subr.bf16.mxu1 %v6212_v16  ;;  %v6242_v43 = vcombine.high %v583_v44, %v591_v34  ;;  %v6241_v49 = vcombine.low %v583_v44, %v591_v34  ;;  %v663_v13 = vld [vmem:[#allocation2 + $0xeb0] sm:$0xff]  ;;  %v672_v16 = vld [vmem:[#allocation2 + $0xef8] sm:$0xff] }
 0x2a3   :  { %v3926_v33 = vmax.f32 %v7371_v26, %v7373_v27  ;;  %v671_v14 = vld [vmem:[#allocation2 + $0xef0] sm:$0xff]  ;;  %v6324_v24 = vcombine.high %v664_v15, %v672_v16  ;;  %v688_v36 = vld [vmem:[#allocation2 + $0xf78] sm:$0xff]  ;;  %v4077_v27 = vld [vmem:[#allocation6 + $0x3c0] sm:$0xff] }
 0x2a4   :  { %v6322_v23 = vcombine.high %v663_v13, %v671_v14  ;;  %v687_v28 = vld [vmem:[#allocation2 + $0xf70] sm:$0xff]  ;;  %v6321_v40 = vcombine.low %v663_v13, %v671_v14  ;;  %v696_v34 = vld [vmem:[#allocation2 + $0xfb8] sm:$0xff] }
 0x2a5   :  { %3811 = vmatpush1.bf16.msra.mxu0 %v6209_v29  ;;  %3893 = vmatpush1.bf16.msra.mxu1 %v6211_v30  ;;  %v680_v29 = vld [vmem:[#allocation2 + $0xf38] sm:$0xff]  ;;  %v6323_v30 = vcombine.low %v664_v15, %v672_v16  ;;  %v703_v44 = vld [vmem:[#allocation2 + $0xff0] sm:$0xff]  ;;  %v6337_v38 = vcombine.low %v679_v25, %v687_v28 }
 0x2a6   :  { %3812 = vmatprep.subr.bf16.mxu0 %v6226_v31  ;;  %3894 = vmatprep.subr.bf16.mxu1 %v6228_v41  ;;  %v6338_v31 = vcombine.high %v679_v25, %v687_v28  ;;  %v6340_v37 = vcombine.high %v680_v29, %v688_v36  ;;  %v695_v41 = vld [vmem:[#allocation2 + $0xfb0] sm:$0xff] }
 0x2a7   :  { %v6353_v48 = vcombine.low %v695_v41, %v703_v44  ;;  %v3986_v6 = vld [vmem:[#allocation6 + $0xe8] sm:$0xff] }
 0x2a8   :  { %v3990_v13 = vld [vmem:[#allocation6 + $0x108] sm:$0xff]  ;;  %v6383_v16 = vcombine.low %v3982_v5, %v3986_v6 }
 0x2a9   :  { %3813 = vmatpush1.bf16.msra.mxu0 %v6225_v39  ;;  %3895 = vmatpush1.bf16.msra.mxu1 %v6227_v42  ;;  %v6339_v39 = vcombine.low %v680_v29, %v688_v36  ;;  %v6354_v42 = vcombine.high %v695_v41, %v703_v44  ;;  %v3994_v14 = vld [vmem:[#allocation6 + $0x128] sm:$0xff] }
 0x2aa   :  { %3814 = vmatprep.subr.bf16.mxu0 %v6242_v43  ;;  %3896 = vmatprep.subr.bf16.mxu1 %v6244_v45  ;;  %v6356_v43 = vcombine.high %v696_v34, %v704_v35  ;;  %v3957_v45 = vld [vmem:[#allocation6] sm:$0xff]  ;;  %v3998_v25 = vld [vmem:[#allocation6 + $0x148] sm:$0xff]  ;;  %v6391_v36 = vcombine.low %v3990_v13, %v3994_v14 }
 0x2ab   :  { %v6357_v55 = vcombine.low %v3957_v45, %v3961_v57  ;;  %v4002_v28 = vld [vmem:[#allocation6 + $0x168] sm:$0xff] }
 0x2ac   :  { %v4006_v41 = vld [vmem:[#allocation6 + $0x188] sm:$0xff] }
 0x2ad   :  { %3815 = vmatpush1.bf16.msra.mxu0 %v6241_v49  ;;  %3897 = vmatpush1.bf16.msra.mxu1 %v6243_v50  ;;  %v6355_v49 = vcombine.low %v696_v34, %v704_v35  ;;  %v6358_v50 = vcombine.high %v3957_v45, %v3961_v57  ;;  %v4010_v44 = vld [vmem:[#allocation6 + $0x1a8] sm:$0xff]  ;;  %v6399_v35 = vcombine.low %v3998_v25, %v4002_v28 }
 0x2ae   :  { %3816 = vmatprep.subr.bf16.mxu0 %v6258_v51  ;;  %3898 = vmatprep.subr.bf16.mxu1 %v6260_v52  ;;  %v6360_v51 = vcombine.high %v3958_v46, %v3962_v47  ;;  %v3965_v52 = vld [vmem:[#allocation6 + $0x40] sm:$0xff]  ;;  %v4014_v45 = vld [vmem:[#allocation6 + $0x1c8] sm:$0xff] }
 0x2af   :  { %v6365_v63 = vcombine.low %v3965_v52, %v3969_v12  ;;  %v4018_v57 = vld [vmem:[#allocation6 + $0x1e8] sm:$0xff] }
 0x2b1   :  { %3817 = vmatpush1.bf16.msra.mxu0 %v6257_v56  ;;  %3899 = vmatpush1.bf16.msra.mxu1 %v6259_v58  ;;  %v6359_v56 = vcombine.low %v3958_v46, %v3962_v47  ;;  %v6366_v58 = vcombine.high %v3965_v52, %v3969_v12  ;;  %v6407_v47 = vcombine.low %v4006_v41, %v4010_v44  ;;  %v4022_v52 = vld [vmem:[#allocation6 + $0x208] sm:$0xff] }
 0x2b2   :  { %3818 = vmatprep.subr.bf16.mxu0 %v6274_v59  ;;  %3900 = vmatprep.subr.bf16.mxu1 %v6276_v60  ;;  %v6368_v59 = vcombine.high %v3966_v53, %v3970_v54  ;;  %v3973_v60 = vld [vmem:[#allocation6 + $0x80] sm:$0xff]  ;;  %v4026_v12 = vld [vmem:[#allocation6 + $0x228] sm:$0xff] }
 0x2b3   :  { %v6373_v7 = vcombine.low %v3973_v60, %v3977_v61 }
 0x2b5   :  { %3819 = vmatpush1.bf16.msra.mxu0 %v6273_v0  ;;  %3901 = vmatpush1.bf16.msra.mxu1 %v6275_v1  ;;  %v6367_v0 = vcombine.low %v3966_v53, %v3970_v54  ;;  %v6374_v1 = vcombine.high %v3973_v60, %v3977_v61  ;;  %v6415_v54 = vcombine.low %v4014_v45, %v4018_v57  ;;  %v4030_v60 = vld [vmem:[#allocation6 + $0x248] sm:$0xff] }
 0x2b6   :  { %3820 = vmatprep.subr.bf16.mxu0 %v6290_v2  ;;  %3902 = vmatprep.subr.bf16.mxu1 %v6292_v3  ;;  %v6376_v2 = vcombine.high %v3974_v62, %v3978_v22  ;;  %v3981_v3 = vld [vmem:[#allocation6 + $0xc0] sm:$0xff]  ;;  %v4034_v61 = vld [vmem:[#allocation6 + $0x268] sm:$0xff] }
 0x2b7   :  { %v6381_v15 = vcombine.low %v3981_v3, %v3985_v4 }
 0x2b9   :  { %3821 = vmatpush1.bf16.msra.mxu0 %v6289_v8  ;;  %3903 = vmatpush1.bf16.msra.mxu1 %v6291_v9  ;;  %v6375_v8 = vcombine.low %v3974_v62, %v3978_v22  ;;  %v6382_v9 = vcombine.high %v3981_v3, %v3985_v4  ;;  %v6423_v22 = vcombine.low %v4022_v52, %v4026_v12  ;;  %v4038_v3 = vld [vmem:[#allocation6 + $0x288] sm:$0xff] }
 0x2ba   :  { %3822 = vmatprep.subr.bf16.mxu0 %v6306_v10  ;;  %3904 = vmatprep.subr.bf16.mxu1 %v6308_v11  ;;  %v3989_v10 = vld [vmem:[#allocation6 + $0x100] sm:$0xff]  ;;  %v4042_v4 = vld [vmem:[#allocation6 + $0x2a8] sm:$0xff] }
 0x2bb   :  { %v3993_v11 = vld [vmem:[#allocation6 + $0x120] sm:$0xff] }
 0x2bc   :  { %v6389_v29 = vcombine.low %v3989_v10, %v3993_v11 }
 0x2bd   :  { %3823 = vmatpush1.bf16.msra.mxu0 %v6305_v17  ;;  %3905 = vmatpush1.bf16.msra.mxu1 %v6307_v18  ;;  %v6390_v17 = vcombine.high %v3989_v10, %v3993_v11  ;;  %v6392_v18 = vcombine.high %v3990_v13, %v3994_v14  ;;  %v4046_v10 = vld [vmem:[#allocation6 + $0x2c8] sm:$0xff]  ;;  %v6439_v14 = vcombine.low %v4038_v3, %v4042_v4 }
 0x2be   :  { %3824 = vmatprep.subr.bf16.mxu0 %v6322_v23  ;;  %3906 = vmatprep.subr.bf16.mxu1 %v6324_v24  ;;  %v3997_v23 = vld [vmem:[#allocation6 + $0x140] sm:$0xff]  ;;  %v4050_v11 = vld [vmem:[#allocation6 + $0x2e8] sm:$0xff] }
 0x2bf   :  { %v4001_v24 = vld [vmem:[#allocation6 + $0x160] sm:$0xff] }
 0x2c0   :  { %v6397_v34 = vcombine.low %v3997_v23, %v4001_v24 }
 0x2c1   :  { %3825 = vmatpush1.bf16.msra.mxu0 %v6321_v40  ;;  %3907 = vmatpush1.bf16.msra.mxu1 %v6323_v30  ;;  %v6398_v40 = vcombine.high %v3997_v23, %v4001_v24  ;;  %v6400_v30 = vcombine.high %v3998_v25, %v4002_v28  ;;  %v4054_v23 = vld [vmem:[#allocation6 + $0x308] sm:$0xff]  ;;  %v6447_v28 = vcombine.low %v4046_v10, %v4050_v11 }
 0x2c2   :  { %3826 = vmatprep.subr.bf16.mxu0 %v6338_v31  ;;  %3908 = vmatprep.subr.bf16.mxu1 %v6340_v37  ;;  %v4005_v31 = vld [vmem:[#allocation6 + $0x180] sm:$0xff]  ;;  %v4058_v24 = vld [vmem:[#allocation6 + $0x328] sm:$0xff] }
 0x2c3   :  { %v4009_v37 = vld [vmem:[#allocation6 + $0x1a0] sm:$0xff] }
 0x2c4   :  { %v6405_v46 = vcombine.low %v4005_v31, %v4009_v37 }
 0x2c5   :  { %3827 = vmatpush1.bf16.msra.mxu0 %v6337_v38  ;;  %3909 = vmatpush1.bf16.msra.mxu1 %v6339_v39  ;;  %v6406_v38 = vcombine.high %v4005_v31, %v4009_v37  ;;  %v6408_v39 = vcombine.high %v4006_v41, %v4010_v44  ;;  %v4061_v31 = vld [vmem:[#allocation6 + $0x340] sm:$0xff]  ;;  %v4062_v41 = vld [vmem:[#allocation6 + $0x348] sm:$0xff] }
 0x2c6   :  { %3828 = vmatprep.subr.bf16.mxu0 %v6354_v42  ;;  %3910 = vmatprep.subr.bf16.mxu1 %v6356_v43  ;;  %v4013_v42 = vld [vmem:[#allocation6 + $0x1c0] sm:$0xff] }
 0x2c7   :  { %v4017_v43 = vld [vmem:[#allocation6 + $0x1e0] sm:$0xff] }
 0x2c8   :  { %v6413_v53 = vcombine.low %v4013_v42, %v4017_v43  ;;  %v4065_v37 = vld [vmem:[#allocation6 + $0x360] sm:$0xff] }
 0x2c9   :  { %3829 = vmatpush1.bf16.msra.mxu0 %v6353_v48  ;;  %3911 = vmatpush1.bf16.msra.mxu1 %v6355_v49  ;;  %v6414_v48 = vcombine.high %v4013_v42, %v4017_v43  ;;  %v6416_v49 = vcombine.high %v4014_v45, %v4018_v57  ;;  %v6461_v43 = vcombine.low %v4061_v31, %v4065_v37 }
 0x2ca   :  { %4725 = vmatprep.subr.bf16.mxu0 %v6358_v50  ;;  %4766 = vmatprep.subr.bf16.mxu1 %v6360_v51  ;;  %v4021_v50 = vld [vmem:[#allocation6 + $0x200] sm:$0xff] }
 0x2cb   :  { %v4025_v51 = vld [vmem:[#allocation6 + $0x220] sm:$0xff] }
 0x2cc   :  { %3831 = vmatmul.mubr.bf16.vlgmr.msra.gmra.mrb[12].mxu0 %v7323_v21  ;;  %3913 = vmatmul.mubr.bf16.vlgmr.msra.gmra.mrb[12].mxu1 %v7323_v21  ;;  %v6384_v21 = vcombine.high %v3982_v5, %v3986_v6  ;;  %v6421_v62 = vcombine.low %v4021_v50, %v4025_v51  ;;  %v6431_v6 = vcombine.low %v4030_v60, %v4034_v61 }
 0x2cd   :  { %4726 = vmatpush1.bf16.msra.mxu0 %v6357_v55  ;;  %4767 = vmatpush1.bf16.msra.mxu1 %v6359_v56  ;;  %v6422_v55 = vcombine.high %v4021_v50, %v4025_v51  ;;  %v6424_v56 = vcombine.high %v4022_v52, %v4026_v12  ;;  %v4069_v52 = vld [vmem:[#allocation6 + $0x380] sm:$0xff]  ;;  %v4070_v12 = vld [vmem:[#allocation6 + $0x388] sm:$0xff] }
 0x2ce   :  { %4727 = vmatprep.subr.bf16.mxu0 %v6366_v58  ;;  %4768 = vmatprep.subr.bf16.mxu1 %v6368_v59  ;;  %v4029_v58 = vld [vmem:[#allocation6 + $0x240] sm:$0xff] }
 0x2cf   :  { %v4033_v59 = vld [vmem:[#allocation6 + $0x260] sm:$0xff] }
 0x2d0   :  { %v6429_v5 = vcombine.low %v4029_v58, %v4033_v59 }
 0x2d1   :  { %4728 = vmatpush1.bf16.msra.mxu0 %v6365_v63  ;;  %4769 = vmatpush1.bf16.msra.mxu1 %v6367_v0  ;;  %v6430_v63 = vcombine.high %v4029_v58, %v4033_v59  ;;  %v6432_v0 = vcombine.high %v4030_v60, %v4034_v61  ;;  %v4078_v58 = vld [vmem:[#allocation6 + $0x3c8] sm:$0xff] }
 0x2d2   :  { %4729 = vmatprep.subr.bf16.mxu0 %v6374_v1  ;;  %4770 = vmatprep.subr.bf16.mxu1 %v6376_v2  ;;  %v4037_v1 = vld [vmem:[#allocation6 + $0x280] sm:$0xff]  ;;  %v4082_v60 = vld [vmem:[#allocation6 + $0x3e8] sm:$0xff] }
 0x2d3   :  { %v4041_v2 = vld [vmem:[#allocation6 + $0x2a0] sm:$0xff] }
 0x2d4   :  { %v6437_v13 = vcombine.low %v4037_v1, %v4041_v2 }
 0x2d5   :  { %4730 = vmatpush1.bf16.msra.mxu0 %v6373_v7  ;;  %4771 = vmatpush1.bf16.msra.mxu1 %v6375_v8  ;;  %v6438_v7 = vcombine.high %v4037_v1, %v4041_v2  ;;  %v6440_v8 = vcombine.high %v4038_v3, %v4042_v4  ;;  %v3960_v1 = vld [vmem:[#allocation6 + $0x18] sm:$0xff] }
 0x2d6   :  { %4731 = vmatprep.subr.bf16.mxu0 %v6382_v9  ;;  %4772 = vmatprep.subr.bf16.mxu1 %v6384_v21  ;;  %v4045_v9 = vld [vmem:[#allocation6 + $0x2c0] sm:$0xff]  ;;  %v3964_v3 = vld [vmem:[#allocation6 + $0x38] sm:$0xff] }
 0x2d7   :  { %v4049_v21 = vld [vmem:[#allocation6 + $0x2e0] sm:$0xff] }
 0x2d8   :  { %v6445_v25 = vcombine.low %v4045_v9, %v4049_v21 }
 0x2d9   :  { %4732 = vmatpush1.bf16.msra.mxu0 %v6381_v15  ;;  %4773 = vmatpush1.bf16.msra.mxu1 %v6383_v16  ;;  %v6446_v15 = vcombine.high %v4045_v9, %v4049_v21  ;;  %v6448_v16 = vcombine.high %v4046_v10, %v4050_v11  ;;  %v3935_v21 = vld [vmem:[#allocation4] sm:$0x3] }
 0x2da   :  { %4733 = vmatprep.subr.bf16.mxu0 %v6390_v17  ;;  %4774 = vmatprep.subr.bf16.mxu1 %v6392_v18  ;;  %v4053_v17 = vld [vmem:[#allocation6 + $0x300] sm:$0xff] }
 0x2db   :  { %v4057_v18 = vld [vmem:[#allocation6 + $0x320] sm:$0xff] }
 0x2dd   :  { %4734 = vmatpush1.bf16.msra.mxu0 %v6389_v29  ;;  %4775 = vmatpush1.bf16.msra.mxu1 %v6391_v36  ;;  %v6454_v29 = vcombine.high %v4053_v17, %v4057_v18  ;;  %v6456_v36 = vcombine.high %v4054_v23, %v4058_v24 }
 0x2de   :  { %4735 = vmatprep.subr.bf16.mxu0 %v6398_v40  ;;  %4776 = vmatprep.subr.bf16.mxu1 %v6400_v30  ;;  %v6453_v40 = vcombine.low %v4053_v17, %v4057_v18  ;;  %v6455_v30 = vcombine.low %v4054_v23, %v4058_v24 }
 0x2e1   :  { %4736 = vmatpush1.bf16.msra.mxu0 %v6397_v34  ;;  %4777 = vmatpush1.bf16.msra.mxu1 %v6399_v35  ;;  %v6462_v34 = vcombine.high %v4061_v31, %v4065_v37  ;;  %v4066_v35 = vld [vmem:[#allocation6 + $0x368] sm:$0xff] }
 0x2e2   :  { %4737 = vmatprep.subr.bf16.mxu0 %v6406_v38  ;;  %4778 = vmatprep.subr.bf16.mxu1 %v6408_v39  ;;  %v6463_v45 = vcombine.low %v4062_v41, %v4066_v35  ;;  %v6464_v57 = vcombine.high %v4062_v41, %v4066_v35 }
 0x2e5   :  { %4738 = vmatpush1.bf16.msra.mxu0 %v6405_v46  ;;  %4779 = vmatpush1.bf16.msra.mxu1 %v6407_v47 }
 0x2e6   :  { %4739 = vmatprep.subr.bf16.mxu0 %v6414_v48  ;;  %4780 = vmatprep.subr.bf16.mxu1 %v6416_v49 }
 0x2e9   :  { %4740 = vmatpush1.bf16.msra.mxu0 %v6413_v53  ;;  %4781 = vmatpush1.bf16.msra.mxu1 %v6415_v54  ;;  %v4074_v53 = vld [vmem:[#allocation6 + $0x3a8] sm:$0xff] }
 0x2ea   :  { %4741 = vmatprep.subr.bf16.mxu0 %v6422_v55  ;;  %4782 = vmatprep.subr.bf16.mxu1 %v6424_v56  ;;  %v6471_v56 = vcombine.low %v4070_v12, %v4074_v53  ;;  %v6472_v26 = vcombine.high %v4070_v12, %v4074_v53  ;;  %v3987_v12 = vld [vmem:[#allocation6 + $0xf0] sm:$0xff]  ;;  %v3984_v53 = vld [vmem:[#allocation6 + $0xd8] sm:$0xff] }
 0x2ed   :  { %4742 = vmatpush1.bf16.msra.mxu0 %v6421_v62  ;;  %4783 = vmatpush1.bf16.msra.mxu1 %v6423_v22  ;;  %v6479_v62 = vcombine.low %v4078_v58, %v4082_v60  ;;  %v6480_v22 = vcombine.high %v4078_v58, %v4082_v60  ;;  %v3995_v58 = vld [vmem:[#allocation6 + $0x130] sm:$0xff]  ;;  %v3996_v60 = vld [vmem:[#allocation6 + $0x138] sm:$0xff] }
 0x2ee   :  { %4743 = vmatprep.subr.bf16.mxu0 %v6430_v63  ;;  %4784 = vmatprep.subr.bf16.mxu1 %v6432_v0  ;;  %v3959_v63 = vld [vmem:[#allocation6 + $0x10] sm:$0xff] }
 0x2ef   :  { %v3963_v0 = vld [vmem:[#allocation6 + $0x30] sm:$0xff] }
 0x2f0   :  { %v6362_v2 = vcombine.high %v3959_v63, %v3963_v0  ;;  %v6361_v4 = vcombine.low %v3959_v63, %v3963_v0  ;;  %v3999_v0 = vld [vmem:[#allocation6 + $0x150] sm:$0xff] }
 0x2f1   :  { %4744 = vmatpush1.bf16.msra.mxu0 %v6429_v5  ;;  %4785 = vmatpush1.bf16.msra.mxu1 %v6431_v6  ;;  %v6363_v5 = vcombine.low %v3960_v1, %v3964_v3  ;;  %v6364_v6 = vcombine.high %v3960_v1, %v3964_v3  ;;  %v4003_v1 = vld [vmem:[#allocation6 + $0x170] sm:$0xff]  ;;  %v4004_v3 = vld [vmem:[#allocation6 + $0x178] sm:$0xff] }
 0x2f2   :  { %4745 = vmatprep.subr.bf16.mxu0 %v6438_v7  ;;  %4786 = vmatprep.subr.bf16.mxu1 %v6440_v8  ;;  %v3937_v7 = vlaneseq }
 0x2f4   :  { %v3938_v8 = vshrl.u32 %v3937_v7, 7 }
 0x2f5   :  { %4746 = vmatpush1.bf16.msra.mxu0 %v6437_v13  ;;  %4787 = vmatpush1.bf16.msra.mxu1 %v6439_v14 }
 0x2f6   :  { %4747 = vmatprep.subr.bf16.mxu0 %v6446_v15  ;;  %4788 = vmatprep.subr.bf16.mxu1 %v6448_v16  ;;  %v3939_v9 = vsub.s32 0, %v3938_v8  ;;  %v3943_v10 = vsub.s32 1, %v3938_v8  ;;  %v4007_v8 = vld [vmem:[#allocation6 + $0x190] sm:$0xff] }
 0x2f8   :  { %v3940_v15 = vrot.slane %v3935_v21, %v3939_v9  ;;  %v3944_v23 = vrot.slane %v3935_v21, %v3943_v10  ;;  %v4011_v9 = vld [vmem:[#allocation6 + $0x1b0] sm:$0xff]  ;;  %v4008_v21 = vld [vmem:[#allocation6 + $0x198] sm:$0xff] }
 0x2f9   :  { %4748 = vmatpush1.bf16.msra.mxu0 %v6445_v25  ;;  %4789 = vmatpush1.bf16.msra.mxu1 %v6447_v28  ;;  %v4012_v10 = vld [vmem:[#allocation6 + $0x1b8] sm:$0xff] }
 0x2fa   :  { %4749 = vmatprep.subr.bf16.mxu0 %v6454_v29  ;;  %4790 = vmatprep.subr.bf16.mxu1 %v6456_v36 }
 0x2fd   :  { %4750 = vmatpush1.bf16.msra.mxu0 %v6453_v40  ;;  %4791 = vmatpush1.bf16.msra.mxu1 %v6455_v30 }
 0x2fe   :  { %4751 = vmatprep.subr.bf16.mxu0 %v6462_v34  ;;  %4792 = vmatprep.subr.bf16.mxu1 %v6464_v57  ;;  %v3967_v34 = vld [vmem:[#allocation6 + $0x50] sm:$0xff] }
 0x2ff   :  { %v3975_v57 = vld [vmem:[#allocation6 + $0x90] sm:$0xff] }
 0x301   :  { %4752 = vmatpush1.bf16.msra.mxu0 %v6461_v43  ;;  %4793 = vmatpush1.bf16.msra.mxu1 %v6463_v45 }
 0x302   :  { %4794 = vmatprep.subr.bf16.mxu1 %v6472_v26 }
 0x305   :  { %4795 = vmatpush1.bf16.msra.mxu1 %v6471_v56 }
 0x306   :  { %4796 = vmatprep.subr.bf16.mxu1 %v6480_v22 }
 0x309   :  { %4797 = vmatpush1.bf16.msra.mxu1 %v6479_v62 }
 0x30a   :  { %4848 = vmatprep.subr.bf16.mxu1 %v6364_v6  ;;  %v6402_v6 = vcombine.high %v3999_v0, %v4003_v1 }
 0x31f   :  { %v3668_v44 = vpop.f32.mrb[8].mxu0  ;;  %v3750_v39 = vpop.f32.mrb[8].mxu1 }
 0x320   :  { %v3927_v38 = vmax.f32 %v3925_v32, %v3668_v44  ;;  %v3670_v42 = vpop.f32.mrb[9].mxu0  ;;  %v3752_v47 = vpop.f32.mrb[9].mxu1  ;;  %v4073_v32 = vld [vmem:[#allocation6 + $0x3a0] sm:$0xff] }
 0x321   :  { %v3928_v46 = vmax.f32 %v3926_v33, %v3670_v42  ;;  %v3672_v48 = vpop.f32.mrb[10].mxu0  ;;  %v3754_v50 = vpop.f32.mrb[10].mxu1  ;;  %v6469_v54 = vcombine.low %v4069_v52, %v4073_v32  ;;  %v6470_v55 = vcombine.high %v4069_v52, %v4073_v32  ;;  %v4081_v33 = vld [vmem:[#allocation6 + $0x3e0] sm:$0xff]  ;;  %v3972_v42 = vld [vmem:[#allocation6 + $0x78] sm:$0xff]  ;;  %v3983_v32 = vld [vmem:[#allocation6 + $0xd0] sm:$0xff] }
 0x322   :  { %v3929_v49 = vmax.f32 %v3927_v38, %v3750_v39  ;;  %v3673_v51 = vpop.f32.mrb[11].mxu0  ;;  %v3755_v20 = vpop.f32.mrb[11].mxu1  ;;  %v6478_v59 = vcombine.high %v4077_v27, %v4081_v33  ;;  %v6477_v61 = vcombine.low %v4077_v27, %v4081_v33  ;;  %v3971_v38 = vld [vmem:[#allocation6 + $0x70] sm:$0xff]  ;;  %v3968_v39 = vld [vmem:[#allocation6 + $0x58] sm:$0xff]  ;;  %v6386_v26 = vcombine.high %v3983_v32, %v3987_v12 }
 0x323   :  { %v3930_v19 = vmax.f32 %v3928_v46, %v3752_v47  ;;  %4753 = vmatprep.subr.bf16.mxu0 %v6470_v55  ;;  %v6370_v46 = vcombine.high %v3967_v34, %v3971_v38  ;;  %v6372_v47 = vcombine.high %v3968_v39, %v3972_v42  ;;  %v3979_v48 = vld [vmem:[#allocation6 + $0xb0] sm:$0xff]  ;;  %v3980_v50 = vld [vmem:[#allocation6 + $0xb8] sm:$0xff]  ;;  %v6369_v51 = vcombine.low %v3967_v34, %v3971_v38 }
 0x324   :  { %4754 = vmatpush1.bf16.msra.mxu0 %v6469_v54  ;;  %v6371_v52 = vcombine.low %v3968_v39, %v3972_v42  ;;  %v3988_v54 = vld [vmem:[#allocation6 + $0xf8] sm:$0xff]  ;;  %v6377_v55 = vcombine.low %v3975_v57, %v3979_v48  ;;  %v3991_v33 = vld [vmem:[#allocation6 + $0x110] sm:$0xff] }
 0x325   :  { %4755 = vmatprep.subr.bf16.mxu0 %v6478_v59  ;;  %v6388_v27 = vcombine.high %v3984_v53, %v3988_v54  ;;  %v3992_v59 = vld [vmem:[#allocation6 + $0x118] sm:$0xff]  ;;  %v6387_v62 = vcombine.low %v3984_v53, %v3988_v54  ;;  %v6394_v22 = vcombine.high %v3991_v33, %v3995_v58  ;;  %v4035_v38 = vld [vmem:[#allocation6 + $0x270] sm:$0xff] }
 0x326   :  { %v6396_v63 = vcombine.high %v3992_v59, %v3996_v60  ;;  %v4032_v39 = vld [vmem:[#allocation6 + $0x258] sm:$0xff]  ;;  %v4051_v53 = vld [vmem:[#allocation6 + $0x2f0] sm:$0xff] }
 0x327   :  { %v4036_v42 = vld [vmem:[#allocation6 + $0x278] sm:$0xff] }
 0x328   :  { %4756 = vmatpush1.bf16.msra.mxu0 %v6477_v61  ;;  %v6385_v61 = vcombine.low %v3983_v32, %v3987_v12  ;;  %v4047_v12 = vld [vmem:[#allocation6 + $0x2d0] sm:$0xff]  ;;  %v4048_v54 = vld [vmem:[#allocation6 + $0x2d8] sm:$0xff] }
 0x329   :  { %4807 = vmatprep.subr.bf16.mxu0 %v6362_v2  ;;  %v4000_v2 = vld [vmem:[#allocation6 + $0x158] sm:$0xff] }
 0x32a   :  { %v6404_v7 = vcombine.high %v4000_v2, %v4004_v3 }
 0x39f   :  { %v3832_v11 = vpop.f32.mrb[12].mxu0  ;;  %v3914_v14 = vpop.f32.mrb[12].mxu1 }
 0x3a0   :  { %v3931_v13 = vmax.f32 %v3929_v49, %v3832_v11  ;;  %v3834_v16 = vpop.f32.mrb[13].mxu0  ;;  %v3916_v18 = vpop.f32.mrb[13].mxu1  ;;  %v3976_v49 = vld [vmem:[#allocation6 + $0x98] sm:$0xff]  ;;  %v6401_v11 = vcombine.low %v3999_v0, %v4003_v1  ;;  %v4063_v1 = vld [vmem:[#allocation6 + $0x350] sm:$0xff] }
 0x3a1   :  { %v3932_v17 = vmax.f32 %v3930_v19, %v3834_v16  ;;  %v3836_v24 = vpop.f32.mrb[14].mxu0  ;;  %v3918_v28 = vpop.f32.mrb[14].mxu1  ;;  %v6378_v19 = vcombine.high %v3975_v57, %v3979_v48  ;;  %v6380_v20 = vcombine.high %v3976_v49, %v3980_v50  ;;  %v6379_v56 = vcombine.low %v3976_v49, %v3980_v50  ;;  %v4015_v16 = vld [vmem:[#allocation6 + $0x1d0] sm:$0xff]  ;;  %v4040_v50 = vld [vmem:[#allocation6 + $0x298] sm:$0xff] }
 0x3a2   :  { %v3933_v25 = vmax.f32 %v3931_v13, %v3914_v14  ;;  %v3837_v29 = vpop.f32.mrb[15].mxu0  ;;  %v3919_v40 = vpop.f32.mrb[15].mxu1  ;;  %v6403_v13 = vcombine.low %v4000_v2, %v4004_v3  ;;  %v6410_v14 = vcombine.high %v4007_v8, %v4011_v9  ;;  %v6409_v24 = vcombine.low %v4007_v8, %v4011_v9  ;;  %v4039_v48 = vld [vmem:[#allocation6 + $0x290] sm:$0xff]  ;;  %v4064_v3 = vld [vmem:[#allocation6 + $0x358] sm:$0xff] }
 0x3a3   :  { %v3934_v36 = vmax.f32 %v3932_v17, %v3916_v18  ;;  %v4019_v17 = vld [vmem:[#allocation6 + $0x1f0] sm:$0xff]  ;;  %v4016_v18 = vld [vmem:[#allocation6 + $0x1d8] sm:$0xff] }
 0x3a4   :  { %v3947_v30 = vadd.f32 %v3940_v15, %v3933_v25  ;;  %v6412_v15 = vcombine.high %v4008_v21, %v4012_v10  ;;  %v6411_v25 = vcombine.low %v4008_v21, %v4012_v10  ;;  %v6418_v28 = vcombine.high %v4015_v16, %v4019_v17  ;;  %v4027_v40 = vld [vmem:[#allocation6 + $0x230] sm:$0xff]  ;;  %v4072_v10 = vld [vmem:[#allocation6 + $0x398] sm:$0xff] }
 0x3a5   :  { %v3948_v31 = vadd.f32 %v3944_v23, %v3934_v36  ;;  %v4020_v23 = vld [vmem:[#allocation6 + $0x1f8] sm:$0xff]  ;;  %v4023_v36 = vld [vmem:[#allocation6 + $0x210] sm:$0xff] }
 0x3a6   :  { %vm3949_vm0 = vcmp.gt.f32.partialorder %v3947_v30, 0.0  ;;  %v3951_v37 = vmul.f32 0.2, %v3947_v30  ;;  %v6420_v29 = vcombine.high %v4016_v18, %v4020_v23  ;;  %v4043_v49 = vld [vmem:[#allocation6 + $0x2b0] sm:$0xff] }
 0x3a7   :  { %vm3950_vm1 = vcmp.gt.f32.partialorder %v3948_v31, 0.0  ;;  %v3952_v41 = vmul.f32 0.2, %v3948_v31  ;;  %v4067_v2 = vld [vmem:[#allocation6 + $0x370] sm:$0xff] }
 0x3a8   :  { %v3953_v44 = vsel %vm3949_vm0, %v3947_v30, %v3951_v37  ;;  %v4024_v30 = vld [vmem:[#allocation6 + $0x218] sm:$0xff]  ;;  %v6417_v37 = vcombine.low %v4015_v16, %v4019_v17  ;;  %v4071_v9 = vld [vmem:[#allocation6 + $0x390] sm:$0xff] }
 0x3a9   :  { %v3954_v35 = vsel %vm3950_vm1, %v3948_v31, %v3952_v41  ;;  %v7387_v45 = vpack.c.bf16 %v3953_v44, %v3953_v44  ;;  %v4028_v31 = vld [vmem:[#allocation6 + $0x238] sm:$0xff]  ;;  %v6419_v41 = vcombine.low %v4016_v18, %v4020_v23  ;;  %v6426_v44 = vcombine.high %v4023_v36, %v4027_v40  ;;  %v4075_v21 = vld [vmem:[#allocation6 + $0x3b0] sm:$0xff] }
 0x3aa   :  { %v3956_v43 = vpack.c.bf16 %v3954_v35, %v3954_v35  ;;  %v6428_v34 = vcombine.high %v4024_v30, %v4028_v31  ;;  %v4031_v35 = vld [vmem:[#allocation6 + $0x250] sm:$0xff]  ;;  %v6427_v57 = vcombine.low %v4024_v30, %v4028_v31  ;;  %v4080_v23 = vld [vmem:[#allocation6 + $0x3d8] sm:$0xff]  ;;  %v4908_v31 = vld [vmem:[#allocation9] sm:$0xff] }
 0x3ab   :  { %v4079_v17 = vld [vmem:[#allocation6 + $0x3d0] sm:$0xff] }
 0x3ac   :  { %4757 = vmatprep.mubr.bf16.mxu0 %v3956_v43  ;;  %4798 = vmatprep.mubr.bf16.mxu1 %v3956_v43  ;;  %v4083_v18 = vld [vmem:[#allocation6 + $0x3f0] sm:$0xff] }
 0x3ad   :  { %4758 = vmatmul.mubr.bf16.vlgmr.msra.gmra.mrb[16].mxu0 %v7387_v45  ;;  %4799 = vmatmul.mubr.bf16.vlgmr.msra.gmra.mrb[16].mxu1 %v7387_v45 }
 0x3ae   :  { %4808 = vmatpush1.bf16.msra.mxu0 %v6361_v4  ;;  %4849 = vmatpush1.bf16.msra.mxu1 %v6363_v5  ;;  %v6393_v4 = vcombine.low %v3991_v33, %v3995_v58  ;;  %v6395_v5 = vcombine.low %v3992_v59, %v3996_v60  ;;  %v4055_v58 = vld [vmem:[#allocation6 + $0x310] sm:$0xff]  ;;  %v4056_v60 = vld [vmem:[#allocation6 + $0x318] sm:$0xff] }
 0x3af   :  { %4839 = vmatprep.mubr.bf16.mxu0 %v3956_v43  ;;  %4880 = vmatprep.mubr.bf16.mxu1 %v3956_v43  ;;  %v6425_v43 = vcombine.low %v4023_v36, %v4027_v40  ;;  %v4059_v59 = vld [vmem:[#allocation6 + $0x330] sm:$0xff]  ;;  %v6481_v40 = vcombine.low %v4079_v17, %v4083_v18 }
 0x3b0   :  { %4809 = vmatprep.subr.bf16.mxu0 %v6370_v46  ;;  %4850 = vmatprep.subr.bf16.mxu1 %v6372_v47  ;;  %v6434_v46 = vcombine.high %v4031_v35, %v4035_v38  ;;  %v6436_v47 = vcombine.high %v4032_v39, %v4036_v42 }
 0x3b2   :  { %4810 = vmatpush1.bf16.msra.mxu0 %v6369_v51  ;;  %4851 = vmatpush1.bf16.msra.mxu1 %v6371_v52  ;;  %v4044_v51 = vld [vmem:[#allocation6 + $0x2b8] sm:$0xff]  ;;  %v6433_v52 = vcombine.low %v4031_v35, %v4035_v38  ;;  %v4913_v35 = vld [vmem:[#allocation9 + $0x28] sm:$0xff]  ;;  %v4916_v38 = vld [vmem:[#allocation9 + $0x40] sm:$0xff] }
 0x3b3   :  { %4811 = vmatprep.subr.bf16.mxu0 %v6378_v19  ;;  %4852 = vmatprep.subr.bf16.mxu1 %v6380_v20  ;;  %v6435_v19 = vcombine.low %v4032_v39, %v4036_v42  ;;  %v6442_v20 = vcombine.high %v4039_v48, %v4043_v49  ;;  %v6444_v32 = vcombine.high %v4040_v50, %v4044_v51  ;;  %v4920_v39 = vld [vmem:[#allocation9 + $0x60] sm:$0xff] }
 0x3b6   :  { %4812 = vmatpush1.bf16.msra.mxu0 %v6377_v55  ;;  %4853 = vmatpush1.bf16.msra.mxu1 %v6379_v56  ;;  %v4052_v55 = vld [vmem:[#allocation6 + $0x2f8] sm:$0xff]  ;;  %v6441_v56 = vcombine.low %v4039_v48, %v4043_v49  ;;  %v4924_v48 = vld [vmem:[#allocation9 + $0x80] sm:$0xff] }
 0x3b7   :  { %4813 = vmatprep.subr.bf16.mxu0 %v6386_v26  ;;  %4854 = vmatprep.subr.bf16.mxu1 %v6388_v27  ;;  %v6443_v26 = vcombine.low %v4040_v50, %v4044_v51  ;;  %v6450_v27 = vcombine.high %v4047_v12, %v4051_v53  ;;  %v6452_v33 = vcombine.high %v4048_v54, %v4052_v55  ;;  %v4928_v50 = vld [vmem:[#allocation9 + $0xa0] sm:$0xff]  ;;  %v4925_v51 = vld [vmem:[#allocation9 + $0x88] sm:$0xff] }
 0x3ba   :  { %4814 = vmatpush1.bf16.msra.mxu0 %v6385_v61  ;;  %4855 = vmatpush1.bf16.msra.mxu1 %v6387_v62  ;;  %v4060_v61 = vld [vmem:[#allocation6 + $0x338] sm:$0xff]  ;;  %v6449_v62 = vcombine.low %v4047_v12, %v4051_v53  ;;  %v4932_v12 = vld [vmem:[#allocation9 + $0xc0] sm:$0xff] }
 0x3bb   :  { %4815 = vmatprep.subr.bf16.mxu0 %v6394_v22  ;;  %4856 = vmatprep.subr.bf16.mxu1 %v6396_v63  ;;  %v6451_v22 = vcombine.low %v4048_v54, %v4052_v55  ;;  %v6458_v63 = vcombine.high %v4055_v58, %v4059_v59  ;;  %v6460_v0 = vcombine.high %v4056_v60, %v4060_v61  ;;  %v4936_v53 = vld [vmem:[#allocation9 + $0xe0] sm:$0xff]  ;;  %v4933_v54 = vld [vmem:[#allocation9 + $0xc8] sm:$0xff] }
 0x3bc   :  { %v4937_v55 = vld [vmem:[#allocation9 + $0xe8] sm:$0xff] }
 0x3be   :  { %4816 = vmatpush1.bf16.msra.mxu0 %v6393_v4  ;;  %4857 = vmatpush1.bf16.msra.mxu1 %v6395_v5  ;;  %v4068_v4 = vld [vmem:[#allocation6 + $0x378] sm:$0xff]  ;;  %v6457_v5 = vcombine.low %v4055_v58, %v4059_v59  ;;  %v4940_v58 = vld [vmem:[#allocation9 + $0x100] sm:$0xff] }
 0x3bf   :  { %4817 = vmatprep.subr.bf16.mxu0 %v6402_v6  ;;  %4858 = vmatprep.subr.bf16.mxu1 %v6404_v7  ;;  %v6459_v6 = vcombine.low %v4056_v60, %v4060_v61  ;;  %v6466_v7 = vcombine.high %v4063_v1, %v4067_v2  ;;  %v6468_v8 = vcombine.high %v4064_v3, %v4068_v4  ;;  %v4944_v59 = vld [vmem:[#allocation9 + $0x120] sm:$0xff]  ;;  %v4941_v60 = vld [vmem:[#allocation9 + $0x108] sm:$0xff] }
 0x3c0   :  { %v4945_v61 = vld [vmem:[#allocation9 + $0x128] sm:$0xff] }
 0x3c2   :  { %4818 = vmatpush1.bf16.msra.mxu0 %v6401_v11  ;;  %4859 = vmatpush1.bf16.msra.mxu1 %v6403_v13  ;;  %v4076_v11 = vld [vmem:[#allocation6 + $0x3b8] sm:$0xff]  ;;  %v6465_v13 = vcombine.low %v4063_v1, %v4067_v2  ;;  %v6518_v1 = vcombine.low %v4940_v58, %v4944_v59  ;;  %v6520_v2 = vcombine.low %v4941_v60, %v4945_v61 }
 0x3c3   :  { %4819 = vmatprep.subr.bf16.mxu0 %v6410_v14  ;;  %4860 = vmatprep.subr.bf16.mxu1 %v6412_v15  ;;  %v6467_v14 = vcombine.low %v4064_v3, %v4068_v4  ;;  %v6474_v15 = vcombine.high %v4071_v9, %v4075_v21  ;;  %v6476_v16 = vcombine.high %v4072_v10, %v4076_v11  ;;  %v4948_v3 = vld [vmem:[#allocation9 + $0x140] sm:$0xff] }
 0x3c4   :  { %v4952_v4 = vld [vmem:[#allocation9 + $0x160] sm:$0xff] }
 0x3c6   :  { %4820 = vmatpush1.bf16.msra.mxu0 %v6409_v24  ;;  %4861 = vmatpush1.bf16.msra.mxu1 %v6411_v25  ;;  %v4084_v24 = vld [vmem:[#allocation6 + $0x3f8] sm:$0xff]  ;;  %v6473_v25 = vcombine.low %v4071_v9, %v4075_v21 }
 0x3c7   :  { %4821 = vmatprep.subr.bf16.mxu0 %v6418_v28  ;;  %4862 = vmatprep.subr.bf16.mxu1 %v6420_v29  ;;  %v6475_v28 = vcombine.low %v4072_v10, %v4076_v11  ;;  %v6482_v29 = vcombine.high %v4079_v17, %v4083_v18  ;;  %v6484_v36 = vcombine.high %v4080_v23, %v4084_v24  ;;  %v4956_v10 = vld [vmem:[#allocation9 + $0x180] sm:$0xff] }
 0x3c8   :  { %v6483_v30 = vcombine.low %v4080_v23, %v4084_v24  ;;  %v4960_v11 = vld [vmem:[#allocation9 + $0x1a0] sm:$0xff] }
 0x3c9   :  { %v4964_v23 = vld [vmem:[#allocation9 + $0x1c0] sm:$0xff] }
 0x3ca   :  { %4822 = vmatpush1.bf16.msra.mxu0 %v6417_v37  ;;  %4863 = vmatpush1.bf16.msra.mxu1 %v6419_v41  ;;  %v4912_v37 = vld [vmem:[#allocation9 + $0x20] sm:$0xff]  ;;  %v4909_v41 = vld [vmem:[#allocation9 + $0x8] sm:$0xff] }
 0x3cb   :  { %4823 = vmatprep.subr.bf16.mxu0 %v6426_v44  ;;  %4864 = vmatprep.subr.bf16.mxu1 %v6428_v34  ;;  %v6486_v44 = vcombine.low %v4908_v31, %v4912_v37  ;;  %v6487_v34 = vcombine.high %v4908_v31, %v4912_v37  ;;  %v6488_v42 = vcombine.low %v4909_v41, %v4913_v35  ;;  %v4968_v24 = vld [vmem:[#allocation9 + $0x1e0] sm:$0xff]  ;;  %v4910_v31 = vld [vmem:[#allocation9 + $0x10] sm:$0xff] }
 0x3cc   :  { %v4914_v37 = vld [vmem:[#allocation9 + $0x30] sm:$0xff] }
 0x3ce   :  { %4824 = vmatpush1.bf16.msra.mxu0 %v6425_v43  ;;  %4865 = vmatpush1.bf16.msra.mxu1 %v6427_v57  ;;  %v6489_v43 = vcombine.high %v4909_v41, %v4913_v35  ;;  %v6495_v57 = vcombine.high %v4916_v38, %v4920_v39  ;;  %v4911_v41 = vld [vmem:[#allocation9 + $0x18] sm:$0xff]  ;;  %v6490_v35 = vcombine.low %v4910_v31, %v4914_v37 }
 0x3cf   :  { %4825 = vmatprep.subr.bf16.mxu0 %v6434_v46  ;;  %4866 = vmatprep.subr.bf16.mxu1 %v6436_v47  ;;  %v4917_v46 = vld [vmem:[#allocation9 + $0x48] sm:$0xff] }
 0x3d0   :  { %v4921_v47 = vld [vmem:[#allocation9 + $0x68] sm:$0xff] }
 0x3d1   :  { %v6497_v49 = vcombine.high %v4917_v46, %v4921_v47 }
 0x3d2   :  { %4826 = vmatpush1.bf16.msra.mxu0 %v6433_v52  ;;  %4867 = vmatpush1.bf16.msra.mxu1 %v6435_v19  ;;  %v4929_v52 = vld [vmem:[#allocation9 + $0xa8] sm:$0xff]  ;;  %v6496_v19 = vcombine.low %v4917_v46, %v4921_v47 }
 0x3d3   :  { %4827 = vmatprep.subr.bf16.mxu0 %v6442_v20  ;;  %4868 = vmatprep.subr.bf16.mxu1 %v6444_v32  ;;  %v6503_v20 = vcombine.high %v4924_v48, %v4928_v50  ;;  %v6505_v32 = vcombine.high %v4925_v51, %v4929_v52 }
 0x3d6   :  { %4828 = vmatpush1.bf16.msra.mxu0 %v6441_v56  ;;  %4869 = vmatpush1.bf16.msra.mxu1 %v6443_v26  ;;  %v6502_v56 = vcombine.low %v4924_v48, %v4928_v50  ;;  %v6504_v26 = vcombine.low %v4925_v51, %v4929_v52 }
 0x3d7   :  { %4829 = vmatprep.subr.bf16.mxu0 %v6450_v27  ;;  %4870 = vmatprep.subr.bf16.mxu1 %v6452_v33  ;;  %v6511_v27 = vcombine.high %v4932_v12, %v4936_v53  ;;  %v6513_v33 = vcombine.high %v4933_v54, %v4937_v55 }
 0x3da   :  { %4830 = vmatpush1.bf16.msra.mxu0 %v6449_v62  ;;  %4871 = vmatpush1.bf16.msra.mxu1 %v6451_v22  ;;  %v6510_v62 = vcombine.low %v4932_v12, %v4936_v53  ;;  %v6512_v22 = vcombine.low %v4933_v54, %v4937_v55 }
 0x3db   :  { %4831 = vmatprep.subr.bf16.mxu0 %v6458_v63  ;;  %4872 = vmatprep.subr.bf16.mxu1 %v6460_v0  ;;  %v6519_v63 = vcombine.high %v4940_v58, %v4944_v59  ;;  %v6521_v0 = vcombine.high %v4941_v60, %v4945_v61  ;;  %v6485_v59 = vld [vmem:[#allocation7] ss:$0 sm:$0xff] }
 0x3de   :  { %4832 = vmatpush1.bf16.msra.mxu0 %v6457_v5  ;;  %4873 = vmatpush1.bf16.msra.mxu1 %v6459_v6  ;;  %v4949_v5 = vld [vmem:[#allocation9 + $0x148] sm:$0xff]  ;;  %v6527_v6 = vcombine.high %v4948_v3, %v4952_v4 }
 0x3df   :  { %4833 = vmatprep.subr.bf16.mxu0 %v6466_v7  ;;  %4874 = vmatprep.subr.bf16.mxu1 %v6468_v8  ;;  %v4953_v7 = vld [vmem:[#allocation9 + $0x168] sm:$0xff]  ;;  %v6526_v8 = vcombine.low %v4948_v3, %v4952_v4 }
 0x3e0   :  { %v6528_v9 = vcombine.low %v4949_v5, %v4953_v7  ;;  %v6529_v21 = vcombine.high %v4949_v5, %v4953_v7  ;;  %v4930_v7 = vld [vmem:[#allocation9 + $0xb0] sm:$0xff] }
 0x3e2   :  { %4834 = vmatpush1.bf16.msra.mxu0 %v6465_v13  ;;  %4875 = vmatpush1.bf16.msra.mxu1 %v6467_v14  ;;  %v4957_v13 = vld [vmem:[#allocation9 + $0x188] sm:$0xff]  ;;  %v6535_v14 = vcombine.high %v4956_v10, %v4960_v11 }
 0x3e3   :  { %4835 = vmatprep.subr.bf16.mxu0 %v6474_v15  ;;  %4876 = vmatprep.subr.bf16.mxu1 %v6476_v16  ;;  %v4961_v15 = vld [vmem:[#allocation9 + $0x1a8] sm:$0xff]  ;;  %v6534_v16 = vcombine.low %v4956_v10, %v4960_v11 }
 0x3e4   :  { %v6536_v17 = vcombine.low %v4957_v13, %v4961_v15  ;;  %v6537_v18 = vcombine.high %v4957_v13, %v4961_v15  ;;  %v4938_v15 = vld [vmem:[#allocation9 + $0xf0] sm:$0xff] }
 0x3e6   :  { %4836 = vmatpush1.bf16.msra.mxu0 %v6473_v25  ;;  %4877 = vmatpush1.bf16.msra.mxu1 %v6475_v28  ;;  %v4965_v25 = vld [vmem:[#allocation9 + $0x1c8] sm:$0xff]  ;;  %v6543_v28 = vcombine.high %v4964_v23, %v4968_v24 }
 0x3e7   :  { %4837 = vmatprep.subr.bf16.mxu0 %v6482_v29  ;;  %4878 = vmatprep.subr.bf16.mxu1 %v6484_v36  ;;  %v4969_v29 = vld [vmem:[#allocation9 + $0x1e8] sm:$0xff]  ;;  %v6542_v36 = vcombine.low %v4964_v23, %v4968_v24 }
 0x3ea   :  { %4838 = vmatpush1.bf16.msra.mxu0 %v6481_v40  ;;  %4879 = vmatpush1.bf16.msra.mxu1 %v6483_v30  ;;  %v6544_v40 = vcombine.low %v4965_v25, %v4969_v29  ;;  %v6545_v30 = vcombine.high %v4965_v25, %v4969_v29  ;;  %v4946_v29 = vld [vmem:[#allocation9 + $0x130] sm:$0xff] }
 0x3eb   :  { %5292 = vmatprep.subr.bf16.mxu0 %v6487_v34  ;;  %5333 = vmatprep.subr.bf16.mxu1 %v6489_v43  ;;  %v4915_v34 = vld [vmem:[#allocation9 + $0x38] sm:$0xff] }
 0x3ed   :  { %4840 = vmatmul.mubr.bf16.vlgmr.msra.gmra.mrb[20].mxu0 %v7387_v45  ;;  %4881 = vmatmul.mubr.bf16.vlgmr.msra.gmra.mrb[20].mxu1 %v7387_v45  ;;  %v6494_v45 = vcombine.low %v4916_v38, %v4920_v39  ;;  %v6492_v38 = vcombine.low %v4911_v41, %v4915_v34  ;;  %v6493_v39 = vcombine.high %v4911_v41, %v4915_v34  ;;  %v4954_v34 = vld [vmem:[#allocation9 + $0x170] sm:$0xff] }
 0x3ee   :  { %5293 = vmatpush1.bf16.msra.mxu0 %v6486_v44  ;;  %5334 = vmatpush1.bf16.msra.mxu1 %v6488_v42  ;;  %v6491_v44 = vcombine.high %v4910_v31, %v4914_v37  ;;  %v7081_v42 = vmov 0  }
 0x3ef   :  { %5294 = vmatprep.subr.bf16.mxu0 %v6495_v57  ;;  %5335 = vmatprep.subr.bf16.mxu1 %v6497_v49 }
 0x3f0   :  { %5324 = vmatprep.mubr.bf16.mxu0 %v7081_v42  ;;  %5365 = vmatprep.mubr.bf16.mxu1 %v7081_v42 }
 0x3f2   :  { %5295 = vmatpush1.bf16.msra.mxu0 %v6494_v45  ;;  %5336 = vmatpush1.bf16.msra.mxu1 %v6496_v19 }
 0x3f3   :  { %5296 = vmatprep.subr.bf16.mxu0 %v6503_v20  ;;  %5337 = vmatprep.subr.bf16.mxu1 %v6505_v32 }
 0x3f6   :  { %5297 = vmatpush1.bf16.msra.mxu0 %v6502_v56  ;;  %5338 = vmatpush1.bf16.msra.mxu1 %v6504_v26 }
 0x3f7   :  { %5298 = vmatprep.subr.bf16.mxu0 %v6511_v27  ;;  %5339 = vmatprep.subr.bf16.mxu1 %v6513_v33 }
 0x3fa   :  { %5299 = vmatpush1.bf16.msra.mxu0 %v6510_v62  ;;  %5340 = vmatpush1.bf16.msra.mxu1 %v6512_v22  ;;  %v4918_v62 = vld [vmem:[#allocation9 + $0x50] sm:$0xff] }
 0x3fb   :  { %5300 = vmatprep.subr.bf16.mxu0 %v6519_v63  ;;  %5341 = vmatprep.subr.bf16.mxu1 %v6521_v0  ;;  %v4922_v63 = vld [vmem:[#allocation9 + $0x70] sm:$0xff]  ;;  %v4919_v0 = vld [vmem:[#allocation9 + $0x58] sm:$0xff] }
 0x3fc   :  { %v6499_v4 = vcombine.high %v4918_v62, %v4922_v63 }
 0x3fe   :  { %5301 = vmatpush1.bf16.msra.mxu0 %v6518_v1  ;;  %5342 = vmatpush1.bf16.msra.mxu1 %v6520_v2  ;;  %v4923_v1 = vld [vmem:[#allocation9 + $0x78] sm:$0xff] }
 0x3ff   :  { %5302 = vmatprep.subr.bf16.mxu0 %v6527_v6  ;;  %5343 = vmatprep.subr.bf16.mxu1 %v6529_v21  ;;  %v6501_v5 = vcombine.high %v4919_v0, %v4923_v1  ;;  %v4926_v6 = vld [vmem:[#allocation9 + $0x90] sm:$0xff]  ;;  %v6498_v21 = vcombine.low %v4918_v62, %v4922_v63  ;;  %v6500_v10 = vcombine.low %v4919_v0, %v4923_v1  ;;  %v5478_v63 = vld [vmem:[%s7504_s7 + $0x20] sm:$0xff]  ;;  %v5479_v0 = vld [vmem:[%s7504_s7 + $0x28] sm:$0xff] }
 0x400   :  { %v6507_v11 = vcombine.high %v4926_v6, %v4930_v7  ;;  %v5477_v62 = vld [vmem:[%s7504_s7 + $0x18] sm:$0xff]  ;;  %v6702_v1 = vpack.c.bf16 %v5479_v0, %v5478_v63 }
 0x401   :  { %v5662_v0 = vld [vmem:[#allocation15 + $0x10] sm:$0xff] }
 0x402   :  { %5303 = vmatpush1.bf16.msra.mxu0 %v6526_v8  ;;  %5344 = vmatpush1.bf16.msra.mxu1 %v6528_v9  ;;  %v4927_v8 = vld [vmem:[#allocation9 + $0x98] sm:$0xff] }
 0x403   :  { %5304 = vmatprep.subr.bf16.mxu0 %v6535_v14  ;;  %5345 = vmatprep.subr.bf16.mxu1 %v6537_v18  ;;  %v4931_v9 = vld [vmem:[#allocation9 + $0xb8] sm:$0xff]  ;;  %v4934_v14 = vld [vmem:[#allocation9 + $0xd0] sm:$0xff]  ;;  %v6506_v18 = vcombine.low %v4926_v6, %v4930_v7  ;;  %v5483_v6 = vld [vmem:[%s7504_s7 + $0x48] sm:$0xff] }
 0x404   :  { %v6509_v13 = vcombine.high %v4927_v8, %v4931_v9  ;;  %v6508_v23 = vcombine.low %v4927_v8, %v4931_v9  ;;  %v6515_v24 = vcombine.high %v4934_v14, %v4938_v15  ;;  %v5484_v8 = vld [vmem:[%s7504_s7 + $0x50] sm:$0xff]  ;;  %v5485_v9 = vld [vmem:[%s7504_s7 + $0x58] sm:$0xff] }
 0x406   :  { %5305 = vmatpush1.bf16.msra.mxu0 %v6534_v16  ;;  %5346 = vmatpush1.bf16.msra.mxu1 %v6536_v17  ;;  %v4935_v16 = vld [vmem:[#allocation9 + $0xd8] sm:$0xff] }
 0x407   :  { %5306 = vmatprep.subr.bf16.mxu0 %v6543_v28  ;;  %5347 = vmatprep.subr.bf16.mxu1 %v6545_v30  ;;  %v4939_v17 = vld [vmem:[#allocation9 + $0xf8] sm:$0xff]  ;;  %v4942_v28 = vld [vmem:[#allocation9 + $0x110] sm:$0xff]  ;;  %v6514_v30 = vcombine.low %v4934_v14, %v4938_v15 }
 0x408   :  { %v6517_v25 = vcombine.high %v4935_v16, %v4939_v17  ;;  %v6516_v31 = vcombine.low %v4935_v16, %v4939_v17  ;;  %v6523_v37 = vcombine.high %v4942_v28, %v4946_v29  ;;  %v5488_v14 = vld [vmem:[%s7504_s7 + $0x70] sm:$0xff]  ;;  %v5489_v15 = vld [vmem:[%s7504_s7 + $0x78] sm:$0xff]  ;;  %v7084_v17 = vmov 0.0  }
 0x409   :  { %v6717_v16 = vpack.c.bf16 %v5489_v15, %v5488_v14  ;;  %v5750_v14 = vld [vmem:[#allocation18 + $0x28] sm:$0xff] }
 0x40a   :  { %5307 = vmatpush1.bf16.msra.mxu0 %v6542_v36  ;;  %5348 = vmatpush1.bf16.msra.mxu1 %v6544_v40  ;;  %v4943_v36 = vld [vmem:[#allocation9 + $0x118] sm:$0xff] }
 0x40b   :  { %5374 = vmatprep.subr.bf16.mxu0 %v6491_v44  ;;  %5415 = vmatprep.subr.bf16.mxu1 %v6493_v39  ;;  %v4947_v40 = vld [vmem:[#allocation9 + $0x138] sm:$0xff]  ;;  %v4950_v44 = vld [vmem:[#allocation9 + $0x150] sm:$0xff]  ;;  %v6522_v39 = vcombine.low %v4942_v28, %v4946_v29 }
 0x40c   :  { %v6525_v41 = vcombine.high %v4943_v36, %v4947_v40 }
 0x480   :  { %v4759_v43 = vpop.f32.mrb[16].mxu0  ;;  %v4800_v57 = vpop.f32.mrb[16].mxu1 }
 0x481   :  { %v4761_v46 = vpop.f32.mrb[17].mxu0  ;;  %v4802_v47 = vpop.f32.mrb[17].mxu1 }
 0x482   :  { %v4889_v48 = vmax.f32 %v4759_v43, %v4761_v46  ;;  %v4763_v49 = vpop.f32.mrb[18].mxu0  ;;  %v4804_v50 = vpop.f32.mrb[18].mxu1  ;;  %v6531_v43 = vcombine.high %v4950_v44, %v4954_v34  ;;  %v4958_v46 = vld [vmem:[#allocation9 + $0x190] sm:$0xff] }
 0x483   :  { %v4764_v51 = vpop.f32.mrb[19].mxu0  ;;  %v4805_v52 = vpop.f32.mrb[19].mxu1  ;;  %v4963_v49 = vld [vmem:[#allocation9 + $0x1b8] sm:$0xff]  ;;  %v6530_v50 = vcombine.low %v4950_v44, %v4954_v34 }
 0x484   :  { %v4890_v45 = vmax.f32 %v4889_v48, %v4800_v57  ;;  %v4959_v48 = vld [vmem:[#allocation9 + $0x198] sm:$0xff] }
 0x486   :  { %v4891_v19 = vmax.f32 %v4890_v45, %v4802_v47  ;;  %v4962_v47 = vld [vmem:[#allocation9 + $0x1b0] sm:$0xff]  ;;  %v6541_v45 = vcombine.high %v4959_v48, %v4963_v49 }
 0x487   :  { %v6539_v52 = vcombine.high %v4958_v46, %v4962_v47 }
 0x4c0   :  { %v4841_v20 = vpop.f32.mrb[20].mxu0  ;;  %v4882_v32 = vpop.f32.mrb[20].mxu1 }
 0x4c1   :  { %v4892_v12 = vmax.f32 %v4891_v19, %v4841_v20  ;;  %v4843_v53 = vpop.f32.mrb[21].mxu0  ;;  %v4884_v54 = vpop.f32.mrb[21].mxu1  ;;  %v4966_v19 = vld [vmem:[#allocation9 + $0x1d0] sm:$0xff] }
 0x4c2   :  { %v4845_v55 = vpop.f32.mrb[22].mxu0  ;;  %v4886_v56 = vpop.f32.mrb[22].mxu1  ;;  %v4970_v20 = vld [vmem:[#allocation9 + $0x1f0] sm:$0xff] }
 0x4c3   :  { %v4893_v26 = vmax.f32 %v4892_v12, %v4843_v53  ;;  %v4846_v27 = vpop.f32.mrb[23].mxu0  ;;  %v4887_v33 = vpop.f32.mrb[23].mxu1  ;;  %v4971_v12 = vld [vmem:[#allocation9 + $0x1f8] sm:$0xff]  ;;  %v6538_v53 = vcombine.low %v4958_v46, %v4962_v47  ;;  %v6547_v55 = vcombine.high %v4966_v19, %v4970_v20 }
 0x4c4   :  { %v5474_v33 = vld [vmem:[%s7504_s7] sm:$0xff] }
 0x4c5   :  { %v4894_v58 = vmax.f32 %v4893_v26, %v4882_v32  ;;  %v4967_v32 = vld [vmem:[#allocation9 + $0x1d8] sm:$0xff]  ;;  %v6546_v26 = vcombine.low %v4966_v19, %v4970_v20  ;;  %v5572_v20 = vld [vmem:[%s7506_s9 + $0x10] sm:$0xff] }
 0x4c6   :  { %v6549_v56 = vcombine.high %v4967_v32, %v4971_v12  ;;  %v6548_v27 = vcombine.low %v4967_v32, %v4971_v12  ;;  %v5573_v32 = vld [vmem:[%s7506_s9 + $0x18] sm:$0xff] }
 0x4c7   :  { %v4895_v60 = vmax.f32 %v4894_v58, %v4884_v54  ;;  %v6540_v54 = vcombine.low %v4959_v48, %v4963_v49  ;;  %v5475_v58 = vld [vmem:[%s7504_s7 + $0x8] sm:$0xff]  ;;  %v6550_v48 = vld [vmem:[#allocation10] ss:$0 sm:$0xff] }
 0x4c9   :  { %v4903_v61 = vadd.f32 %v6485_v59, %v4895_v60  ;;  %v5476_v59 = vld [vmem:[%s7504_s7 + $0x10] sm:$0xff]  ;;  %v7082_v60 = vmov 0.0|0.0  }
 0x4cb   :  { %vm4904_vm2 = vcmp.gt.f32.partialorder %v4903_v61, 0.0  ;;  %v4905_v22 = vmul.f32 0.2, %v4903_v61 }
 0x4cd   :  { %v4906_v2 = vsel %vm4904_vm2, %v4903_v61, %v4905_v22  ;;  %v6696_v61 = vpack.c.bf16 %v5475_v58, %v5474_v33  ;;  %v6699_v22 = vpack.c.bf16 %v5477_v62, %v5476_v59  ;;  %v6551_v58 = vld [vmem:[#allocation12] ss:$0 sm:$0xff] }
 0x4ce   :  { %v7393_v3 = vpack.c.bf16 %v4906_v2, %v4906_v2  ;;  %v5480_v2 = vld [vmem:[%s7504_s7 + $0x30] sm:$0xff] }
 0x4d0   :  { %5325 = vmatmul.mubr.bf16.vlgmr.msra.gmra.mrb[24].mxu0 %v7393_v3  ;;  %5366 = vmatmul.mubr.bf16.vlgmr.msra.gmra.mrb[24].mxu1 %v7393_v3 }
 0x4d1   :  { %5375 = vmatpush1.bf16.msra.mxu0 %v6490_v35  ;;  %5416 = vmatpush1.bf16.msra.mxu1 %v6492_v38  ;;  %v4951_v35 = vld [vmem:[#allocation9 + $0x158] sm:$0xff] }
 0x4d2   :  { %5376 = vmatprep.subr.bf16.mxu0 %v6499_v4  ;;  %5417 = vmatprep.subr.bf16.mxu1 %v6501_v5  ;;  %v4955_v38 = vld [vmem:[#allocation9 + $0x178] sm:$0xff] }
 0x4d3   :  { %5406 = vmatprep.mubr.bf16.mxu0 %v7081_v42  ;;  %5447 = vmatprep.mubr.bf16.mxu1 %v7081_v42  ;;  %v6524_v42 = vcombine.low %v4943_v36, %v4947_v40  ;;  %v6533_v57 = vcombine.high %v4951_v35, %v4955_v38  ;;  %v6532_v51 = vcombine.low %v4951_v35, %v4955_v38  ;;  %v5482_v5 = vld [vmem:[%s7504_s7 + $0x40] sm:$0xff] }
 0x4d4   :  { %v6708_v7 = vpack.c.bf16 %v5483_v6, %v5482_v5 }
 0x4d5   :  { %5377 = vmatpush1.bf16.msra.mxu0 %v6498_v21  ;;  %5418 = vmatpush1.bf16.msra.mxu1 %v6500_v10  ;;  %v6711_v21 = vpack.c.bf16 %v5485_v9, %v5484_v8  ;;  %v5486_v10 = vld [vmem:[%s7504_s7 + $0x60] sm:$0xff]  ;;  %v5747_v9 = vld [vmem:[#allocation18 + $0x10] sm:$0xff] }
 0x4d6   :  { %5378 = vmatprep.subr.bf16.mxu0 %v6507_v11  ;;  %5419 = vmatprep.subr.bf16.mxu1 %v6509_v13  ;;  %v5487_v11 = vld [vmem:[%s7504_s7 + $0x68] sm:$0xff] }
 0x4d7   :  { %v6714_v13 = vpack.c.bf16 %v5487_v11, %v5486_v10 }
 0x4d9   :  { %5379 = vmatpush1.bf16.msra.mxu0 %v6506_v18  ;;  %5420 = vmatpush1.bf16.msra.mxu1 %v6508_v23 }
 0x4da   :  { %5380 = vmatprep.subr.bf16.mxu0 %v6515_v24  ;;  %5421 = vmatprep.subr.bf16.mxu1 %v6517_v25 }
 0x4dd   :  { %5381 = vmatpush1.bf16.msra.mxu0 %v6514_v30  ;;  %5422 = vmatpush1.bf16.msra.mxu1 %v6516_v31 }
 0x4de   :  { %5382 = vmatprep.subr.bf16.mxu0 %v6523_v37  ;;  %5423 = vmatprep.subr.bf16.mxu1 %v6525_v41 }
 0x4e1   :  { %5383 = vmatpush1.bf16.msra.mxu0 %v6522_v39  ;;  %5424 = vmatpush1.bf16.msra.mxu1 %v6524_v42 }
 0x4e2   :  { %5384 = vmatprep.subr.bf16.mxu0 %v6531_v43  ;;  %5425 = vmatprep.subr.bf16.mxu1 %v6533_v57 }
 0x4e5   :  { %5385 = vmatpush1.bf16.msra.mxu0 %v6530_v50  ;;  %5426 = vmatpush1.bf16.msra.mxu1 %v6532_v51  ;;  %v5570_v50 = vld [vmem:[%s7506_s9] sm:$0xff]  ;;  %v5571_v51 = vld [vmem:[%s7506_s9 + $0x8] sm:$0xff] }
 0x4e6   :  { %5386 = vmatprep.subr.bf16.mxu0 %v6539_v52  ;;  %5427 = vmatprep.subr.bf16.mxu1 %v6541_v45  ;;  %v6720_v19 = vpack.c.bf16 %v5571_v51, %v5570_v50 }
 0x4e9   :  { %5387 = vmatpush1.bf16.msra.mxu0 %v6538_v53  ;;  %5428 = vmatpush1.bf16.msra.mxu1 %v6540_v54  ;;  %v6723_v53 = vpack.c.bf16 %v5573_v32, %v5572_v20  ;;  %v5574_v54 = vld [vmem:[%s7506_s9 + $0x20] sm:$0xff] }
 0x4ea   :  { %5388 = vmatprep.subr.bf16.mxu0 %v6547_v55  ;;  %5429 = vmatprep.subr.bf16.mxu1 %v6549_v56  ;;  %v5575_v55 = vld [vmem:[%s7506_s9 + $0x28] sm:$0xff] }
 0x4eb   :  { %v6726_v56 = vpack.c.bf16 %v5575_v55, %v5574_v54 }
 0x4ed   :  { %5389 = vmatpush1.bf16.msra.mxu0 %v6546_v26  ;;  %5430 = vmatpush1.bf16.msra.mxu1 %v6548_v27  ;;  %v5660_v26 = vld [vmem:[#allocation15] sm:$0xff]  ;;  %v5661_v27 = vld [vmem:[#allocation15 + $0x8] sm:$0xff] }
 0x4ee   :  { %6695 = vmatprep.subr.bf16.mxu0 %v7082_v60  ;;  %6728 = vmatprep.subr.bf16.mxu1 %v7082_v60  ;;  %v6729_v33 = vpack.c.bf16 %v5661_v27, %v5660_v26 }
 0x4f0   :  { %5407 = vmatmul.mubr.bf16.vlgmr.msra.gmra.mrb[28].mxu0 %v7393_v3  ;;  %5448 = vmatmul.mubr.bf16.vlgmr.msra.gmra.mrb[28].mxu1 %v7393_v3  ;;  %v5481_v3 = vld [vmem:[%s7504_s7 + $0x38] sm:$0xff] }
 0x4f1   :  { %6697 = vmatpush3.bf16.msra.mxu0 %v6696_v61  ;;  %v6705_v4 = vpack.c.bf16 %v5481_v3, %v5480_v2  ;;  %6633 = vmatprep.mubr.msk.f32.mxu0 %vm7083_vm3, %v7084_v17  ;;  %v5745_v3 = vld [vmem:[#allocation18] sm:$0xff] }
 0x4f2   :  { %6698 = vmatprep.subr.bf16.mxu0 %v7082_v60  ;;  %6657 = vmatprep.mubr.msk.f32.mxu1 %vm7083_vm3, %v7084_v17 }
 0x4f3   :  { %6730 = vmatpush3.bf16.msra.mxu1 %v6729_v33 }
 0x4f4   :  { %6655 = vmatprep.subr.mxu1 %v7084_v17 }
 0x4f5   :  { %6700 = vmatpush3.bf16.msra.mxu0 %v6699_v22 }
 0x4f6   :  { %6701 = vmatprep.subr.bf16.mxu0 %v7082_v60 }
 0x4f7   :  { %6656 = vmatpush3.msra.mxu1 %v5662_v0 }
 0x4f8   :  { %6731 = vmatprep.subr.bf16.mxu1 %v7082_v60 }
 0x4f9   :  { %6703 = vmatpush3.bf16.msra.mxu0 %v6702_v1  ;;  %v6552_v1 = vld [vmem:[#allocation13] ss:$0 sm:$0xff] }
 0x4fa   :  { %6704 = vmatprep.subr.bf16.mxu0 %v7082_v60 }
 0x4fd   :  { %6706 = vmatpush3.bf16.msra.mxu0 %v6705_v4  ;;  %v5746_v4 = vld [vmem:[#allocation18 + $0x8] sm:$0xff] }
 0x4fe   :  { %6707 = vmatprep.subr.bf16.mxu0 %v7082_v60  ;;  %v6732_v8 = vpack.c.bf16 %v5746_v4, %v5745_v3 }
 0x501   :  { %6709 = vmatpush3.bf16.msra.mxu0 %v6708_v7 }
 0x502   :  { %6710 = vmatprep.subr.bf16.mxu0 %v7082_v60 }
 0x505   :  { %6712 = vmatpush3.bf16.msra.mxu0 %v6711_v21  ;;  %v5748_v21 = vld [vmem:[#allocation18 + $0x18] sm:$0xff] }
 0x506   :  { %6713 = vmatprep.subr.bf16.mxu0 %v7082_v60  ;;  %v6735_v11 = vpack.c.bf16 %v5748_v21, %v5747_v9 }
 0x509   :  { %6715 = vmatpush3.bf16.msra.mxu0 %v6714_v13  ;;  %v5749_v13 = vld [vmem:[#allocation18 + $0x20] sm:$0xff] }
 0x50a   :  { %6716 = vmatprep.subr.bf16.mxu0 %v7082_v60  ;;  %v6738_v15 = vpack.c.bf16 %v5750_v14, %v5749_v13 }
 0x50d   :  { %6718 = vmatpush3.bf16.msra.mxu0 %v6717_v16  ;;  %v5751_v16 = vld [vmem:[#allocation18 + $0x30] sm:$0xff] }
 0x50e   :  { %6719 = vmatprep.subr.bf16.mxu0 %v7082_v60 }
 0x5a3   :  { %v5326_v18 = vpop.f32.mrb[24].mxu0  ;;  %v5367_v23 = vpop.f32.mrb[24].mxu1 }
 0x5a4   :  { %v5328_v24 = vpop.f32.mrb[25].mxu0  ;;  %v5369_v25 = vpop.f32.mrb[25].mxu1 }
 0x5a5   :  { %v5456_v28 = vmax.f32 %v5326_v18, %v5328_v24  ;;  %v5330_v29 = vpop.f32.mrb[26].mxu0  ;;  %v5371_v36 = vpop.f32.mrb[26].mxu1  ;;  %v5752_v18 = vld [vmem:[#allocation18 + $0x38] sm:$0xff]  ;;  %v5753_v24 = vld [vmem:[#allocation18 + $0x40] sm:$0xff] }
 0x5a6   :  { %v5331_v40 = vpop.f32.mrb[27].mxu0  ;;  %v5372_v30 = vpop.f32.mrb[27].mxu1  ;;  %v5756_v29 = vld [vmem:[#allocation18 + $0x58] sm:$0xff] }
 0x5a7   :  { %v5457_v31 = vmax.f32 %v5456_v28, %v5367_v23  ;;  %v6741_v23 = vpack.c.bf16 %v5752_v18, %v5751_v16  ;;  %v5757_v40 = vld [vmem:[#allocation18 + $0x60] sm:$0xff]  ;;  %v5758_v30 = vld [vmem:[#allocation18 + $0x68] sm:$0xff] }
 0x5a9   :  { %v5458_v37 = vmax.f32 %v5457_v31, %v5369_v25  ;;  %v5754_v25 = vld [vmem:[#allocation18 + $0x48] sm:$0xff]  ;;  %v6750_v31 = vpack.c.bf16 %v5758_v30, %v5757_v40 }
 0x5aa   :  { %v6744_v28 = vpack.c.bf16 %v5754_v25, %v5753_v24 }
 0x5c3   :  { %v5408_v41 = vpop.f32.mrb[28].mxu0  ;;  %v5449_v44 = vpop.f32.mrb[28].mxu1 }
 0x5c4   :  { %v5459_v34 = vmax.f32 %v5458_v37, %v5408_v41  ;;  %v5410_v35 = vpop.f32.mrb[29].mxu0  ;;  %v5451_v38 = vpop.f32.mrb[29].mxu1  ;;  %v5759_v37 = vld [vmem:[#allocation18 + $0x70] sm:$0xff]  ;;  %v5760_v41 = vld [vmem:[#allocation18 + $0x78] sm:$0xff] }
 0x5c5   :  { %v5412_v39 = vpop.f32.mrb[30].mxu0  ;;  %v5453_v42 = vpop.f32.mrb[30].mxu1 }
 0x5c6   :  { %v5460_v43 = vmax.f32 %v5459_v34, %v5410_v35  ;;  %v5413_v57 = vpop.f32.mrb[31].mxu0  ;;  %v5454_v46 = vpop.f32.mrb[31].mxu1  ;;  %v6554_v34 = vld [vmem:[#allocation16] ss:$0 sm:$0xff] }
 0x5c8   :  { %v5461_v47 = vmax.f32 %v5460_v43, %v5449_v44  ;;  %v6753_v44 = vpack.c.bf16 %v5760_v41, %v5759_v37 }
 0x5ca   :  { %v5462_v49 = vmax.f32 %v5461_v47, %v5451_v38 }
 0x5cc   :  { %v5470_v52 = vadd.f32 %v6550_v48, %v5462_v49 }
 0x5ce   :  { %v5472_v45 = vmul.f32 0.2, %v5470_v52  ;;  %vm5471_vm4 = vcmp.gt.f32.partialorder %v5470_v52, 0.0 }
 0x5d0   :  { %v5473_v12 = vsel %vm5471_vm4, %v5470_v52, %v5472_v45 }
 0x5d1   :  { %6634 = vmatmul.mubr.f32.vlgmr.msra.gmra.mrb[32].mxu0 %v5473_v12 }
 0x5d2   :  { %6721 = vmatpush3.bf16.msra.mxu0 %v6720_v19  ;;  %6648 = vmatprep.mubr.msk.f32.mxu0 %vm7083_vm3, %v7084_v17 }
 0x5d3   :  { %6722 = vmatprep.subr.bf16.mxu0 %v7082_v60 }
 0x5d6   :  { %6724 = vmatpush3.bf16.msra.mxu0 %v6723_v53 }
 0x5d7   :  { %6725 = vmatprep.subr.bf16.mxu0 %v7082_v60 }
 0x5da   :  { %6727 = vmatpush3.bf16.msra.mxu0 %v6726_v56 }
 0x6a4   :  { %v5563_v59 = vpop.f32.mrb[32].mxu0 }
 0x6a5   :  { %v5564_v61 = vadd.f32 %v6551_v58, %v5563_v59  ;;  %v6635_v62 = vpop.f32.mrb[33].mxu0 }
 0x6a7   :  { %vm5567_vm5 = vcmp.gt.f32.partialorder %v5564_v61, 0.0  ;;  %v5568_v22 = vmul.f32 0.2, %v5564_v61 }
 0x6a9   :  { %v5569_v63 = vsel %vm5567_vm5, %v5564_v61, %v5568_v22 }
 0x6aa   :  { %6649 = vmatmul.mubr.msk.f32.vlgmr.msra.gmra.mrb[34].mxu0 %vm5583_vm6, %v5569_v63 }
 0x77d   :  { %v5653_v2 = vpop.f32.mrb[34].mxu0 }
 0x77e   :  { %v5654_v5 = vadd.f32 %v6552_v1, %v5653_v2  ;;  %v6650_v6 = vpop.f32.mrb[35].mxu0 }
 0x780   :  { %vm5657_vm7 = vcmp.gt.f32.partialorder %v5654_v5, 0.0  ;;  %v5658_v7 = vmul.f32 0.2, %v5654_v5 }
 0x782   :  { %v5659_v10 = vsel %vm5657_vm7, %v5654_v5, %v5658_v7 }
 0x783   :  { %6658 = vmatmul.mubr.msk.f32.vlgmr.msra.gmra.mrb[32].mxu1 %vm5670_vm8, %v5659_v10 }
 0x784   :  { %6733 = vmatpush3.bf16.msra.mxu1 %v6732_v8  ;;  %6692 = vmatprep.mubr.msk.f32.mxu1 %vm7083_vm3, %v7084_v17  ;;  %v5755_v17 = vld [vmem:[#allocation18 + $0x50] sm:$0xff] }
 0x785   :  { %6734 = vmatprep.subr.bf16.mxu1 %v7082_v60  ;;  %v6747_v36 = vpack.c.bf16 %v5756_v29, %v5755_v17 }
 0x788   :  { %6736 = vmatpush3.bf16.msra.mxu1 %v6735_v11 }
 0x789   :  { %6737 = vmatprep.subr.bf16.mxu1 %v7082_v60 }
 0x78c   :  { %6739 = vmatpush3.bf16.msra.mxu1 %v6738_v15 }
 0x78d   :  { %6740 = vmatprep.subr.bf16.mxu1 %v7082_v60 }
 0x790   :  { %6742 = vmatpush3.bf16.msra.mxu1 %v6741_v23 }
 0x791   :  { %6743 = vmatprep.subr.bf16.mxu1 %v7082_v60 }
 0x794   :  { %6745 = vmatpush3.bf16.msra.mxu1 %v6744_v28 }
 0x795   :  { %6746 = vmatprep.subr.bf16.mxu1 %v7082_v60 }
 0x798   :  { %6748 = vmatpush3.bf16.msra.mxu1 %v6747_v36 }
 0x799   :  { %6749 = vmatprep.subr.bf16.mxu1 %v7082_v60 }
 0x79c   :  { %6751 = vmatpush3.bf16.msra.mxu1 %v6750_v31 }
 0x79d   :  { %6752 = vmatprep.subr.bf16.mxu1 %v7082_v60 }
 0x7a0   :  { %6754 = vmatpush3.bf16.msra.mxu1 %v6753_v44 }
 0x856   :  { %v5740_v35 = vpop.f32.mrb[32].mxu1 }
 0x857   :  { %v5741_v38 = vadd.f32 %v6554_v34, %v5740_v35  ;;  %v6659_v39 = vpop.f32.mrb[33].mxu1 }
 0x859   :  { %v5744_v42 = vmul.f32 %v5741_v38, %v5741_v38 }
 0x85b   :  { %6693 = vmatmul.mubr.f32.vlgmr.msra.gmra.mrb[34].mxu1 %v5744_v42 }
 0x92e   :  { %v5827_v43 = vpop.f32.mrb[34].mxu1 }
 0x92f   :  { %v5831_v57 = vmax.f32 %v5827_v43, 1e-12  ;;  %v6694_v46 = vpop.f32.mrb[35].mxu1 }
 0x931   :  { %6808 = vrsqrt.f32 %v5831_v57 }
 0x93b   :  { %v6809_v47 = vpop.eup %6808 }
 0x93c   :  { %v5833_v48 = vmul.f32 %v6809_v47, %v5741_v38 }
 0x93e   :  { %5834 = vst [vmem:[%s7511_s14] sm:$0xff] %v5833_v48 }
 0x93f   :  { %5839 = vsyncpa [#allocation3], 1 }
 0x940   :  { %5840 = vsyncpa [#allocation5], 1 }
 0x941   :  { %5841 = vsyncpa [#allocation8], 1 }
 0x942   :  { %5842 = vsyncpa [#allocation11], 1 }
 0x943   :  { %5843 = vsyncpa [#allocation14], 1 }
 0x944   :  { %5844 = vsyncpa [#allocation17], 1 }

</bundles_post_ra>
